<compile_context>
chip_gen: v7x
topology: tpu7x:2x2x1
jax: 0.10.0
libtpu: 0.0.40
codegen_flags: <defaults>
</compile_context>

<pallas_src>
import jax
import jax.numpy as jnp
from jax.experimental import pallas as pl
from jax.experimental.pallas import tpu as pltpu


def _round_up(x, m):
    return ((x + m - 1) // m) * m


def _vmem_budget_bytes():
    # ~7/8 of physical VMEM, capped: 112 MiB on v5e/v6e (128 MiB phys),
    # 56 MiB on v7x (64 MiB phys).  Falls back to the conservative 56 MiB.
    try:
        cap = int(pltpu.get_tpu_info().vmem_capacity_bytes)
    except Exception:
        cap = 64 * 1024 * 1024
    return int(min(cap * 7 // 8, 112 * 1024 * 1024))


# ----------------------------------------------------------------------------
# Kernel A: LSTM recurrence + LayerNorm + online logsumexp statistics
# ----------------------------------------------------------------------------
def _recurrence_stats_kernel(features_ref, emb_ref, wih_ref, whh_ref, b_ref,
                             gamma_ref, beta_ref, wlin_ref, blin_ref,
                             y_ref, lse_ref,
                             h_scr, c_scr, m_scr, l_scr):
    Bb, Tc, E = emb_ref.shape
    H = h_scr.shape[1]
    cdt = whh_ref.dtype                       # MXU operand dtype (bf16 or f32)

    t = pl.program_id(1)
    v = pl.program_id(2)

    @pl.when(v == 0)
    def _recurrence_and_layernorm():
        w_ih = wih_ref[...]
        w_hh = whh_ref[...]
        bias = b_ref[...]                     # (1, 4H) f32 = b_ih + b_hh

        def cell(x_gates, h, c):
            # x_gates already contains x @ W_ih + bias.  PyTorch gate order
            # i, f, g, o.  NOTE: H multiple of 128 keeps these lane slices
            # vreg-aligned; other H lowers to cross-lane moves (still correct).
            gates = x_gates + jnp.dot(h.astype(cdt), w_hh,
                                      preferred_element_type=jnp.float32)
            i = jax.nn.sigmoid(gates[:, 0 * H:1 * H])
            f = jax.nn.sigmoid(gates[:, 1 * H:2 * H])
            g = jnp.tanh(gates[:, 2 * H:3 * H])
            o = jax.nn.sigmoid(gates[:, 3 * H:4 * H])
            c_new = f * c + i * g
            return o * jnp.tanh(c_new), c_new

        # Chunk 0 also performs "x = self.lstm(features)" from zero state.
        @pl.when(t == 0)
        def _bootstrap():
            x0 = jnp.dot(features_ref[...], w_ih,
                         preferred_element_type=jnp.float32) + bias
            h1, c1 = cell(x0, jnp.zeros((Bb, H), jnp.float32),
                          jnp.zeros((Bb, H), jnp.float32))
            h_scr[...] = h1
            c_scr[...] = c1

        # Batched input projection for the whole chunk; bias folded in once so
        # it is not re-broadcast on the serial chain.
        x = emb_ref[...].reshape(Bb * Tc, E)
        xg = (jnp.dot(x, w_ih, preferred_element_type=jnp.float32)
              + bias).reshape(Bb, Tc, 4 * H)

        # Serial recurrence: only h @ W_hh is sequential.  Raw h_t collected in
        # a Python list; LayerNorm is applied batched AFTER the loop (off the
        # latency-bound per-timestep dependency chain).
        h = h_scr[...]
        c = c_scr[...]
        hs = []
        for tt in range(Tc):
            h, c = cell(xg[:, tt, :], h, c)
            hs.append(h)
        h_scr[...] = h
        c_scr[...] = c

        h_chunk = jnp.stack(hs, axis=1)                     # (Bb, Tc, H) f32
        mean = jnp.mean(h_chunk, axis=-1, keepdims=True)
        var = jnp.mean((h_chunk - mean) ** 2, axis=-1, keepdims=True)
        y = ((h_chunk - mean) * jax.lax.rsqrt(var + 1e-5)
             * gamma_ref[...] + beta_ref[...])
        y_ref[...] = y.astype(y_ref.dtype)                  # single dense store

        # Reset the online logsumexp state for this (b, t) chunk.
        m_scr[...] = jnp.full_like(m_scr, -1e30)
        l_scr[...] = jnp.zeros_like(l_scr)

    # Every v: online logsumexp update over one (H, Vt) slab of W_lin.
    y2d = y_ref[...].reshape(Bb * Tc, H).astype(cdt)
    logits = (jnp.dot(y2d, wlin_ref[...], preferred_element_type=jnp.float32)
              + blin_ref[...])                              # (Bb*Tc, Vt) f32
    m_prev = m_scr[...]
    m_new = jnp.maximum(m_prev, jnp.max(logits, axis=-1, keepdims=True))
    l_scr[...] = (l_scr[...] * jnp.exp(m_prev - m_new)
                  + jnp.sum(jnp.exp(logits - m_new), axis=-1, keepdims=True))
    m_scr[...] = m_new

    @pl.when(v == pl.num_programs(2) - 1)
    def _finalize_lse():
        lse = m_scr[...] + jnp.log(l_scr[...])
        lse_ref[...] = lse.reshape(Bb, Tc, 1)


# ----------------------------------------------------------------------------
# Kernel B: vocab projection + log-prob output (second pass over V tiles)
# ----------------------------------------------------------------------------
def _vocab_logprob_kernel(y_ref, lse_ref, wlin_ref, blin_ref, out_ref):
    Bb, Tc, H = y_ref.shape
    Vt = out_ref.shape[2]
    y2d = y_ref[...].reshape(Bb * Tc, H)
    logits = (jnp.dot(y2d, wlin_ref[...], preferred_element_type=jnp.float32)
              + blin_ref[...]).reshape(Bb, Tc, Vt)
    out_ref[...] = (logits - lse_ref[...]).astype(out_ref.dtype)


# ----------------------------------------------------------------------------
# Wrapper
# ----------------------------------------------------------------------------
def decoder_nic_paper(features, caption, params, *, chunk=32, v_tile=2048,
                      batch_block=8, compute_dtype=jnp.bfloat16,
                      out_dtype=jnp.float32):
    """features: (B, embed_dim); caption: (B, T) int32 -> (B, T-1, V) log-probs."""
    B, E = features.shape
    T = caption.shape[1]
    steps = T - 1
    H = params["w_hh"].shape[0]
    V = params["w_lin"].shape[1]

    # ---- tiling -------------------------------------------------------------
    Bp = _round_up(B, 8)                      # batch padded to a sublane tile
    Bb = min(_round_up(batch_block, 8), Bp)   # batch block (parallel grid axis)
    if Bp % Bb:
        Bb = Bp
    # Tc timesteps per chunk (multiple of 8, capped to the padded sequence).
    # Default chunk=32 -> Bb*Tc = 256 rows fills MXU rows on v6e/v7x.
    Tc = min(_round_up(max(chunk, 8), 8), _round_up(steps, 8))
    Sp = _round_up(steps, Tc)
    # Vocab tile: lane-dense multiple of 128; W_lin is never fully resident.
    Vt = min(_round_up(min(v_tile, V), 128), _round_up(V, 128))
    Vp = _round_up(V, Vt)

    # ---- operand prep (layout plumbing / glue only) --------------------------
    cdt = compute_dtype
    feats = jnp.pad(features, ((0, Bp - B), (0, 0))).astype(cdt)
    # Embedding lookup (gather) stays as JAX glue outside the kernel.
    emb_seq = jnp.take(params["emb"], caption[:, :steps], axis=0)
    emb_seq = jnp.pad(emb_seq, ((0, Bp - B), (0, Sp - steps), (0, 0))).astype(cdt)

    w_ih = params["w_ih"].astype(cdt)
    w_hh = params["w_hh"].astype(cdt)
    bias = params["b"].astype(jnp.float32)
    gamma = params["ln_gamma"].astype(jnp.float32)
    beta = params["ln_beta"].astype(jnp.float32)
    # Padded (ghost) vocab columns get a huge negative bias so they contribute
    # nothing to the logsumexp; they are sliced off from the output below.
    w_lin = jnp.pad(params["w_lin"].astype(cdt), ((0, 0), (0, Vp - V)))
    b_lin = jnp.pad(params["b_lin"].astype(jnp.float32), ((0, 0), (0, Vp - V)),
                    constant_values=-1e30)

    vmem_limit = _vmem_budget_bytes()

    def const_spec(shape):
        # Grid-invariant operand: constant index map + single-buffered.
        return pl.BlockSpec(shape, lambda b, t, v: (0,) * len(shape),
                            pipeline_mode=pl.Buffered(1))

    # ---- pass 1: recurrence + LayerNorm + logsumexp stats ---------------------
    y, lse = pl.pallas_call(
        _recurrence_stats_kernel,
        out_shape=(jax.ShapeDtypeStruct((Bp, Sp, H), cdt),
                   jax.ShapeDtypeStruct((Bp, Sp, 1), jnp.float32)),
        grid_spec=pltpu.PrefetchScalarGridSpec(
            num_scalar_prefetch=0,
            grid=(Bp // Bb, Sp // Tc, Vp // Vt),
            in_specs=[
                pl.BlockSpec((Bb, E), lambda b, t, v: (b, 0)),         # features
                pl.BlockSpec((Bb, Tc, E), lambda b, t, v: (b, t, 0)),  # emb chunk
                const_spec((E, 4 * H)),                                # W_ih^T
                const_spec((H, 4 * H)),                                # W_hh^T
                const_spec((1, 4 * H)),                                # b_ih+b_hh
                const_spec((1, H)),                                    # ln gamma
                const_spec((1, H)),                                    # ln beta
                pl.BlockSpec((H, Vt), lambda b, t, v: (0, v)),         # W_lin tile
                pl.BlockSpec((1, Vt), lambda b, t, v: (0, v)),         # b_lin tile
            ],
            out_specs=[
                pl.BlockSpec((Bb, Tc, H), lambda b, t, v: (b, t, 0)),  # y
                pl.BlockSpec((Bb, Tc, 1), lambda b, t, v: (b, t, 0)),  # lse
            ],
            scratch_shapes=[
                pltpu.VMEM((Bb, H), jnp.float32),        # h carry
                pltpu.VMEM((Bb, H), jnp.float32),        # c carry
                pltpu.VMEM((Bb * Tc, 1), jnp.float32),   # running max m
                pltpu.VMEM((Bb * Tc, 1), jnp.float32),   # running sumexp l
            ],
        ),
        compiler_params=pltpu.CompilerParams(
            # batch axis is parallel (2 TCs on v7x); time/V are serial.
            dimension_semantics=("parallel", "arbitrary", "arbitrary"),
            vmem_limit_bytes=vmem_limit,
        ),
    )(feats, emb_seq, w_ih, w_hh, bias, gamma, beta, w_lin, b_lin)

    # ---- pass 2: vocab projection + log-probs (V tile outermost so each W_lin
    # slab is streamed from HBM exactly once) ----------------------------------
    out = pl.pallas_call(
        _vocab_logprob_kernel,
        out_shape=jax.ShapeDtypeStruct((Bp, Sp, Vp), out_dtype),
        grid_spec=pltpu.PrefetchScalarGridSpec(
            num_scalar_prefetch=0,
            grid=(Vp // Vt, Bp // Bb, Sp // Tc),
            in_specs=[
                pl.BlockSpec((Bb, Tc, H), lambda v, b, t: (b, t, 0)),  # y
                pl.BlockSpec((Bb, Tc, 1), lambda v, b, t: (b, t, 0)),  # lse
                pl.BlockSpec((H, Vt), lambda v, b, t: (0, v)),         # W_lin tile
                pl.BlockSpec((1, Vt), lambda v, b, t: (0, v)),         # b_lin tile
            ],
            out_specs=pl.BlockSpec((Bb, Tc, Vt), lambda v, b, t: (b, t, v)),
        ),
        compiler_params=pltpu.CompilerParams(
            dimension_semantics=("parallel", "parallel", "arbitrary"),
            vmem_limit_bytes=vmem_limit,
        ),
    )(y, lse, w_lin, b_lin)

    # Output is already in (B, T-1, V) layout; strip padding only.
    return out[:B, :steps, :V]


# ----------------------------------------------------------------------------
# Pure-JAX reference of nic_paper (optionally casting MXU operands)
# ----------------------------------------------------------------------------
def decoder_reference(features, caption, params, compute_dtype=jnp.float32):
    B, _ = features.shape
    H = params["w_hh"].shape[0]
    cdt = compute_dtype
    w_ih = params["w_ih"].astype(cdt)
    w_hh = params["w_hh"].astype(cdt)
    w_lin = params["w_lin"].astype(cdt)

    def cell(x, h, c):
        gates = (jnp.dot(x.astype(cdt), w_ih, preferred_element_type=jnp.float32)
                 + jnp.dot(h.astype(cdt), w_hh, preferred_element_type=jnp.float32)
                 + params["b"])
        i = jax.nn.sigmoid(gates[:, 0 * H:1 * H])
        f = jax.nn.sigmoid(gates[:, 1 * H:2 * H])
        g = jnp.tanh(gates[:, 2 * H:3 * H])
        o = jax.nn.sigmoid(gates[:, 3 * H:4 * H])
        c_new = f * c + i * g
        return o * jnp.tanh(c_new), c_new

    h = jnp.zeros((B, H), jnp.float32)
    c = jnp.zeros((B, H), jnp.float32)
    h, c = cell(features, h, c)
    outs = []
    for t in range(caption.shape[1] - 1):
        e = jnp.take(params["emb"], caption[:, t], axis=0)
        h, c = cell(e, h, c)
        mean = jnp.mean(h, axis=-1, keepdims=True)
        var = jnp.mean((h - mean) ** 2, axis=-1, keepdims=True)
        y = (h - mean) * jax.lax.rsqrt(var + 1e-5) * params["ln_gamma"] + params["ln_beta"]
        logits = (jnp.dot(y.astype(cdt), w_lin, preferred_element_type=jnp.float32)
                  + params["b_lin"])
        outs.append(jax.nn.log_softmax(logits, axis=-1))
    return jnp.stack(outs, axis=1)


if __name__ == "__main__":
    # Small shapes.  T=18 -> 17 decode steps; chunk=8 -> 3 time chunks
    # (exercises the cross-chunk (h, c) carry); V=200 with v_tile=128 -> 2
    # vocab tiles, one partially padded (exercises the online logsumexp and
    # the ghost-column masking); batch padded 2 -> 8.
    B, E, H, V, T = 2, 32, 32, 200, 18

    key = jax.random.PRNGKey(0)
    ks = jax.random.split(key, 10)
    s = 1.0 / jnp.sqrt(jnp.float32(H))

    params = {
        # LSTMCell weights, stored pre-transposed: x @ W_ih (E,4H), h @ W_hh (H,4H)
        "w_ih": jax.random.uniform(ks[0], (E, 4 * H), jnp.float32, -s, s),
        "w_hh": jax.random.uniform(ks[1], (H, 4 * H), jnp.float32, -s, s),
        "b": (jax.random.uniform(ks[2], (1, 4 * H), jnp.float32, -s, s)
              + jax.random.uniform(ks[3], (1, 4 * H), jnp.float32, -s, s)),
        "emb": jax.random.normal(ks[4], (V, E), jnp.float32),
        "ln_gamma": jnp.ones((1, H), jnp.float32),
        "ln_beta": jnp.zeros((1, H), jnp.float32),
        "w_lin": jax.random.uniform(ks[5], (H, V), jnp.float32, -s, s),
        "b_lin": jax.random.uniform(ks[6], (1, V), jnp.float32, -s, s),
    }

    features = jax.random.normal(ks[7], (B, E), jnp.float32)
    caption = jax.random.randint(ks[8], (B, T), 0, V, dtype=jnp.int32)

    # f32 compute path: matches the PyTorch module numerics.
    out_f32 = jax.block_until_ready(
        decoder_nic_paper(features, caption, params, chunk=8, v_tile=128,
                          compute_dtype=jnp.float32))
    ref_f32 = decoder_reference(features, caption, params, jnp.float32)
    assert out_f32.shape == (B, T - 1, V), out_f32.shape
    assert jnp.allclose(out_f32, ref_f32, atol=1e-3, rtol=1e-3), \
        float(jnp.max(jnp.abs(out_f32 - ref_f32)))

    # bf16 MXU path (perf mode): compared against a bf16-casting reference.
    out_bf16 = jax.block_until_ready(
        decoder_nic_paper(features, caption, params, chunk=8, v_tile=128,
                          compute_dtype=jnp.bfloat16))
    ref_bf16 = decoder_reference(features, caption, params, jnp.bfloat16)
    assert out_bf16.shape == (B, T - 1, V), out_bf16.shape
    assert bool(jnp.all(jnp.isfinite(out_bf16)))
    assert jnp.allclose(out_bf16, ref_bf16, atol=0.15, rtol=0.15), \
        float(jnp.max(jnp.abs(out_bf16 - ref_bf16)))

    # Default (large chunk / large V-tile) configuration smoke test.
    out_def = jax.block_until_ready(decoder_nic_paper(features, caption, params))
    assert out_def.shape == (B, T - 1, V), out_def.shape
    assert bool(jnp.all(jnp.isfinite(out_def)))

    # TODO(synk): beam-search / nucleus / greedy sampling methods are host-side
    # control flow (heaps, python loops) and are not part of forward(); the
    # Dropout / lstm2 members are unused by nic_paper and are not translated.
    print("KERNEL_OK")
</pallas_src>

<mosaic_0001>
module attributes {stable_mosaic.version = 11 : i64} {
  func.func @_recurrence_stats_kernel(%arg0: i32, %arg1: i32, %arg2: i32, %arg3: memref<8x32xf32, #tpu.memory_space<vmem>>, %arg4: memref<8x8x32xf32, #tpu.memory_space<vmem>>, %arg5: memref<32x128xf32, #tpu.memory_space<vmem>>, %arg6: memref<32x128xf32, #tpu.memory_space<vmem>>, %arg7: memref<1x128xf32, #tpu.memory_space<vmem>>, %arg8: memref<1x32xf32, #tpu.memory_space<vmem>>, %arg9: memref<1x32xf32, #tpu.memory_space<vmem>>, %arg10: memref<32x128xf32, #tpu.memory_space<vmem>>, %arg11: memref<1x128xf32, #tpu.memory_space<vmem>>, %arg12: memref<8x8x32xf32, #tpu.memory_space<vmem>>, %arg13: memref<8x8x1xf32, #tpu.memory_space<vmem>>, %arg14: memref<8x32xf32, #tpu.memory_space<vmem>>, %arg15: memref<8x32xf32, #tpu.memory_space<vmem>>, %arg16: memref<64x1xf32, #tpu.memory_space<vmem>>, %arg17: memref<64x1xf32, #tpu.memory_space<vmem>>) attributes {dimension_semantics = [#tpu.dimension_semantics<parallel>, #tpu.dimension_semantics<arbitrary>, #tpu.dimension_semantics<arbitrary>], iteration_bounds = array<i64: 1, 3, 2>, scalar_prefetch = 0 : i64, scratch_operands = 4 : i64, tpu.core_type = #tpu.core_type<tc>, window_params = [{transform_indices = @transform_0, window_bounds = array<i64: 8, 32>}, {transform_indices = @transform_1, window_bounds = array<i64: 8, 8, 32>}, {pipeline_mode = #tpu.pipeline_mode<synchronous>, transform_indices = @transform_2, window_bounds = array<i64: 32, 128>}, {pipeline_mode = #tpu.pipeline_mode<synchronous>, transform_indices = @transform_3, window_bounds = array<i64: 32, 128>}, {pipeline_mode = #tpu.pipeline_mode<synchronous>, transform_indices = @transform_4, window_bounds = array<i64: 1, 128>}, {pipeline_mode = #tpu.pipeline_mode<synchronous>, transform_indices = @transform_5, window_bounds = array<i64: 1, 32>}, {pipeline_mode = #tpu.pipeline_mode<synchronous>, transform_indices = @transform_6, window_bounds = array<i64: 1, 32>}, {transform_indices = @transform_7, window_bounds = array<i64: 32, 128>}, {transform_indices = @transform_8, window_bounds = array<i64: 1, 128>}, {transform_indices = @transform_9, window_bounds = array<i64: 8, 8, 32>}, {transform_indices = @transform_10, window_bounds = array<i64: 8, 8, 1>}]} {
    %c0_i32 = arith.constant 0 : i32
    %0 = arith.cmpi eq, %arg2, %c0_i32 : i32
    %1 = arith.extui %0 : i1 to i32
    %c0_i32_0 = arith.constant 0 : i32
    %2 = arith.cmpi ne, %1, %c0_i32_0 : i32
    scf.if %2 {
      %c0_18 = arith.constant 0 : index
      %c0_19 = arith.constant 0 : index
      %29 = vector.load %arg5[%c0_18, %c0_19] : memref<32x128xf32, #tpu.memory_space<vmem>>, vector<32x128xf32>
      %c0_20 = arith.constant 0 : index
      %c0_21 = arith.constant 0 : index
      %30 = vector.load %arg6[%c0_20, %c0_21] : memref<32x128xf32, #tpu.memory_space<vmem>>, vector<32x128xf32>
      %c0_22 = arith.constant 0 : index
      %c0_23 = arith.constant 0 : index
      %31 = vector.load %arg7[%c0_22, %c0_23] : memref<1x128xf32, #tpu.memory_space<vmem>>, vector<1x128xf32>
      %c0_i32_24 = arith.constant 0 : i32
      %32 = arith.cmpi eq, %arg1, %c0_i32_24 : i32
      %33 = arith.extui %32 : i1 to i32
      %c0_i32_25 = arith.constant 0 : i32
      %34 = arith.cmpi ne, %33, %c0_i32_25 : i32
      scf.if %34 {
        %c0_88 = arith.constant 0 : index
        %c0_89 = arith.constant 0 : index
        %317 = vector.load %arg3[%c0_88, %c0_89] : memref<8x32xf32, #tpu.memory_space<vmem>>, vector<8x32xf32>
        %cst_90 = arith.constant dense<0.000000e+00> : vector<8x128xf32>
        %318 = tpu.matmul %317, %29, %cst_90 {dimension_numbers = #tpu.dot_dimension_numbers<[1], [0], [0], [1], [0, 0, 1, 1], [], []>} : vector<8x32xf32>, vector<32x128xf32>, vector<8x128xf32> -> vector<8x128xf32>
        %319 = vector.broadcast %31 : vector<1x128xf32> to vector<8x128xf32>
        %320 = arith.addf %318, %319 : vector<8x128xf32>
        %cst_91 = arith.constant 0.000000e+00 : f32
        %321 = vector.broadcast %cst_91 : f32 to vector<8x32xf32>
        %cst_92 = arith.constant 0.000000e+00 : f32
        %322 = vector.broadcast %cst_92 : f32 to vector<8x32xf32>
        %cst_93 = arith.constant dense<0.000000e+00> : vector<8x128xf32>
        %323 = tpu.matmul %321, %30, %cst_93 {dimension_numbers = #tpu.dot_dimension_numbers<[1], [0], [0], [1], [0, 0, 1, 1], [], []>} : vector<8x32xf32>, vector<32x128xf32>, vector<8x128xf32> -> vector<8x128xf32>
        %324 = arith.addf %320, %323 : vector<8x128xf32>
        %325 = vector.extract_strided_slice %324 {offsets = [0, 0], sizes = [8, 32], strides = [1, 1]} : vector<8x128xf32> to vector<8x32xf32>
        %326 = arith.negf %325 : vector<8x32xf32>
        %327 = math.exp %326 : vector<8x32xf32>
        %cst_94 = arith.constant 1.000000e+00 : f32
        %328 = vector.broadcast %cst_94 : f32 to vector<8x32xf32>
        %329 = arith.addf %328, %327 : vector<8x32xf32>
        %330 = arith.divf %328, %329 : vector<8x32xf32>
        %331 = vector.extract_strided_slice %324 {offsets = [0, 32], sizes = [8, 32], strides = [1, 1]} : vector<8x128xf32> to vector<8x32xf32>
        %332 = arith.negf %331 : vector<8x32xf32>
        %333 = math.exp %332 : vector<8x32xf32>
        %cst_95 = arith.constant 1.000000e+00 : f32
        %334 = vector.broadcast %cst_95 : f32 to vector<8x32xf32>
        %335 = arith.addf %334, %333 : vector<8x32xf32>
        %336 = arith.divf %334, %335 : vector<8x32xf32>
        %337 = vector.extract_strided_slice %324 {offsets = [0, 64], sizes = [8, 32], strides = [1, 1]} : vector<8x128xf32> to vector<8x32xf32>
        %338 = math.tanh %337 : vector<8x32xf32>
        %339 = vector.extract_strided_slice %324 {offsets = [0, 96], sizes = [8, 32], strides = [1, 1]} : vector<8x128xf32> to vector<8x32xf32>
        %340 = arith.negf %339 : vector<8x32xf32>
        %341 = math.exp %340 : vector<8x32xf32>
        %cst_96 = arith.constant 1.000000e+00 : f32
        %342 = vector.broadcast %cst_96 : f32 to vector<8x32xf32>
        %343 = arith.addf %342, %341 : vector<8x32xf32>
        %344 = arith.divf %342, %343 : vector<8x32xf32>
        %345 = arith.mulf %336, %322 : vector<8x32xf32>
        %346 = arith.mulf %330, %338 : vector<8x32xf32>
        %347 = arith.addf %345, %346 : vector<8x32xf32>
        %348 = math.tanh %347 : vector<8x32xf32>
        %349 = arith.mulf %344, %348 : vector<8x32xf32>
        %c0_97 = arith.constant 0 : index
        %c0_98 = arith.constant 0 : index
        %350 = vector.load %arg14[%c0_97, %c0_98] : memref<8x32xf32, #tpu.memory_space<vmem>>, vector<8x32xf32>
        tpu.vector_store %arg14[%c0_97, %c0_98], %349 {strides = array<i32>} : memref<8x32xf32, #tpu.memory_space<vmem>>, vector<8x32xf32>,
        %c0_99 = arith.constant 0 : index
        %c0_100 = arith.constant 0 : index
        %351 = vector.load %arg15[%c0_99, %c0_100] : memref<8x32xf32, #tpu.memory_space<vmem>>, vector<8x32xf32>
        tpu.vector_store %arg15[%c0_99, %c0_100], %347 {strides = array<i32>} : memref<8x32xf32, #tpu.memory_space<vmem>>, vector<8x32xf32>,
      } else {
      }
      %c0_26 = arith.constant 0 : index
      %c0_27 = arith.constant 0 : index
      %c0_28 = arith.constant 0 : index
      %35 = vector.load %arg4[%c0_26, %c0_27, %c0_28] : memref<8x8x32xf32, #tpu.memory_space<vmem>>, vector<8x8x32xf32>
      %36 = vector.shape_cast %35 : vector<8x8x32xf32> to vector<64x32xf32>
      %cst_29 = arith.constant dense<0.000000e+00> : vector<64x128xf32>
      %37 = tpu.matmul %36, %29, %cst_29 {dimension_numbers = #tpu.dot_dimension_numbers<[1], [0], [0], [1], [0, 0, 1, 1], [], []>} : vector<64x32xf32>, vector<32x128xf32>, vector<64x128xf32> -> vector<64x128xf32>
      %38 = vector.broadcast %31 : vector<1x128xf32> to vector<64x128xf32>
      %39 = arith.addf %37, %38 : vector<64x128xf32>
      %40 = vector.shape_cast %39 : vector<64x128xf32> to vector<8x8x128xf32>
      %c0_30 = arith.constant 0 : index
      %c0_31 = arith.constant 0 : index
      %41 = vector.load %arg14[%c0_30, %c0_31] : memref<8x32xf32, #tpu.memory_space<vmem>>, vector<8x32xf32>
      %c0_32 = arith.constant 0 : index
      %c0_33 = arith.constant 0 : index
      %42 = vector.load %arg15[%c0_32, %c0_33] : memref<8x32xf32, #tpu.memory_space<vmem>>, vector<8x32xf32>
      %43 = vector.extract_strided_slice %40 {offsets = [0, 0, 0], sizes = [8, 1, 128], strides = [1, 1, 1]} : vector<8x8x128xf32> to vector<8x1x128xf32>
      %44 = vector.shape_cast %43 : vector<8x1x128xf32> to vector<8x128xf32>
      %cst_34 = arith.constant dense<0.000000e+00> : vector<8x128xf32>
      %45 = tpu.matmul %41, %30, %cst_34 {dimension_numbers = #tpu.dot_dimension_numbers<[1], [0], [0], [1], [0, 0, 1, 1], [], []>} : vector<8x32xf32>, vector<32x128xf32>, vector<8x128xf32> -> vector<8x128xf32>
      %46 = arith.addf %44, %45 : vector<8x128xf32>
      %47 = vector.extract_strided_slice %46 {offsets = [0, 0], sizes = [8, 32], strides = [1, 1]} : vector<8x128xf32> to vector<8x32xf32>
      %48 = arith.negf %47 : vector<8x32xf32>
      %49 = math.exp %48 : vector<8x32xf32>
      %cst_35 = arith.constant 1.000000e+00 : f32
      %50 = vector.broadcast %cst_35 : f32 to vector<8x32xf32>
      %51 = arith.addf %50, %49 : vector<8x32xf32>
      %52 = arith.divf %50, %51 : vector<8x32xf32>
      %53 = vector.extract_strided_slice %46 {offsets = [0, 32], sizes = [8, 32], strides = [1, 1]} : vector<8x128xf32> to vector<8x32xf32>
      %54 = arith.negf %53 : vector<8x32xf32>
      %55 = math.exp %54 : vector<8x32xf32>
      %cst_36 = arith.constant 1.000000e+00 : f32
      %56 = vector.broadcast %cst_36 : f32 to vector<8x32xf32>
      %57 = arith.addf %56, %55 : vector<8x32xf32>
      %58 = arith.divf %56, %57 : vector<8x32xf32>
      %59 = vector.extract_strided_slice %46 {offsets = [0, 64], sizes = [8, 32], strides = [1, 1]} : vector<8x128xf32> to vector<8x32xf32>
      %60 = math.tanh %59 : vector<8x32xf32>
      %61 = vector.extract_strided_slice %46 {offsets = [0, 96], sizes = [8, 32], strides = [1, 1]} : vector<8x128xf32> to vector<8x32xf32>
      %62 = arith.negf %61 : vector<8x32xf32>
      %63 = math.exp %62 : vector<8x32xf32>
      %cst_37 = arith.constant 1.000000e+00 : f32
      %64 = vector.broadcast %cst_37 : f32 to vector<8x32xf32>
      %65 = arith.addf %64, %63 : vector<8x32xf32>
      %66 = arith.divf %64, %65 : vector<8x32xf32>
      %67 = arith.mulf %58, %42 : vector<8x32xf32>
      %68 = arith.mulf %52, %60 : vector<8x32xf32>
      %69 = arith.addf %67, %68 : vector<8x32xf32>
      %70 = math.tanh %69 : vector<8x32xf32>
      %71 = arith.mulf %66, %70 : vector<8x32xf32>
      %72 = vector.extract_strided_slice %40 {offsets = [0, 1, 0], sizes = [8, 1, 128], strides = [1, 1, 1]} : vector<8x8x128xf32> to vector<8x1x128xf32>
      %73 = vector.shape_cast %72 : vector<8x1x128xf32> to vector<8x128xf32>
      %cst_38 = arith.constant dense<0.000000e+00> : vector<8x128xf32>
      %74 = tpu.matmul %71, %30, %cst_38 {dimension_numbers = #tpu.dot_dimension_numbers<[1], [0], [0], [1], [0, 0, 1, 1], [], []>} : vector<8x32xf32>, vector<32x128xf32>, vector<8x128xf32> -> vector<8x128xf32>
      %75 = arith.addf %73, %74 : vector<8x128xf32>
      %76 = vector.extract_strided_slice %75 {offsets = [0, 0], sizes = [8, 32], strides = [1, 1]} : vector<8x128xf32> to vector<8x32xf32>
      %77 = arith.negf %76 : vector<8x32xf32>
      %78 = math.exp %77 : vector<8x32xf32>
      %cst_39 = arith.constant 1.000000e+00 : f32
      %79 = vector.broadcast %cst_39 : f32 to vector<8x32xf32>
      %80 = arith.addf %79, %78 : vector<8x32xf32>
      %81 = arith.divf %79, %80 : vector<8x32xf32>
      %82 = vector.extract_strided_slice %75 {offsets = [0, 32], sizes = [8, 32], strides = [1, 1]} : vector<8x128xf32> to vector<8x32xf32>
      %83 = arith.negf %82 : vector<8x32xf32>
      %84 = math.exp %83 : vector<8x32xf32>
      %cst_40 = arith.constant 1.000000e+00 : f32
      %85 = vector.broadcast %cst_40 : f32 to vector<8x32xf32>
      %86 = arith.addf %85, %84 : vector<8x32xf32>
      %87 = arith.divf %85, %86 : vector<8x32xf32>
      %88 = vector.extract_strided_slice %75 {offsets = [0, 64], sizes = [8, 32], strides = [1, 1]} : vector<8x128xf32> to vector<8x32xf32>
      %89 = math.tanh %88 : vector<8x32xf32>
      %90 = vector.extract_strided_slice %75 {offsets = [0, 96], sizes = [8, 32], strides = [1, 1]} : vector<8x128xf32> to vector<8x32xf32>
      %91 = arith.negf %90 : vector<8x32xf32>
      %92 = math.exp %91 : vector<8x32xf32>
      %cst_41 = arith.constant 1.000000e+00 : f32
      %93 = vector.broadcast %cst_41 : f32 to vector<8x32xf32>
      %94 = arith.addf %93, %92 : vector<8x32xf32>
      %95 = arith.divf %93, %94 : vector<8x32xf32>
      %96 = arith.mulf %87, %69 : vector<8x32xf32>
      %97 = arith.mulf %81, %89 : vector<8x32xf32>
      %98 = arith.addf %96, %97 : vector<8x32xf32>
      %99 = math.tanh %98 : vector<8x32xf32>
      %100 = arith.mulf %95, %99 : vector<8x32xf32>
      %101 = vector.extract_strided_slice %40 {offsets = [0, 2, 0], sizes = [8, 1, 128], strides = [1, 1, 1]} : vector<8x8x128xf32> to vector<8x1x128xf32>
      %102 = vector.shape_cast %101 : vector<8x1x128xf32> to vector<8x128xf32>
      %cst_42 = arith.constant dense<0.000000e+00> : vector<8x128xf32>
      %103 = tpu.matmul %100, %30, %cst_42 {dimension_numbers = #tpu.dot_dimension_numbers<[1], [0], [0], [1], [0, 0, 1, 1], [], []>} : vector<8x32xf32>, vector<32x128xf32>, vector<8x128xf32> -> vector<8x128xf32>
      %104 = arith.addf %102, %103 : vector<8x128xf32>
      %105 = vector.extract_strided_slice %104 {offsets = [0, 0], sizes = [8, 32], strides = [1, 1]} : vector<8x128xf32> to vector<8x32xf32>
      %106 = arith.negf %105 : vector<8x32xf32>
      %107 = math.exp %106 : vector<8x32xf32>
      %cst_43 = arith.constant 1.000000e+00 : f32
      %108 = vector.broadcast %cst_43 : f32 to vector<8x32xf32>
      %109 = arith.addf %108, %107 : vector<8x32xf32>
      %110 = arith.divf %108, %109 : vector<8x32xf32>
      %111 = vector.extract_strided_slice %104 {offsets = [0, 32], sizes = [8, 32], strides = [1, 1]} : vector<8x128xf32> to vector<8x32xf32>
      %112 = arith.negf %111 : vector<8x32xf32>
      %113 = math.exp %112 : vector<8x32xf32>
      %cst_44 = arith.constant 1.000000e+00 : f32
      %114 = vector.broadcast %cst_44 : f32 to vector<8x32xf32>
      %115 = arith.addf %114, %113 : vector<8x32xf32>
      %116 = arith.divf %114, %115 : vector<8x32xf32>
      %117 = vector.extract_strided_slice %104 {offsets = [0, 64], sizes = [8, 32], strides = [1, 1]} : vector<8x128xf32> to vector<8x32xf32>
      %118 = math.tanh %117 : vector<8x32xf32>
      %119 = vector.extract_strided_slice %104 {offsets = [0, 96], sizes = [8, 32], strides = [1, 1]} : vector<8x128xf32> to vector<8x32xf32>
      %120 = arith.negf %119 : vector<8x32xf32>
      %121 = math.exp %120 : vector<8x32xf32>
      %cst_45 = arith.constant 1.000000e+00 : f32
      %122 = vector.broadcast %cst_45 : f32 to vector<8x32xf32>
      %123 = arith.addf %122, %121 : vector<8x32xf32>
      %124 = arith.divf %122, %123 : vector<8x32xf32>
      %125 = arith.mulf %116, %98 : vector<8x32xf32>
      %126 = arith.mulf %110, %118 : vector<8x32xf32>
      %127 = arith.addf %125, %126 : vector<8x32xf32>
      %128 = math.tanh %127 : vector<8x32xf32>
      %129 = arith.mulf %124, %128 : vector<8x32xf32>
      %130 = vector.extract_strided_slice %40 {offsets = [0, 3, 0], sizes = [8, 1, 128], strides = [1, 1, 1]} : vector<8x8x128xf32> to vector<8x1x128xf32>
      %131 = vector.shape_cast %130 : vector<8x1x128xf32> to vector<8x128xf32>
      %cst_46 = arith.constant dense<0.000000e+00> : vector<8x128xf32>
      %132 = tpu.matmul %129, %30, %cst_46 {dimension_numbers = #tpu.dot_dimension_numbers<[1], [0], [0], [1], [0, 0, 1, 1], [], []>} : vector<8x32xf32>, vector<32x128xf32>, vector<8x128xf32> -> vector<8x128xf32>
      %133 = arith.addf %131, %132 : vector<8x128xf32>
      %134 = vector.extract_strided_slice %133 {offsets = [0, 0], sizes = [8, 32], strides = [1, 1]} : vector<8x128xf32> to vector<8x32xf32>
      %135 = arith.negf %134 : vector<8x32xf32>
      %136 = math.exp %135 : vector<8x32xf32>
      %cst_47 = arith.constant 1.000000e+00 : f32
      %137 = vector.broadcast %cst_47 : f32 to vector<8x32xf32>
      %138 = arith.addf %137, %136 : vector<8x32xf32>
      %139 = arith.divf %137, %138 : vector<8x32xf32>
      %140 = vector.extract_strided_slice %133 {offsets = [0, 32], sizes = [8, 32], strides = [1, 1]} : vector<8x128xf32> to vector<8x32xf32>
      %141 = arith.negf %140 : vector<8x32xf32>
      %142 = math.exp %141 : vector<8x32xf32>
      %cst_48 = arith.constant 1.000000e+00 : f32
      %143 = vector.broadcast %cst_48 : f32 to vector<8x32xf32>
      %144 = arith.addf %143, %142 : vector<8x32xf32>
      %145 = arith.divf %143, %144 : vector<8x32xf32>
      %146 = vector.extract_strided_slice %133 {offsets = [0, 64], sizes = [8, 32], strides = [1, 1]} : vector<8x128xf32> to vector<8x32xf32>
      %147 = math.tanh %146 : vector<8x32xf32>
      %148 = vector.extract_strided_slice %133 {offsets = [0, 96], sizes = [8, 32], strides = [1, 1]} : vector<8x128xf32> to vector<8x32xf32>
      %149 = arith.negf %148 : vector<8x32xf32>
      %150 = math.exp %149 : vector<8x32xf32>
      %cst_49 = arith.constant 1.000000e+00 : f32
      %151 = vector.broadcast %cst_49 : f32 to vector<8x32xf32>
      %152 = arith.addf %151, %150 : vector<8x32xf32>
      %153 = arith.divf %151, %152 : vector<8x32xf32>
      %154 = arith.mulf %145, %127 : vector<8x32xf32>
      %155 = arith.mulf %139, %147 : vector<8x32xf32>
      %156 = arith.addf %154, %155 : vector<8x32xf32>
      %157 = math.tanh %156 : vector<8x32xf32>
      %158 = arith.mulf %153, %157 : vector<8x32xf32>
      %159 = vector.extract_strided_slice %40 {offsets = [0, 4, 0], sizes = [8, 1, 128], strides = [1, 1, 1]} : vector<8x8x128xf32> to vector<8x1x128xf32>
      %160 = vector.shape_cast %159 : vector<8x1x128xf32> to vector<8x128xf32>
      %cst_50 = arith.constant dense<0.000000e+00> : vector<8x128xf32>
      %161 = tpu.matmul %158, %30, %cst_50 {dimension_numbers = #tpu.dot_dimension_numbers<[1], [0], [0], [1], [0, 0, 1, 1], [], []>} : vector<8x32xf32>, vector<32x128xf32>, vector<8x128xf32> -> vector<8x128xf32>
      %162 = arith.addf %160, %161 : vector<8x128xf32>
      %163 = vector.extract_strided_slice %162 {offsets = [0, 0], sizes = [8, 32], strides = [1, 1]} : vector<8x128xf32> to vector<8x32xf32>
      %164 = arith.negf %163 : vector<8x32xf32>
      %165 = math.exp %164 : vector<8x32xf32>
      %cst_51 = arith.constant 1.000000e+00 : f32
      %166 = vector.broadcast %cst_51 : f32 to vector<8x32xf32>
      %167 = arith.addf %166, %165 : vector<8x32xf32>
      %168 = arith.divf %166, %167 : vector<8x32xf32>
      %169 = vector.extract_strided_slice %162 {offsets = [0, 32], sizes = [8, 32], strides = [1, 1]} : vector<8x128xf32> to vector<8x32xf32>
      %170 = arith.negf %169 : vector<8x32xf32>
      %171 = math.exp %170 : vector<8x32xf32>
      %cst_52 = arith.constant 1.000000e+00 : f32
      %172 = vector.broadcast %cst_52 : f32 to vector<8x32xf32>
      %173 = arith.addf %172, %171 : vector<8x32xf32>
      %174 = arith.divf %172, %173 : vector<8x32xf32>
      %175 = vector.extract_strided_slice %162 {offsets = [0, 64], sizes = [8, 32], strides = [1, 1]} : vector<8x128xf32> to vector<8x32xf32>
      %176 = math.tanh %175 : vector<8x32xf32>
      %177 = vector.extract_strided_slice %162 {offsets = [0, 96], sizes = [8, 32], strides = [1, 1]} : vector<8x128xf32> to vector<8x32xf32>
      %178 = arith.negf %177 : vector<8x32xf32>
      %179 = math.exp %178 : vector<8x32xf32>
      %cst_53 = arith.constant 1.000000e+00 : f32
      %180 = vector.broadcast %cst_53 : f32 to vector<8x32xf32>
      %181 = arith.addf %180, %179 : vector<8x32xf32>
      %182 = arith.divf %180, %181 : vector<8x32xf32>
      %183 = arith.mulf %174, %156 : vector<8x32xf32>
      %184 = arith.mulf %168, %176 : vector<8x32xf32>
      %185 = arith.addf %183, %184 : vector<8x32xf32>
      %186 = math.tanh %185 : vector<8x32xf32>
      %187 = arith.mulf %182, %186 : vector<8x32xf32>
      %188 = vector.extract_strided_slice %40 {offsets = [0, 5, 0], sizes = [8, 1, 128], strides = [1, 1, 1]} : vector<8x8x128xf32> to vector<8x1x128xf32>
      %189 = vector.shape_cast %188 : vector<8x1x128xf32> to vector<8x128xf32>
      %cst_54 = arith.constant dense<0.000000e+00> : vector<8x128xf32>
      %190 = tpu.matmul %187, %30, %cst_54 {dimension_numbers = #tpu.dot_dimension_numbers<[1], [0], [0], [1], [0, 0, 1, 1], [], []>} : vector<8x32xf32>, vector<32x128xf32>, vector<8x128xf32> -> vector<8x128xf32>
      %191 = arith.addf %189, %190 : vector<8x128xf32>
      %192 = vector.extract_strided_slice %191 {offsets = [0, 0], sizes = [8, 32], strides = [1, 1]} : vector<8x128xf32> to vector<8x32xf32>
      %193 = arith.negf %192 : vector<8x32xf32>
      %194 = math.exp %193 : vector<8x32xf32>
      %cst_55 = arith.constant 1.000000e+00 : f32
      %195 = vector.broadcast %cst_55 : f32 to vector<8x32xf32>
      %196 = arith.addf %195, %194 : vector<8x32xf32>
      %197 = arith.divf %195, %196 : vector<8x32xf32>
      %198 = vector.extract_strided_slice %191 {offsets = [0, 32], sizes = [8, 32], strides = [1, 1]} : vector<8x128xf32> to vector<8x32xf32>
      %199 = arith.negf %198 : vector<8x32xf32>
      %200 = math.exp %199 : vector<8x32xf32>
      %cst_56 = arith.constant 1.000000e+00 : f32
      %201 = vector.broadcast %cst_56 : f32 to vector<8x32xf32>
      %202 = arith.addf %201, %200 : vector<8x32xf32>
      %203 = arith.divf %201, %202 : vector<8x32xf32>
      %204 = vector.extract_strided_slice %191 {offsets = [0, 64], sizes = [8, 32], strides = [1, 1]} : vector<8x128xf32> to vector<8x32xf32>
      %205 = math.tanh %204 : vector<8x32xf32>
      %206 = vector.extract_strided_slice %191 {offsets = [0, 96], sizes = [8, 32], strides = [1, 1]} : vector<8x128xf32> to vector<8x32xf32>
      %207 = arith.negf %206 : vector<8x32xf32>
      %208 = math.exp %207 : vector<8x32xf32>
      %cst_57 = arith.constant 1.000000e+00 : f32
      %209 = vector.broadcast %cst_57 : f32 to vector<8x32xf32>
      %210 = arith.addf %209, %208 : vector<8x32xf32>
      %211 = arith.divf %209, %210 : vector<8x32xf32>
      %212 = arith.mulf %203, %185 : vector<8x32xf32>
      %213 = arith.mulf %197, %205 : vector<8x32xf32>
      %214 = arith.addf %212, %213 : vector<8x32xf32>
      %215 = math.tanh %214 : vector<8x32xf32>
      %216 = arith.mulf %211, %215 : vector<8x32xf32>
      %217 = vector.extract_strided_slice %40 {offsets = [0, 6, 0], sizes = [8, 1, 128], strides = [1, 1, 1]} : vector<8x8x128xf32> to vector<8x1x128xf32>
      %218 = vector.shape_cast %217 : vector<8x1x128xf32> to vector<8x128xf32>
      %cst_58 = arith.constant dense<0.000000e+00> : vector<8x128xf32>
      %219 = tpu.matmul %216, %30, %cst_58 {dimension_numbers = #tpu.dot_dimension_numbers<[1], [0], [0], [1], [0, 0, 1, 1], [], []>} : vector<8x32xf32>, vector<32x128xf32>, vector<8x128xf32> -> vector<8x128xf32>
      %220 = arith.addf %218, %219 : vector<8x128xf32>
      %221 = vector.extract_strided_slice %220 {offsets = [0, 0], sizes = [8, 32], strides = [1, 1]} : vector<8x128xf32> to vector<8x32xf32>
      %222 = arith.negf %221 : vector<8x32xf32>
      %223 = math.exp %222 : vector<8x32xf32>
      %cst_59 = arith.constant 1.000000e+00 : f32
      %224 = vector.broadcast %cst_59 : f32 to vector<8x32xf32>
      %225 = arith.addf %224, %223 : vector<8x32xf32>
      %226 = arith.divf %224, %225 : vector<8x32xf32>
      %227 = vector.extract_strided_slice %220 {offsets = [0, 32], sizes = [8, 32], strides = [1, 1]} : vector<8x128xf32> to vector<8x32xf32>
      %228 = arith.negf %227 : vector<8x32xf32>
      %229 = math.exp %228 : vector<8x32xf32>
      %cst_60 = arith.constant 1.000000e+00 : f32
      %230 = vector.broadcast %cst_60 : f32 to vector<8x32xf32>
      %231 = arith.addf %230, %229 : vector<8x32xf32>
      %232 = arith.divf %230, %231 : vector<8x32xf32>
      %233 = vector.extract_strided_slice %220 {offsets = [0, 64], sizes = [8, 32], strides = [1, 1]} : vector<8x128xf32> to vector<8x32xf32>
      %234 = math.tanh %233 : vector<8x32xf32>
      %235 = vector.extract_strided_slice %220 {offsets = [0, 96], sizes = [8, 32], strides = [1, 1]} : vector<8x128xf32> to vector<8x32xf32>
      %236 = arith.negf %235 : vector<8x32xf32>
      %237 = math.exp %236 : vector<8x32xf32>
      %cst_61 = arith.constant 1.000000e+00 : f32
      %238 = vector.broadcast %cst_61 : f32 to vector<8x32xf32>
      %239 = arith.addf %238, %237 : vector<8x32xf32>
      %240 = arith.divf %238, %239 : vector<8x32xf32>
      %241 = arith.mulf %232, %214 : vector<8x32xf32>
      %242 = arith.mulf %226, %234 : vector<8x32xf32>
      %243 = arith.addf %241, %242 : vector<8x32xf32>
      %244 = math.tanh %243 : vector<8x32xf32>
      %245 = arith.mulf %240, %244 : vector<8x32xf32>
      %246 = vector.extract_strided_slice %40 {offsets = [0, 7, 0], sizes = [8, 1, 128], strides = [1, 1, 1]} : vector<8x8x128xf32> to vector<8x1x128xf32>
      %247 = vector.shape_cast %246 : vector<8x1x128xf32> to vector<8x128xf32>
      %cst_62 = arith.constant dense<0.000000e+00> : vector<8x128xf32>
      %248 = tpu.matmul %245, %30, %cst_62 {dimension_numbers = #tpu.dot_dimension_numbers<[1], [0], [0], [1], [0, 0, 1, 1], [], []>} : vector<8x32xf32>, vector<32x128xf32>, vector<8x128xf32> -> vector<8x128xf32>
      %249 = arith.addf %247, %248 : vector<8x128xf32>
      %250 = vector.extract_strided_slice %249 {offsets = [0, 0], sizes = [8, 32], strides = [1, 1]} : vector<8x128xf32> to vector<8x32xf32>
      %251 = arith.negf %250 : vector<8x32xf32>
      %252 = math.exp %251 : vector<8x32xf32>
      %cst_63 = arith.constant 1.000000e+00 : f32
      %253 = vector.broadcast %cst_63 : f32 to vector<8x32xf32>
      %254 = arith.addf %253, %252 : vector<8x32xf32>
      %255 = arith.divf %253, %254 : vector<8x32xf32>
      %256 = vector.extract_strided_slice %249 {offsets = [0, 32], sizes = [8, 32], strides = [1, 1]} : vector<8x128xf32> to vector<8x32xf32>
      %257 = arith.negf %256 : vector<8x32xf32>
      %258 = math.exp %257 : vector<8x32xf32>
      %cst_64 = arith.constant 1.000000e+00 : f32
      %259 = vector.broadcast %cst_64 : f32 to vector<8x32xf32>
      %260 = arith.addf %259, %258 : vector<8x32xf32>
      %261 = arith.divf %259, %260 : vector<8x32xf32>
      %262 = vector.extract_strided_slice %249 {offsets = [0, 64], sizes = [8, 32], strides = [1, 1]} : vector<8x128xf32> to vector<8x32xf32>
      %263 = math.tanh %262 : vector<8x32xf32>
      %264 = vector.extract_strided_slice %249 {offsets = [0, 96], sizes = [8, 32], strides = [1, 1]} : vector<8x128xf32> to vector<8x32xf32>
      %265 = arith.negf %264 : vector<8x32xf32>
      %266 = math.exp %265 : vector<8x32xf32>
      %cst_65 = arith.constant 1.000000e+00 : f32
      %267 = vector.broadcast %cst_65 : f32 to vector<8x32xf32>
      %268 = arith.addf %267, %266 : vector<8x32xf32>
      %269 = arith.divf %267, %268 : vector<8x32xf32>
      %270 = arith.mulf %261, %243 : vector<8x32xf32>
      %271 = arith.mulf %255, %263 : vector<8x32xf32>
      %272 = arith.addf %270, %271 : vector<8x32xf32>
      %273 = math.tanh %272 : vector<8x32xf32>
      %274 = arith.mulf %269, %273 : vector<8x32xf32>
      %c0_66 = arith.constant 0 : index
      %c0_67 = arith.constant 0 : index
      %275 = vector.load %arg14[%c0_66, %c0_67] : memref<8x32xf32, #tpu.memory_space<vmem>>, vector<8x32xf32>
      tpu.vector_store %arg14[%c0_66, %c0_67], %274 {strides = array<i32>} : memref<8x32xf32, #tpu.memory_space<vmem>>, vector<8x32xf32>,
      %c0_68 = arith.constant 0 : index
      %c0_69 = arith.constant 0 : index
      %276 = vector.load %arg15[%c0_68, %c0_69] : memref<8x32xf32, #tpu.memory_space<vmem>>, vector<8x32xf32>
      tpu.vector_store %arg15[%c0_68, %c0_69], %272 {strides = array<i32>} : memref<8x32xf32, #tpu.memory_space<vmem>>, vector<8x32xf32>,
      %277 = vector.shape_cast %71 : vector<8x32xf32> to vector<8x1x32xf32>
      %278 = vector.shape_cast %100 : vector<8x32xf32> to vector<8x1x32xf32>
      %279 = vector.shape_cast %129 : vector<8x32xf32> to vector<8x1x32xf32>
      %280 = vector.shape_cast %158 : vector<8x32xf32> to vector<8x1x32xf32>
      %281 = vector.shape_cast %187 : vector<8x32xf32> to vector<8x1x32xf32>
      %282 = vector.shape_cast %216 : vector<8x32xf32> to vector<8x1x32xf32>
      %283 = vector.shape_cast %245 : vector<8x32xf32> to vector<8x1x32xf32>
      %284 = vector.shape_cast %274 : vector<8x32xf32> to vector<8x1x32xf32>
      %285 = tpu.concatenate %277, %278, %279, %280, %281, %282, %283, %284 in 1 : vector<8x1x32xf32>, vector<8x1x32xf32>, vector<8x1x32xf32>, vector<8x1x32xf32>, vector<8x1x32xf32>, vector<8x1x32xf32>, vector<8x1x32xf32>, vector<8x1x32xf32> -> vector<8x8x32xf32>
      %cst_70 = arith.constant dense<0.000000e+00> : vector<8x8xf32>
      %286 = vector.multi_reduction <add>, %285, %cst_70 [2] : vector<8x8x32xf32> to vector<8x8xf32>
      %287 = vector.shape_cast %286 : vector<8x8xf32> to vector<8x8x1xf32>
      %cst_71 = arith.constant 3.200000e+01 : f32
      %288 = vector.broadcast %cst_71 : f32 to vector<8x8x1xf32>
      %289 = arith.divf %287, %288 : vector<8x8x1xf32>
      %290 = vector.broadcast %289 : vector<8x8x1xf32> to vector<8x8x32xf32>
      %291 = arith.subf %285, %290 : vector<8x8x32xf32>
      %292 = arith.mulf %291, %291 : vector<8x8x32xf32>
      %cst_72 = arith.constant dense<0.000000e+00> : vector<8x8xf32>
      %293 = vector.multi_reduction <add>, %292, %cst_72 [2] : vector<8x8x32xf32> to vector<8x8xf32>
      %294 = vector.shape_cast %293 : vector<8x8xf32> to vector<8x8x1xf32>
      %cst_73 = arith.constant 3.200000e+01 : f32
      %295 = vector.broadcast %cst_73 : f32 to vector<8x8x1xf32>
      %296 = arith.divf %294, %295 : vector<8x8x1xf32>
      %297 = vector.broadcast %289 : vector<8x8x1xf32> to vector<8x8x32xf32>
      %298 = arith.subf %285, %297 : vector<8x8x32xf32>
      %cst_74 = arith.constant 9.99999974E-6 : f32
      %299 = vector.broadcast %cst_74 : f32 to vector<8x8x1xf32>
      %300 = arith.addf %296, %299 : vector<8x8x1xf32>
      %301 = math.rsqrt %300 : vector<8x8x1xf32>
      %302 = vector.broadcast %301 : vector<8x8x1xf32> to vector<8x8x32xf32>
      %303 = arith.mulf %298, %302 : vector<8x8x32xf32>
      %c0_75 = arith.constant 0 : index
      %c0_76 = arith.constant 0 : index
      %304 = vector.load %arg8[%c0_75, %c0_76] : memref<1x32xf32, #tpu.memory_space<vmem>>, vector<1x32xf32>
      %305 = vector.shape_cast %304 : vector<1x32xf32> to vector<1x1x32xf32>
      %306 = vector.broadcast %305 : vector<1x1x32xf32> to vector<8x8x32xf32>
      %307 = arith.mulf %303, %306 : vector<8x8x32xf32>
      %c0_77 = arith.constant 0 : index
      %c0_78 = arith.constant 0 : index
      %308 = vector.load %arg9[%c0_77, %c0_78] : memref<1x32xf32, #tpu.memory_space<vmem>>, vector<1x32xf32>
      %309 = vector.shape_cast %308 : vector<1x32xf32> to vector<1x1x32xf32>
      %310 = vector.broadcast %309 : vector<1x1x32xf32> to vector<8x8x32xf32>
      %311 = arith.addf %307, %310 : vector<8x8x32xf32>
      %c0_79 = arith.constant 0 : index
      %c0_80 = arith.constant 0 : index
      %c0_81 = arith.constant 0 : index
      %312 = vector.load %arg12[%c0_79, %c0_80, %c0_81] : memref<8x8x32xf32, #tpu.memory_space<vmem>>, vector<8x8x32xf32>
      tpu.vector_store %arg12[%c0_79, %c0_80, %c0_81], %311 {strides = array<i32>} : memref<8x8x32xf32, #tpu.memory_space<vmem>>, vector<8x8x32xf32>,
      %cst_82 = arith.constant -1.000000e+30 : f32
      %313 = vector.broadcast %cst_82 : f32 to vector<64x1xf32>
      %c0_83 = arith.constant 0 : index
      %c0_84 = arith.constant 0 : index
      %314 = vector.load %arg16[%c0_83, %c0_84] : memref<64x1xf32, #tpu.memory_space<vmem>>, vector<64x1xf32>
      tpu.vector_store %arg16[%c0_83, %c0_84], %313 {strides = array<i32>} : memref<64x1xf32, #tpu.memory_space<vmem>>, vector<64x1xf32>,
      %cst_85 = arith.constant 0.000000e+00 : f32
      %315 = vector.broadcast %cst_85 : f32 to vector<64x1xf32>
      %c0_86 = arith.constant 0 : index
      %c0_87 = arith.constant 0 : index
      %316 = vector.load %arg17[%c0_86, %c0_87] : memref<64x1xf32, #tpu.memory_space<vmem>>, vector<64x1xf32>
      tpu.vector_store %arg17[%c0_86, %c0_87], %315 {strides = array<i32>} : memref<64x1xf32, #tpu.memory_space<vmem>>, vector<64x1xf32>,
    } else {
    }
    %c0 = arith.constant 0 : index
    %c0_1 = arith.constant 0 : index
    %c0_2 = arith.constant 0 : index
    %3 = vector.load %arg12[%c0, %c0_1, %c0_2] : memref<8x8x32xf32, #tpu.memory_space<vmem>>, vector<8x8x32xf32>
    %4 = vector.shape_cast %3 : vector<8x8x32xf32> to vector<64x32xf32>
    %c0_3 = arith.constant 0 : index
    %c0_4 = arith.constant 0 : index
    %5 = vector.load %arg10[%c0_3, %c0_4] : memref<32x128xf32, #tpu.memory_space<vmem>>, vector<32x128xf32>
    %cst = arith.constant dense<0.000000e+00> : vector<64x128xf32>
    %6 = tpu.matmul %4, %5, %cst {dimension_numbers = #tpu.dot_dimension_numbers<[1], [0], [0], [1], [0, 0, 1, 1], [], []>} : vector<64x32xf32>, vector<32x128xf32>, vector<64x128xf32> -> vector<64x128xf32>
    %c0_5 = arith.constant 0 : index
    %c0_6 = arith.constant 0 : index
    %7 = vector.load %arg11[%c0_5, %c0_6] : memref<1x128xf32, #tpu.memory_space<vmem>>, vector<1x128xf32>
    %8 = vector.broadcast %7 : vector<1x128xf32> to vector<64x128xf32>
    %9 = arith.addf %6, %8 : vector<64x128xf32>
    %c0_7 = arith.constant 0 : index
    %c0_8 = arith.constant 0 : index
    %10 = vector.load %arg16[%c0_7, %c0_8] : memref<64x1xf32, #tpu.memory_space<vmem>>, vector<64x1xf32>
    %cst_9 = arith.constant dense<0xFF800000> : vector<64xf32>
    %11 = vector.multi_reduction <maximumf>, %9, %cst_9 [1] : vector<64x128xf32> to vector<64xf32>
    %12 = vector.shape_cast %11 : vector<64xf32> to vector<64x1xf32>
    %13 = arith.maximumf %10, %12 : vector<64x1xf32>
    %c0_10 = arith.constant 0 : index
    %c0_11 = arith.constant 0 : index
    %14 = vector.load %arg17[%c0_10, %c0_11] : memref<64x1xf32, #tpu.memory_space<vmem>>, vector<64x1xf32>
    %15 = arith.subf %10, %13 : vector<64x1xf32>
    %16 = math.exp %15 : vector<64x1xf32>
    %17 = arith.mulf %14, %16 : vector<64x1xf32>
    %18 = vector.broadcast %13 : vector<64x1xf32> to vector<64x128xf32>
    %19 = arith.subf %9, %18 : vector<64x128xf32>
    %20 = math.exp %19 : vector<64x128xf32>
    %cst_12 = arith.constant dense<0.000000e+00> : vector<64xf32>
    %21 = vector.multi_reduction <add>, %20, %cst_12 [1] : vector<64x128xf32> to vector<64xf32>
    %22 = vector.shape_cast %21 : vector<64xf32> to vector<64x1xf32>
    %23 = arith.addf %17, %22 : vector<64x1xf32>
    %c0_13 = arith.constant 0 : index
    %c0_14 = arith.constant 0 : index
    %24 = vector.load %arg17[%c0_13, %c0_14] : memref<64x1xf32, #tpu.memory_space<vmem>>, vector<64x1xf32>
    tpu.vector_store %arg17[%c0_13, %c0_14], %23 {strides = array<i32>} : memref<64x1xf32, #tpu.memory_space<vmem>>, vector<64x1xf32>,
    %c0_15 = arith.constant 0 : index
    %c0_16 = arith.constant 0 : index
    %25 = vector.load %arg16[%c0_15, %c0_16] : memref<64x1xf32, #tpu.memory_space<vmem>>, vector<64x1xf32>
    tpu.vector_store %arg16[%c0_15, %c0_16], %13 {strides = array<i32>} : memref<64x1xf32, #tpu.memory_space<vmem>>, vector<64x1xf32>,
    %c1_i32 = arith.constant 1 : i32
    %26 = arith.cmpi eq, %arg2, %c1_i32 : i32
    %27 = arith.extui %26 : i1 to i32
    %c0_i32_17 = arith.constant 0 : i32
    %28 = arith.cmpi ne, %27, %c0_i32_17 : i32
    scf.if %28 {
      %c0_18 = arith.constant 0 : index
      %c0_19 = arith.constant 0 : index
      %29 = vector.load %arg16[%c0_18, %c0_19] : memref<64x1xf32, #tpu.memory_space<vmem>>, vector<64x1xf32>
      %c0_20 = arith.constant 0 : index
      %c0_21 = arith.constant 0 : index
      %30 = vector.load %arg17[%c0_20, %c0_21] : memref<64x1xf32, #tpu.memory_space<vmem>>, vector<64x1xf32>
      %31 = math.log %30 : vector<64x1xf32>
      %32 = arith.addf %29, %31 : vector<64x1xf32>
      %33 = vector.shape_cast %32 : vector<64x1xf32> to vector<8x8x1xf32>
      %c0_22 = arith.constant 0 : index
      %c0_23 = arith.constant 0 : index
      %c0_24 = arith.constant 0 : index
      %34 = vector.load %arg13[%c0_22, %c0_23, %c0_24] : memref<8x8x1xf32, #tpu.memory_space<vmem>>, vector<8x8x1xf32>
      tpu.vector_store %arg13[%c0_22, %c0_23, %c0_24], %33 {strides = array<i32>} : memref<8x8x1xf32, #tpu.memory_space<vmem>>, vector<8x8x1xf32>,
    } else {
    }
    return
  }
  func.func @transform_0(%arg0: i32, %arg1: i32, %arg2: i32) -> (i32, i32) {
    %c0_i32 = arith.constant 0 : i32
    %c0_i32_0 = arith.constant 0 : i32
    return %arg0, %c0_i32 : i32, i32
  }
  func.func @transform_1(%arg0: i32, %arg1: i32, %arg2: i32) -> (i32, i32, i32) {
    %c0_i32 = arith.constant 0 : i32
    %c0_i32_0 = arith.constant 0 : i32
    return %arg0, %arg1, %c0_i32 : i32, i32, i32
  }
  func.func @transform_2(%arg0: i32, %arg1: i32, %arg2: i32) -> (i32, i32) {
    %c0_i32 = arith.constant 0 : i32
    %c0_i32_0 = arith.constant 0 : i32
    %c0_i32_1 = arith.constant 0 : i32
    return %c0_i32, %c0_i32_0 : i32, i32
  }
  func.func @transform_3(%arg0: i32, %arg1: i32, %arg2: i32) -> (i32, i32) {
    %c0_i32 = arith.constant 0 : i32
    %c0_i32_0 = arith.constant 0 : i32
    %c0_i32_1 = arith.constant 0 : i32
    return %c0_i32, %c0_i32_0 : i32, i32
  }
  func.func @transform_4(%arg0: i32, %arg1: i32, %arg2: i32) -> (i32, i32) {
    %c0_i32 = arith.constant 0 : i32
    %c0_i32_0 = arith.constant 0 : i32
    %c0_i32_1 = arith.constant 0 : i32
    return %c0_i32, %c0_i32_0 : i32, i32
  }
  func.func @transform_5(%arg0: i32, %arg1: i32, %arg2: i32) -> (i32, i32) {
    %c0_i32 = arith.constant 0 : i32
    %c0_i32_0 = arith.constant 0 : i32
    %c0_i32_1 = arith.constant 0 : i32
    return %c0_i32, %c0_i32_0 : i32, i32
  }
  func.func @transform_6(%arg0: i32, %arg1: i32, %arg2: i32) -> (i32, i32) {
    %c0_i32 = arith.constant 0 : i32
    %c0_i32_0 = arith.constant 0 : i32
    %c0_i32_1 = arith.constant 0 : i32
    return %c0_i32, %c0_i32_0 : i32, i32
  }
  func.func @transform_7(%arg0: i32, %arg1: i32, %arg2: i32) -> (i32, i32) {
    %c0_i32 = arith.constant 0 : i32
    %c0_i32_0 = arith.constant 0 : i32
    return %c0_i32, %arg2 : i32, i32
  }
  func.func @transform_8(%arg0: i32, %arg1: i32, %arg2: i32) -> (i32, i32) {
    %c0_i32 = arith.constant 0 : i32
    %c0_i32_0 = arith.constant 0 : i32
    return %c0_i32, %arg2 : i32, i32
  }
  func.func @transform_9(%arg0: i32, %arg1: i32, %arg2: i32) -> (i32, i32, i32) {
    %c0_i32 = arith.constant 0 : i32
    %c0_i32_0 = arith.constant 0 : i32
    return %arg0, %arg1, %c0_i32 : i32, i32, i32
  }
  func.func @transform_10(%arg0: i32, %arg1: i32, %arg2: i32) -> (i32, i32, i32) {
    %c0_i32 = arith.constant 0 : i32
    %c0_i32_0 = arith.constant 0 : i32
    return %arg0, %arg1, %c0_i32 : i32, i32, i32
  }
}

</mosaic_0001>

<bundles_post_ra>
// kernel: tpu_custom_call.1
= control target key start
LH: loop header
LB: loop body
LE: loop exit
PB: predicated region body
PF: predicated region fallthrough
CT: control target
= control target key end

     0   :  { %s8190_s0 = inlined_call_operand.hbm [shape: f32[8,32], index: 0, kind: input, shape index: {}]   ;;  %s8191_s1 = inlined_call_operand.hbm [shape: f32[8,24,32], index: 1, kind: input, shape index: {}]   ;;  %s8192_s2 = inlined_call_operand.hbm [shape: f32[32,128], index: 2, kind: input, shape index: {}]   ;;  %s8193_s3 = inlined_call_operand.hbm [shape: f32[32,128], index: 3, kind: input, shape index: {}]   ;;  %s8194_s4 = inlined_call_operand.vmem [shape: f32[1,128], index: 4, kind: input, shape index: {}]   ;;  %s8195_s5 = inlined_call_operand.vmem [shape: f32[1,32], index: 5, kind: input, shape index: {}]   ;;  %s8196_s6 = inlined_call_operand.vmem [shape: f32[1,32], index: 6, kind: input, shape index: {}]   ;;  %s8197_s7 = inlined_call_operand.hbm [shape: f32[32,256], index: 7, kind: input, shape index: {}]   ;;  %s8198_s8 = inlined_call_operand.vmem [shape: f32[1,256], index: 8, kind: input, shape index: {}]   ;;  %s8199_s9 = inlined_call_operand.hbm [shape: f32[8,24,32], index: 9, kind: output, shape index: {0}]   ;;  %s8200_s10 = inlined_call_operand.vmem [shape: f32[8,24,1], index: 10, kind: output, shape index: {1}]  }
   0x1   :  { %8220 = sst [smem:[#allocation31_spill]] %s8190_s0 }
   0x2   :  { %8221 = sst [smem:[#allocation32_spill]] %s8194_s4 }
   0x3   :  { %8222 = sst [smem:[#allocation33_spill]] %s8195_s5 }
   0x4   :  { %8223 = sst [smem:[#allocation34_spill]] %s8196_s6 }
   0x5   :  { %8224 = sst [smem:[#allocation35_spill]] %s8198_s8 }
   0x6   :  { %8225 = sst [smem:[#allocation36_spill]] %s8199_s9 }
   0x7   :  { %8226 = sst [smem:[#allocation37_spill]] %s8200_s10 }
   0x8   :  { %16 = vsyncpa [#allocation7], 0 }
   0x9   :  { %17 = vsyncpa [#allocation10], 0 }
   0xa   :  { %19 = vsyncpa [#allocation10 + $0x1], 0 }
   0xb   :  { %20 = vsyncpa [#allocation13], 0 }
   0xc   :  { %21 = vsyncpa [#allocation8], 0 }
   0xd   :  { %23 = vsyncpa [#allocation8 + $0x1], 0  ;;  %s6116_s13 = smov 0   ;;  %s6118_s14 = smov 0  }
   0xe   :  { %s6120_s15 = smov 0   ;;  %s6122_s16 = smov 0  }
   0xf   :  { %s6124_s17 = smov 0   ;;  %s6126_s18 = smov 0  }
  0x10   :  { %s6128_s19 = smov 0   ;;  %s6130_s20 = smov 0  }
  0x11   :  { %s6132_s21 = smov 0   ;;  %s6134_s22 = smov 0  }
  0x12   :  { %s6136_s23 = smov 0  }
  0x13 LB: > { %8227 = sst [smem:[#allocation23_spill]] %s5996_s14  ;;  %s6170_s24 = sadd.s32 4294967295, %s6032_s23   ;;  %s6032_s23 = sphi %s6136_s23, %s29_s23   ;;  %s6028_s22 = sphi %s6134_s22, %s8292_s22   ;;  %s6024_s21 = sphi %s6132_s21, %s8291_s21   ;;  %s6020_s20 = sphi %s6130_s20, %s8290_s20   ;;  %s6016_s19 = sphi %s6128_s19, %s8289_s19   ;;  %s6012_s18 = sphi %s6126_s18, %s8288_s18   ;;  %s6008_s17 = sphi %s6124_s17, %s8287_s17   ;;  %s6004_s16 = sphi %s6122_s16, %s8286_s16   ;;  %s6000_s15 = sphi %s6120_s15, %s8285_s15   ;;  %s5996_s14 = sphi %s6118_s14, %s8284_s14   ;;  %s5992_s13 = sphi %s6116_s13, %s8282_s13  }
  0x14   : > { %8228 = sst [smem:[#allocation24_spill]] %s6004_s16  ;;  %s4579_s25 = sadd.s32 4294967294, %s6032_s23  }
  0x15   : > { %8229 = sst [smem:[#allocation25_spill]] %s6016_s19  ;;  %p90_p0 = scmp.ne.s32.totalorder %s6012_s18, %s6008_s17 }
  0x16   : > { %8230 = sst [smem:[#allocation26_spill]] %s6020_s20  ;;  %p91_p1 = scmp.eq.s32.totalorder %s6032_s23, 0 }
  0x17   : > { %p8201_p2 = scmp.ne.s32.totalorder %s6008_s17, %s6004_s16  ;;  %p8202_p3 = scmp.eq.s32.totalorder %s6170_s24, 0 }
  0x18   : > { %p221_p4 = scmp.ne.s32.totalorder %s6000_s15, %s5996_s14  ;;  %p6185_p5 = por %p91_p1, %p90_p0 }
  0x19   : > { %p227_p6 = scmp.ne.s32.totalorder %s5996_s14, %s5992_s13  ;;  %p6195_p7 = por %p8202_p3, %p8201_p2 }
  0x1a   : > { %p6199_p8 = por %p221_p4, %p91_p1  ;;  %p279_p10 = scmp.eq.s32.totalorder %s6170_s24, 5 }
  0x1b   : > { %s8232_s28 = scalar_select %p6195_p7, 1, 0 }
  0x1c   : > { %p6205_p9 = por %p227_p6, %p8202_p3  ;;  %p285_p11 = scmp.eq.s32.totalorder %s4579_s25, 5 }
  0x1d   : > { %8233 = sst [smem:[#allocation27_spill]] %s8232_s28  ;;  %p4580_p12 = scmp.ge.s32.totalorder %s6032_s23, 1 }
  0x1e   : > { %s8235_s30 = scalar_select %p6205_p9, 1, 0 }
  0x1f   : > { %p6214_p13 = por %p279_p10, %p90_p0  ;;  %p320_p2 = scmp.lt.s32.totalorder %s6032_s23, 7 }
  0x20   : > { %8236 = sst [smem:[#allocation28_spill]] %s8235_s30  ;;  %p8239_p1 = scmp.ne.s32.totalorder %s6008_s17, %s6004_s16 }
  0x21   : > { %s8237_s11 = scalar_select %p6214_p13, 1, 0 }
  0x22   : > { %p6222_p4 = por %p285_p11, %p8239_p1  ;;  %p6226_p6 = pnand %p4580_p12, %p320_p2 }
  0x23   : > { %8238 = sst [smem:[#allocation29_spill]] %s8237_s11  ;;  %s6034_s26 = smov [#allocation6]  }
  0x24   : > { %s8240_s12 = scalar_select %p6222_p4, 1, 0 }
  0x25   : > { %s8242_s13 = scalar_select %p6226_p6, 1, 0 }
  0x26   : > { %8241 = sst [smem:[#allocation30_spill]] %s8240_s12  ;;  %s335_s10 = sshll.u32 %s6034_s26, 4  ;;  %s336_s10 = int_to_ptr.vmem [resolvable:$true] %s335_s10 }
  0x27   : > { %p5023_p3 = pneg %p6226_p6  ;;  %p5047_p0 = scmp.lt.s32.totalorder %s6032_s23, 6 }
  0x28   : > { %p8243_p10 = scmp.eq.s32.totalorder %s6170_s24, 0  ;;  %s6035_s16 = smov [#allocation11]  }
  0x29   : > { %s345_s9 = sshll.u32 %s6035_s16, 4  ;;  %p6241_p2 = pnand %p5047_p0, %p6185_p5  ;;  %s6251_s9 = int_to_ptr.vmem [resolvable:$true] %s345_s9 }
  0x2a   : > { %p6235_p9 = pnand %p5023_p3, %p8243_p10  ;;  %p6247_p11 = pnand %p5047_p0, %p6199_p8 }
  0x2b   : > { %s8245_s12 = scalar_select %p6241_p2, 1, 0 }
  0x2c   : > { %s8246_s26 = scalar_select %p6247_p11, 1, 0 }
  0x2d   : > { %s8247_s0 = sld [smem:[#allocation31_spill]]  ;;  %p6261_p5 = pneg %p6235_p9 }
  0x33   : > { %s5750_s5 = scalar_lea.hbm %s8247_s0, 128 }
  0x34   : > { %p5751_p3 = scmp.ne.s32.totalorder %s8247_s0, %s5750_s5  ;;  %p5757_p1 = scmp.lt.u32.totalorder %s5750_s5, %s8247_s0 }
  0x36   : > { %p5753_p8 = pnand %p6261_p5, %p5751_p3 }
  0x38   : > { %p5754_p12 = pneg %p5753_p8 }
  0x3a   : > { %p5759_p0 = pnand %p5757_p1, %p5754_p12 }
  0x3c   : > { %5762 = shalt.err (!%p5759_p0)
}
  0x3d   : > { %s5763_s6 = scalar_lea.vmem %s336_s10, 128  ;;  %p5771_p7 = scmp.lt.s32.totalorder %s336_s10, %s336_s10 }
  0x3e   : > { %p5764_p10 = scmp.ne.s32.totalorder %s336_s10, %s5763_s6  ;;  %p5772_p6 = scmp.lt.s32.totalorder %s5763_s6, %s5763_s6 }
  0x40   : > { %p5766_p4 = pnand %p5764_p10, %p6261_p5  ;;  %p5773_p11 = por %p5772_p6, %p5771_p7 }
  0x42   : > { %p5767_p13 = pneg %p5766_p4 }
  0x44   : > { %p5774_p2 = pnand %p5773_p11, %p5767_p13 }
  0x46   : > { %5777 = shalt.err (!%p5774_p2)
}
  0x47   : > { %5026 = dma.hbm_to_vmem [thread:$0]  (!%p6235_p9), %s8247_s0, 128, %s336_s10, [#allocation7]  }
  0x48   : > { %s5778_s27 = scalar_lea.hbm %s8192_s2, 512 }
  0x49   : > { %p5779_p4 = scmp.ne.s32.totalorder %s8192_s2, %s5778_s27  ;;  %p5785_p13 = scmp.lt.u32.totalorder %s5778_s27, %s8192_s2 }
  0x4b   : > { %p5781_p3 = pnand %p5779_p4, %p6261_p5 }
  0x4d   : > { %p5782_p7 = pneg %p5781_p3 }
  0x4f   : > { %p5787_p6 = pnand %p5785_p13, %p5782_p7 }
  0x51   : > { %5790 = shalt.err (!%p5787_p6)
}
  0x52   : > { %s5791_s10 = scalar_lea.vmem %s6251_s9, 512  ;;  %p5799_p12 = scmp.lt.s32.totalorder %s6251_s9, %s6251_s9 }
  0x53   : > { %p5792_p2 = scmp.ne.s32.totalorder %s6251_s9, %s5791_s10  ;;  %p5800_p1 = scmp.lt.s32.totalorder %s5791_s10, %s5791_s10 }
  0x55   : > { %p5794_p11 = pnand %p5792_p2, %p6261_p5  ;;  %p5801_p0 = por %p5800_p1, %p5799_p12 }
  0x57   : > { %p5795_p8 = pneg %p5794_p11 }
  0x59   : > { %p5802_p10 = pnand %p5801_p0, %p5795_p8 }
  0x5b   : > { %5805 = shalt.err (!%p5802_p10)
}
  0x5c   : > { %s6036_s8 = smov 128   ;;  %s6037_s19 = smov 8  }
  0x5d   : > { %5029 = dma.hbm_to_vmem [thread:$0]  (!%p6235_p9), %s8192_s2, 512, %s6251_s9, [#allocation10], %s6036_s8, %s6036_s8, %s6037_s19  }
  0x5e   : > { %s6038_s5 = smov [#allocation12]   ;;  %s44_s27 = sadd.s32 1, %s6028_s22 }
  0x5f   : > { %s358_s11 = sshll.u32 %s6038_s5, 4  ;;  %s5806_s10 = scalar_lea.hbm %s8193_s3, 512  ;;  %s359_s11 = int_to_ptr.vmem [resolvable:$true] %s358_s11 }
  0x60   : > { %p5807_p4 = scmp.ne.s32.totalorder %s8193_s3, %s5806_s10  ;;  %p5813_p13 = scmp.lt.u32.totalorder %s5806_s10, %s8193_s3 }
  0x62   : > { %p5809_p3 = pnand %p5807_p4, %p6261_p5 }
  0x64   : > { %p5810_p7 = pneg %p5809_p3 }
  0x66   : > { %p5815_p6 = pnand %p5813_p13, %p5810_p7 }
  0x68   : > { %5818 = shalt.err (!%p5815_p6)
}
  0x69   : > { %s5819_s9 = scalar_lea.vmem %s359_s11, 512  ;;  %p5827_p12 = scmp.lt.s32.totalorder %s359_s11, %s359_s11 }
  0x6a   : > { %p5820_p2 = scmp.ne.s32.totalorder %s359_s11, %s5819_s9  ;;  %p5828_p1 = scmp.lt.s32.totalorder %s5819_s9, %s5819_s9 }
  0x6c   : > { %p5822_p11 = pnand %p5820_p2, %p6261_p5  ;;  %p5829_p0 = por %p5828_p1, %p5827_p12 }
  0x6e   : > { %p5823_p8 = pneg %p5822_p11 }
  0x70   : > { %p5830_p10 = pnand %p5829_p0, %p5823_p8 }
  0x72   : > { %5833 = shalt.err (!%p5830_p10)
}
  0x73   : > { %5032 = dma.hbm_to_vmem [thread:$0]  (!%p6235_p9), %s8193_s3, 512, %s359_s11, [#allocation13], %s6036_s8, %s6036_s8, %s6037_s19  }
  0x74   : > { %s381_s28 = sand.u32 1, %s6032_s23   ;;  %s383_s30 = sand.u32 1, %s6012_s18  }
  0x75   : > { %s4585_s16 = sshll.u32 %s383_s30, 6  ;;  %s4586_s4 = sshll.u32 %s6028_s22, 7 }
  0x76   : > { %s6331_s25 = scalar_lea.hbm %s8191_s1, %s4586_s4  ;;  %s385_s29 = scalar_lea.vmem [#allocation9], %s4585_s16 }
  0x77   : > { %s394_s6 = sshll.u32 %s385_s29, 4  ;;  %s6337_s10 = scalar_lea.sflag [#allocation10], %s381_s28  ;;  %s6333_s6 = int_to_ptr.vmem [resolvable:$true] %s394_s6 }
  0x78   : > { %s5834_s11 = scalar_lea.hbm %s6331_s25, 1024  ;;  %p8249_p5 = scmp.ne.s32.totalorder %s8245_s12, 0 }
  0x79   : > { %p5835_p9 = scmp.ne.s32.totalorder %s6331_s25, %s5834_s11  ;;  %s5839_s14 = scalar_lea.hbm %s8191_s1, 3072 }
  0x7a   : > { %p5836_p4 = pneg %p8249_p5  ;;  %p5840_p13 = scmp.lt.u32.totalorder %s6331_s25, %s8191_s1 }
  0x7b   : > { %p5841_p6 = scmp.lt.u32.totalorder %s5839_s14, %s5834_s11  ;;  %p5843_p11 = scmp.lt.u32.totalorder %s5834_s11, %s6331_s25 }
  0x7c   : > { %p5837_p3 = pnand %p5836_p4, %p5835_p9 }
  0x7d   : > { %p5842_p2 = por %p5841_p6, %p5840_p13 }
  0x7e   : > { %p5838_p7 = pneg %p5837_p3 }
  0x7f   : > { %p5844_p8 = por %p5843_p11, %p5842_p2 }
  0x81   : > { %p5845_p12 = pnand %p5844_p8, %p5838_p7 }
  0x83   : > { %5848 = shalt.err (!%p5845_p12)
}
  0x84   : > { %s5849_s4 = scalar_lea.vmem %s6333_s6, 1024  ;;  %s6039_s20 = smov [#allocation9]  }
  0x85   : > { %p5850_p1 = scmp.ne.s32.totalorder %s6333_s6, %s5849_s4  ;;  %s5854_s5 = sshll.u32 %s6039_s20, 4  ;;  %s5855_s5 = int_to_ptr.vmem [resolvable:$false] %s5854_s5 }
  0x86   : > { %s5856_s29 = scalar_lea.vmem %s5855_s5, 2048  ;;  %p5857_p9 = scmp.lt.s32.totalorder %s6333_s6, %s5855_s5 }
  0x87   : > { %p5852_p0 = pnand %p5850_p1, %p5836_p4  ;;  %p5858_p3 = scmp.lt.s32.totalorder %s5856_s29, %s5849_s4 }
  0x89   : > { %p5853_p10 = pneg %p5852_p0  ;;  %p5859_p13 = por %p5858_p3, %p5857_p9 }
  0x8b   : > { %p5860_p6 = pnand %p5859_p13, %p5853_p10 }
  0x8d   : > { %5863 = shalt.err (!%p5860_p6)
}
  0x8e   : > { %s6040_s11 = smov 384   ;;  %s214_s9 = sadd.s32 1, %s6000_s15 }
  0x8f   : > { %5036 = dma.hbm_to_vmem [thread:$0]  (!%p8249_p5), %s6331_s25, 1024, %s6333_s6, %s6337_s10, %s6040_s11, %s6036_s8, %s6037_s19  }
  0x90   : > { %s41_s0 = sadd.s32 1, %s6024_s21  ;;  %s406_s14 = sand.u32 1, %s6000_s15  }
  0x91   : > { %p42_p4 = scmp.ge.s32.totalorder %s41_s0, 2  ;;  %s4587_s12 = sshll.u32 %s406_s14, 5 }
  0x92   : > { %s4588_s30 = sshll.u32 %s6024_s21, 7  ;;  %s408_s6 = scalar_lea.vmem [#allocation14], %s4587_s12 }
  0x93   : > { %s8294_s0 = smov (%p42_p4, %s41_s0), 0  ;;  %s8296_s27 = smov (!%p42_p4, %s44_s27), %s6028_s22 }
  0x94   : > { %s211_s16 = ssub.s32 %s6024_s21, %s8294_s0  ;;  %s6381_s25 = scalar_lea.hbm %s8197_s7, %s4588_s30 }
  0x95   : > { %p46_p5 = scmp.ge.s32.totalorder %s8296_s27, 3  ;;  %p212_p7 = scmp.eq.s32.totalorder %s211_s16, 0 }
  0x96   : > { %s414_s10 = sshll.u32 %s408_s6, 4  ;;  %s6398_s14 = scalar_lea.sflag [#allocation7], %s381_s28  ;;  %s6390_s10 = int_to_ptr.vmem [resolvable:$true] %s414_s10 }
  0x97   : > { %s8298_s27 = smov (%p46_p5, %s8296_s27), 0  ;;  %s5864_s30 = scalar_lea.hbm %s6381_s25, 512 }
  0x98   : > { %s6386_s5 = scalar_select %p212_p7, %s6000_s15, %s214_s9  }
  0x99   : > { %s79_s29 = ssub.s32 %s6028_s22, %s8298_s27  ;;  %p5865_p11 = scmp.ne.s32.totalorder %s6381_s25, %s5864_s30 }
  0x9a   : > { %p6392_p2 = scmp.eq.s32.totalorder %s79_s29, 0  ;;  %p8251_p8 = scmp.ne.s32.totalorder %s8246_s26, 0 }
  0x9b   : > { %s5869_s16 = scalar_lea.hbm %s8197_s7, 1024  ;;  %p5870_p10 = scmp.lt.u32.totalorder %s6381_s25, %s8197_s7 }
  0x9c   : > { %p5866_p12 = pneg %p8251_p8  ;;  %p5871_p9 = scmp.lt.u32.totalorder %s5869_s16, %s5864_s30 }
  0x9d   : > { %p5873_p13 = scmp.lt.u32.totalorder %s5864_s30, %s6381_s25 }
  0x9e   : > { %p5867_p1 = pnand %p5866_p12, %p5865_p11  ;;  %p5872_p3 = por %p5871_p9, %p5870_p10 }
  0xa0   : > { %p5868_p0 = pneg %p5867_p1  ;;  %p5874_p6 = por %p5873_p13, %p5872_p3 }
  0xa2   : > { %p5875_p4 = pnand %p5874_p6, %p5868_p0 }
  0xa4   : > { %5878 = shalt.err (!%p5875_p4)
}
  0xa5   : > { %s5879_s28 = scalar_lea.vmem %s6390_s10, 512  ;;  %s6041_s6 = smov [#allocation14]  }
  0xa6   : > { %p5880_p5 = scmp.ne.s32.totalorder %s6390_s10, %s5879_s28  ;;  %s5884_s29 = sshll.u32 %s6041_s6, 4  ;;  %s5885_s29 = int_to_ptr.vmem [resolvable:$false] %s5884_s29 }
  0xa7   : > { %s5886_s9 = scalar_lea.vmem %s5885_s29, 1024  ;;  %p5887_p1 = scmp.lt.s32.totalorder %s6390_s10, %s5885_s29 }
  0xa8   : > { %p5882_p7 = pnand %p5880_p5, %p5866_p12  ;;  %p5888_p10 = scmp.lt.s32.totalorder %s5886_s9, %s5879_s28 }
  0xaa   : > { %p5883_p11 = pneg %p5882_p7  ;;  %p5889_p9 = por %p5888_p10, %p5887_p1 }
  0xac   : > { %p5890_p3 = pnand %p5889_p9, %p5883_p11 }
  0xae   : > { %5893 = shalt.err (!%p5890_p3)
}
  0xaf   : > { %s6042_s30 = smov 256   ;;  %s8252_s12 = sadd.s32 1, %s6012_s18 }
  0xb0   : > { %5039 = dma.hbm_to_vmem [thread:$0]  (!%p8251_p8), %s6381_s25, 512, %s6390_s10, %s6398_s14, %s6042_s30, %s6036_s8, %s6037_s19  }
  0xb1   : > { %s6433_s16 = scalar_select %p6392_p2, %s6012_s18, %s8252_s12  }
  0xb2   : > { %p8253_p12 = scmp.ne.s32.totalorder %s8242_s13, 0 }
  0xb3   : > { %p8254_p0 = scmp.eq.s32.totalorder (!%p8253_p12), %s6170_s24, 0 }
  0xb4   : > { %432 = sbr.rel (%p8253_p12) target bundleno = 8024 (0x1f58), region = 56 }
  0xbb   : > { %5967 = dma.done.wait (%p8254_p0), [#allocation7], 128   ;;  %p8255_p13 = pmov %p8254_p0 }
  0xbc   : > { %s8256_s26 = sld [smem:[#allocation27_spill]]  ;;  %s438_s4 = sand.u32 1, %s6170_s24  }
  0xbd   : > { %5969 = vsyncadd (%p8255_p13), [#allocation7], 4294967168  ;;  %s440_s20 = sand.u32 1, %s6008_s17   ;;  %s439_s19 = scalar_lea.sflag [#allocation10], %s438_s4 }
  0xbe   : > { %s4591_s8 = sshll.u32 %s440_s20, 6 }
  0xbf   : > { %s6445_s25 = scalar_lea.vmem [#allocation9], %s4591_s8 }
  0xc2   : > { %p8257_p2 = scmp.ne.s32.totalorder %s8256_s26, 0 }
  0xc4   : > { %5971 = dma.done.wait (%p8257_p2), %s439_s19, 1024  }
  0xc5   : > { %5973 = vsyncadd (%p8257_p2), %s439_s19, 4294966272  ;;  %p8258_p8 = pmov %p8254_p0 }
  0xc6   : > { %p8259_p6 = pmov %p8254_p0 }
  0xc7   : > { %5975 = dma.done.wait (%p8258_p8), [#allocation10], 512  }
  0xc8   : > { %5977 = vsyncadd (%p8259_p6), [#allocation10], 4294966784  ;;  %p8260_p4 = pmov %p8254_p0 }
  0xc9   : > { %p8261_p5 = pmov %p8254_p0 }
  0xca   : > { %5979 = dma.done.wait (%p8260_p4), [#allocation13], 512  }
  0xcb   : > { %5981 = vsyncadd (%p8261_p5), [#allocation13], 4294966784  ;;  %s8262_s13 = sld [smem:[#allocation23_spill]]  ;;  %s8263_s10 = sld [smem:[#allocation28_spill]] }
  0xcc   : > { %s456_s28 = scalar_lea.sflag [#allocation7], %s438_s4 }
  0xd1   : > { %s457_s11 = sand.u32 1, %s8262_s13   ;;  %p8264_p7 = scmp.ne.s32.totalorder %s8263_s10, 0 }
  0xd2   : > { %s4594_s14 = sshll.u32 %s457_s11, 5 }
  0xd3   : > { %s6460_s6 = scalar_lea.vmem [#allocation14], %s4594_s14 }
  0xd4   : > { %5983 = dma.done.wait (%p8264_p7), %s456_s28, 512  }
  0xd5   : > { %5985 = vsyncadd (%p8264_p7), %s456_s28, 4294966784  ;;  %s8265_s29 = sld [smem:[#allocation25_spill]]  ;;  %s8266_s12 = sld [smem:[#allocation35_spill]] }
  0xd6   : > { %s6474_s19 = scalar_lea.vmem [#allocation15], %s4591_s8  ;;  %s6476_s4 = scalar_lea.vmem [#allocation16], %s4591_s8 }
  0xdb   : > { %p509_p11 = scmp.lt.s32.totalorder %s8265_s29, 1  ;;  %p4597_p1 = scmp.ne.s32.totalorder %s8265_s29, 0 }
  0xdc   : > { %v6479_v0 = vld [vmem:[#allocation11] sm:$0xff] (!%p4597_p1)  ;;  %v6481_v1 = vld [vmem:[#allocation11 + $0x8] sm:$0xff] (!%p4597_p1)  ;;  %v6483_v2 = vld [vmem:[#allocation11 + $0x10] sm:$0xff] (!%p4597_p1)  ;;  %s8267_s10 = sld [smem:[#allocation32_spill]] (!%p4597_p1)  ;;  %s8268_s11 = sld [smem:[#allocation26_spill]] (!%p4597_p1) }
  0xdd   : > { %s6468_s9 = scalar_select %p509_p11, %s8265_s29, 1 }
  0xde   : > { %517 = sbr.rel (%p4597_p1) target bundleno = 7279 (0x1c6f), region = 80  ;;  %v6485_v3 = vld [vmem:[#allocation11 + $0x18] sm:$0xff] (!%p4597_p1)  ;;  %v6487_v4 = vld [vmem:[#allocation12] sm:$0xff] (!%p4597_p1)  ;;  %v6489_v5 = vld [vmem:[#allocation12 + $0x8] sm:$0xff] (!%p4597_p1) }
  0xdf   : > { %s511_s26 = scalar_lea.vmem %s8266_s12, %s6468_s9  ;;  %v6491_v6 = vld [vmem:[#allocation12 + $0x10] sm:$0xff] (!%p4597_p1)  ;;  %v6493_v7 = vld [vmem:[#allocation12 + $0x18] sm:$0xff] (!%p4597_p1) }
  0xe2   : > { %v6498_v8 = vld [vmem:[%s8267_s10] sm:$0x1] (!%p4597_p1)  ;;  %p4598_p10 = scmp.ne.s32.totalorder (!%p4597_p1), %s8268_s11, 0 }
  0xe5   : > { %530 = sbr.rel (%p4598_p10) target bundleno = 943 (0x3af), region = 84  ;;  %v4924_v9 = vpack.c.bf16 (!%p4598_p10), %v6481_v1, %v6479_v0  ;;  %v4930_v10 = vpack.c.bf16 (!%p4598_p10), %v6489_v5, %v6487_v4  ;;  %v6043_v11 = vmov (!%p4598_p10), 0.0|0.0   ;;  %v4927_v12 = vpack.c.bf16 (!%p4598_p10), %v6485_v3, %v6483_v2  ;;  %v531_v15 = vld [vmem:[#allocation6] sm:$0xff] (!%p4598_p10)  ;;  %s6046_s14 = smov (!%p4598_p10), 64  }
  0xe6   : > { %4923 = vmatprep.subr.bf16.mxu1 (!%p4598_p10), %v6043_v11  ;;  %4929 = vmatprep.subr.bf16.mxu0 (!%p4598_p10), %v6043_v11  ;;  %v4933_v13 = vpack.c.bf16 (!%p4598_p10), %v6493_v7, %v6491_v6  ;;  %vm6044_vm0 = vmmov (!%p4598_p10), 0   ;;  %v6045_v14 = vmov (!%p4598_p10), 0.0   ;;  %vm538_vm1 = vcmask (!%p4598_p10), 261120   ;;  %s6047_s28 = smov (!%p4598_p10), 32   ;;  %s6048_s29 = smov (!%p4598_p10), 96  }
  0xe7   : > { %4925 = vmatpush3.bf16.msra.mxu1 (!%p4598_p10), %v4924_v9  ;;  %4931 = vmatpush3.bf16.msra.mxu0 (!%p4598_p10), %v4930_v10  ;;  %v533_v16 = vlaneseq (!%p4598_p10) }
  0xe8   : > { %4926 = vmatprep.subr.bf16.mxu1 (!%p4598_p10), %v6043_v11  ;;  %4932 = vmatprep.subr.bf16.mxu0 (!%p4598_p10), %v6043_v11 }
  0xe9   : > { %4781 = vmatprep.mubr.msk.f32.mxu1 (!%p4598_p10), %vm6044_vm0, %v6045_v14  ;;  %4792 = vmatprep.mubr.msk.f32.mxu0 (!%p4598_p10), %vm6044_vm0, %v6045_v14  ;;  %v534_v17 = vshrl.u32 (!%p4598_p10), %v533_v16, 7 }
  0xeb   : > { %4928 = vmatpush3.bf16.msra.mxu1 (!%p4598_p10), %v4927_v12  ;;  %4934 = vmatpush3.bf16.msra.mxu0 (!%p4598_p10), %v4933_v13  ;;  %v535_v18 = vsub.s32 (!%p4598_p10), 0, %v534_v17 }
  0xed   : > { %v536_v19 = vrot.slane %v6498_v8, %v535_v18 }
  0xee   : > { %4782 = vmatmul.mubr.msk.f32.vlgmr.msra.gmra.mrb[0].mxu1 %vm538_vm1, %v531_v15  ;;  %4793 = vmatmul.mubr.f32.vlgmr.msra.gmra.mrb[0].mxu0 %v6045_v14 }
 0x1c1   : > { %v608_v20 = vpop.f32.mrb[0].mxu1  ;;  %v681_v21 = vpop.f32.mrb[0].mxu0 }
 0x1c2   : > { %v609_v22 = vadd.f32 %v608_v20, %v536_v19  ;;  %v4783_v23 = vpop.f32.mrb[1].mxu1  ;;  %v4794_v24 = vpop.f32.mrb[1].mxu0 }
 0x1c4   : > { %v685_v25 = vadd.f32 %v681_v21, %v609_v22 }
 0x1c6   : > { %5164 = vtanh.f32 %v685_v25  ;;  %v4600_v27 = vmul.f32 -1.442695, %v685_v25 }
 0x1c8   : > { %5166 = vpow2.f32 %v4600_v27 }
 0x1d0   : > { %v5165_v26 = vpop.eup %5164 }
 0x1d1   : > { %695 = vrot.lane.b32.xlu0 %v5165_v26, %s6046_s14 }
 0x1d2   : > { %v5167_v28 = vpop.eup %5166 }
 0x1d3   : > { %v689_v29 = vadd.f32 1.0, %v5167_v28 }
 0x1d5   : > { %5168 = vrcp.f32 %v689_v29 }
 0x1df   : > { %v5169_v30 = vpop.eup %5168 }
 0x1e0   : > { %v693_v33 = vmul.f32 0.0, %v5169_v30 }
 0x243   : > { %v696_v31 = vpop.permute.xlu0 %695 }
 0x244   : > { %v698_v32 = vmul.f32 %v5169_v30, %v696_v31 }
 0x246   : > { %700 = vrot.lane.b32.xlu0 %v698_v32, %s6047_s28 }
 0x2b8   : > { %v701_v34 = vpop.permute.xlu0 %700 }
 0x2b9   : > { %v703_v35 = vadd.f32 %v701_v34, %v693_v33 }
 0x2bb   : > { %5170 = vtanh.f32 %v703_v35  ;;  %716 = vrot.lane.b32.xlu0 %v703_v35, %s6048_s29 }
 0x2c5   : > { %v5171_v36 = vpop.eup %5170 }
 0x2c6   : > { %706 = vrot.lane.b32.xlu1 %v5171_v36, %s6046_s14 }
 0x32d   : > { %v717_v37 = vpop.permute.xlu0 %716 }
 0x32e   : > { %719 = vst.msk [vmem:[#allocation3] sm:$0xff] %vm538_vm1, %v717_v37 }
 0x338   : > { %v707_v38 = vpop.permute.xlu1 %706 }
 0x339   : > { %v709_v39 = vmul.f32 %v5169_v30, %v707_v38 }
 0x33b   : > { %711 = vrot.lane.b32.xlu1 %v709_v39, %s6047_s28 }
 0x3ad   : > { %v712_v40 = vpop.permute.xlu1 %711 }
 0x3ae   : > { %714 = vst.msk [vmem:[#allocation2] sm:$0xff] %vm538_vm1, %v712_v40 }
 0x3af PF: > { %v4935_v41 = vpack.c.bf16 %v6481_v1, %v6479_v0  ;;  %v6517_v42 = vpack.c.bf16 %v6489_v5, %v6487_v4  ;;  %v4939_v43 = vpack.c.bf16 %v6485_v3, %v6483_v2  ;;  %v6049_v44 = vmov 0.0|0.0   ;;  %v720_v46 = vld [vmem:[%s6445_s25] sm:$0xff]  ;;  %v721_v50 = vld [vmem:[%s6445_s25 + $0x8] sm:$0xff]  ;;  %v722_v51 = vld [vmem:[%s6445_s25 + $0x10] sm:$0xff]  ;;  %s6054_s24 = smov 32   ;;  %s8269_s8 = sld [smem:[#allocation33_spill]] }
 0x3b0   : > { %4943 = vmatprep.subr.bf16.mxu1 %v6049_v44  ;;  %v6524_v45 = vpack.c.bf16 %v6493_v7, %v6491_v6  ;;  %vm734_vm2 = vcmask 261120   ;;  %vm3912_vm3 = vcmask 7168   ;;  %v6050_v47 = vmov -1e+30   ;;  %v723_v52 = vld [vmem:[%s6445_s25 + $0x18] sm:$0xff]  ;;  %v724_v53 = vld [vmem:[%s6445_s25 + $0x20] sm:$0xff] }
 0x3b1   : > { %4936 = vmatprep.subr.bf16.mxu0 %v4935_v41  ;;  %4945 = vmatpush3.bf16.msra.mxu1 %v6517_v42  ;;  %3913 = vst.msk [vmem:[#allocation4] sm:$0xff] %vm3912_vm3, %v6050_v47  ;;  %3914 = vst.msk [vmem:[#allocation4 + $0x8] sm:$0xff] %vm3912_vm3, %v6050_v47  ;;  %v6051_v48 = vmov 0.0   ;;  %vm6052_vm4 = vmmov 0   ;;  %v725_v54 = vld [vmem:[%s6445_s25 + $0x28] sm:$0xff]  ;;  %v726_v55 = vld [vmem:[%s6445_s25 + $0x30] sm:$0xff]  ;;  %v729_v57 = vlaneseq }
 0x3b2   : > { %4938 = vmatpush3.bf16.msra.mxu0 %v4935_v41  ;;  %4946 = vmatprep.subr.bf16.mxu1 %v6049_v44  ;;  %3915 = vst.msk [vmem:[#allocation4 + $0x10] sm:$0xff] %vm3912_vm3, %v6050_v47  ;;  %3916 = vst.msk [vmem:[#allocation4 + $0x18] sm:$0xff] %vm3912_vm3, %v6050_v47  ;;  %v727_v56 = vld [vmem:[%s6445_s25 + $0x38] sm:$0xff]  ;;  %s6053_s25 = smov 64   ;;  %v865_v36 = vld [vmem:[#allocation3] sm:$0xff]  ;;  %vm1196_vm5 = vcmask 1041409  }
 0x3b3   : > { %3917 = vst.msk [vmem:[#allocation4 + $0x20] sm:$0xff] %vm3912_vm3, %v6050_v47  ;;  %3918 = vst.msk [vmem:[#allocation4 + $0x28] sm:$0xff] %vm3912_vm3, %v6050_v47  ;;  %4940 = vmatprep.subr.bf16.mxu0 %v4939_v43  ;;  %4803 = vmatprep.mubr.msk.f32.mxu0 %vm734_vm2, %v720_v46  ;;  %v730_v58 = vshrl.u32 %v729_v57, 7  ;;  %v1020_v39 = vrot.slane %v865_v36, 1  ;;  %v1021_v40 = vrot.slane %v865_v36, 2  ;;  %v1022_v41 = vrot.slane %v865_v36, 3 }
 0x3b4   : > { %3919 = vst.msk [vmem:[#allocation4 + $0x30] sm:$0xff] %vm3912_vm3, %v6050_v47  ;;  %3920 = vst.msk [vmem:[#allocation4 + $0x38] sm:$0xff] %vm3912_vm3, %v6050_v47  ;;  %4823 = vmatprep.mubr.msk.f32.mxu1 %vm6052_vm4, %v6051_v48  ;;  %v1023_v46 = vrot.slane %v865_v36, 4  ;;  %v1026_v47 = vrot.slane %v865_v36, 7  ;;  %vm1199_vm6 = vcmask 1042434   ;;  %vm1202_vm7 = vcmask 1043459  }
 0x3b5   : > { %3921 = vst.msk [vmem:[#allocation5] sm:$0xff] %vm3912_vm3, %v6051_v48  ;;  %3922 = vst.msk [vmem:[#allocation5 + $0x8] sm:$0xff] %vm3912_vm3, %v6051_v48  ;;  %4948 = vmatpush3.bf16.msra.mxu1 %v6524_v45  ;;  %v864_v49 = vld [vmem:[#allocation2] sm:$0xff]  ;;  %v731_v59 = vsub.s32 0, %v730_v58  ;;  %vm1205_vm8 = vcmask 1044484   ;;  %vm1208_vm9 = vcmask 1045509  }
 0x3b6   : > { %3923 = vst.msk [vmem:[#allocation5 + $0x10] sm:$0xff] %vm3912_vm3, %v6051_v48  ;;  %3924 = vst.msk [vmem:[#allocation5 + $0x18] sm:$0xff] %vm3912_vm3, %v6051_v48  ;;  %4942 = vmatpush3.bf16.msra.mxu0 %v4939_v43  ;;  %4949 = vmatprep.subr.bf16.mxu1 %v6049_v44  ;;  %v1025_v43 = vrot.slane %v865_v36, 6  ;;  %vm1211_vm10 = vcmask 1046534   ;;  %vm1214_vm11 = vcmask 1047559   ;;  %vm3606_vm12 = vcmask 1040384  }
 0x3b7   : > { %3925 = vst.msk [vmem:[#allocation5 + $0x20] sm:$0xff] %vm3912_vm3, %v6051_v48  ;;  %3926 = vst.msk [vmem:[#allocation5 + $0x28] sm:$0xff] %vm3912_vm3, %v6051_v48  ;;  %4955 = vmatprep.subr.bf16.mxu0 %v6049_v44  ;;  %v732_v60 = vrot.slane %v6498_v8, %v731_v59  ;;  %vm3615_vm13 = vcmask 1041408   ;;  %vm3624_vm14 = vcmask 1042432   ;;  %vm3633_vm15 = vcmask 1043456   ;;  %s6055_s13 = smov 96  }
 0x3b8   : > { %3927 = vst.msk [vmem:[#allocation5 + $0x30] sm:$0xff] %vm3912_vm3, %v6051_v48  ;;  %3928 = vst.msk [vmem:[#allocation5 + $0x38] sm:$0xff] %vm3912_vm3, %v6051_v48  ;;  %4824 = vmatmul.mubr.msk.f32.vlgmr.msra.gmra.mrb[0].mxu1 %vm734_vm2, %v864_v49  ;;  %v1024_v49 = vrot.slane %v865_v36, 5  ;;  %vm3642_vm0 = vcmask 1044480   ;;  %vm3651_vm1 = vcmask 1045504   ;;  %vm3660_vm3 = vcmask 1046528  }
 0x3b9   : > { %4804 = vmatmul.mubr.msk.f32.vlgmr.msra.gmra.mrb[0].mxu0 %vm734_vm2, %v721_v50  ;;  %4951 = vmatpush3.bf16.msra.mxu1 %v6517_v42  ;;  %s8270_s14 = sld [smem:[#allocation34_spill]] }
 0x3ba   : > { %4806 = vmatprep.mubr.msk.f32.mxu0 %vm734_vm2, %v722_v51  ;;  %4952 = vmatprep.subr.bf16.mxu1 %v6049_v44 }
 0x3bb   : > { %4834 = vmatprep.mubr.msk.f32.mxu1 %vm6052_vm4, %v6051_v48  ;;  %4957 = vmatpush3.bf16.msra.mxu0 %v6517_v42 }
 0x3bc   : > { %4958 = vmatprep.subr.bf16.mxu0 %v6049_v44 }
 0x3bd   : > { %4807 = vmatmul.mubr.msk.f32.gmra.mrb[2].mxu0 %vm734_vm2, %v723_v52  ;;  %4954 = vmatpush3.bf16.msra.mxu1 %v6524_v45 }
 0x3be   : > { %4809 = vmatprep.mubr.msk.f32.mxu0 %vm734_vm2, %v724_v53  ;;  %4961 = vmatprep.subr.bf16.mxu1 %v6049_v44 }
 0x3bf   : > { %4960 = vmatpush3.bf16.msra.mxu0 %v6524_v45 }
 0x3c0   : > { %4967 = vmatprep.subr.bf16.mxu0 %v6049_v44 }
 0x3c1   : > { %4810 = vmatmul.mubr.msk.f32.gmra.mrb[4].mxu0 %vm734_vm2, %v725_v54 }
 0x3c2   : > { %4812 = vmatprep.mubr.msk.f32.mxu0 %vm734_vm2, %v726_v55 }
 0x3c5   : > { %4813 = vmatmul.mubr.msk.f32.gmra.mrb[6].mxu0 %vm734_vm2, %v727_v56 }
 0x3c6   : > { %4845 = vmatprep.mubr.msk.f32.mxu0 %vm6052_vm4, %v6051_v48 }
 0x48b   : > { %v935_v61 = vpop.f32.mrb[0].mxu1 }
 0x48c   : > { %v4805_v62 = vpop.f32.mrb[0].mxu0  ;;  %v4825_v63 = vpop.f32.mrb[1].mxu1  ;;  %v940_v2 = vrot.slane %v935_v61, 1  ;;  %v942_v7 = vrot.slane %v935_v61, 3  ;;  %v941_v10 = vrot.slane %v935_v61, 2  ;;  %v944_v15 = vrot.slane %v935_v61, 5 }
 0x48d   : > { %v6587_v0 = vadd.f32 %v4805_v62, %v732_v60  ;;  %v825_v1 = vpop.f32.mrb[1].mxu0  ;;  %v943_v18 = vrot.slane %v935_v61, 4  ;;  %v946_v23 = vrot.slane %v935_v61, 7  ;;  %v945_v26 = vrot.slane %v935_v61, 6 }
 0x48e   : > { %v6589_v3 = vadd.f32 %v825_v1, %v732_v60 }
 0x48f   : > { %v6592_v4 = vadd.f32 %v940_v2, %v6587_v0 }
 0x490   : > { %v4808_v5 = vpop.f32.mrb[2].mxu0  ;;  %v6595_v6 = vadd.f32 %v935_v61, %v6589_v3 }
 0x491   : > { %v6597_v9 = vadd.f32 %v4808_v5, %v732_v60  ;;  %v835_v8 = vpop.f32.mrb[3].mxu0  ;;  %5172 = vtanh.f32 %v6592_v4  ;;  %v4611_v50 = vmul.f32 -1.442695, %v6592_v4 }
 0x492   : > { %v6600_v11 = vadd.f32 %v835_v8, %v732_v60  ;;  %5174 = vtanh.f32 %v6595_v6  ;;  %v4610_v51 = vmul.f32 -1.442695, %v6595_v6 }
 0x493   : > { %v958_v12 = vadd.f32 %v942_v7, %v6597_v9 }
 0x494   : > { %v4811_v13 = vpop.f32.mrb[4].mxu0  ;;  %v957_v14 = vadd.f32 %v941_v10, %v6600_v11 }
 0x495   : > { %v6605_v16 = vadd.f32 %v4811_v13, %v732_v60  ;;  %v845_v17 = vpop.f32.mrb[5].mxu0  ;;  %5176 = vtanh.f32 %v958_v12  ;;  %v4613_v52 = vmul.f32 -1.442695, %v958_v12 }
 0x496   : > { %v6607_v19 = vadd.f32 %v845_v17, %v732_v60  ;;  %5178 = vtanh.f32 %v957_v14  ;;  %v4612_v53 = vmul.f32 -1.442695, %v957_v14 }
 0x497   : > { %v960_v20 = vadd.f32 %v944_v15, %v6605_v16 }
 0x498   : > { %v4814_v21 = vpop.f32.mrb[6].mxu0  ;;  %v959_v22 = vadd.f32 %v943_v18, %v6607_v19 }
 0x499   : > { %v6611_v24 = vadd.f32 %v4814_v21, %v732_v60  ;;  %v855_v25 = vpop.f32.mrb[7].mxu0  ;;  %5180 = vtanh.f32 %v960_v20  ;;  %v4615_v54 = vmul.f32 -1.442695, %v960_v20 }
 0x49a   : > { %v6613_v27 = vadd.f32 %v855_v25, %v732_v60  ;;  %5182 = vtanh.f32 %v959_v22  ;;  %v4614_v55 = vmul.f32 -1.442695, %v959_v22 }
 0x49b   : > { %v5173_v28 = vpop.eup %5172  ;;  %v962_v29 = vadd.f32 %v946_v23, %v6611_v24 }
 0x49c   : > { %v5175_v30 = vpop.eup %5174  ;;  %1069 = vrot.lane.b32.xlu0 %v5173_v28, %s6053_s25  ;;  %v961_v31 = vadd.f32 %v945_v26, %v6613_v27 }
 0x49d   : > { %1067 = vrot.lane.b32.xlu1 %v5175_v30, %s6053_s25  ;;  %5184 = vtanh.f32 %v962_v29  ;;  %v4617_v58 = vmul.f32 -1.442695, %v962_v29 }
 0x49e   : > { %5186 = vtanh.f32 %v961_v31  ;;  %v4616_v56 = vmul.f32 -1.442695, %v961_v31 }
 0x49f   : > { %v5177_v32 = vpop.eup %5176  ;;  %5188 = vpow2.f32 %v4611_v50 }
 0x4a0   : > { %v5179_v33 = vpop.eup %5178  ;;  %5190 = vpow2.f32 %v4610_v51 }
 0x4a1   : > { %1071 = vrot.lane.b32.xlu0 %v5179_v33, %s6053_s25  ;;  %1073 = vrot.lane.b32.xlu1 %v5177_v32, %s6053_s25  ;;  %5192 = vpow2.f32 %v4613_v52 }
 0x4a2   : > { %5194 = vpow2.f32 %v4612_v53 }
 0x4a3   : > { %v5181_v34 = vpop.eup %5180  ;;  %5196 = vpow2.f32 %v4615_v54 }
 0x4a4   : > { %v5183_v35 = vpop.eup %5182  ;;  %5198 = vpow2.f32 %v4614_v55 }
 0x4a5   : > { %1075 = vrot.lane.b32.xlu0 %v5183_v35, %s6053_s25  ;;  %1077 = vrot.lane.b32.xlu1 %v5181_v34, %s6053_s25  ;;  %5200 = vpow2.f32 %v4616_v56 }
 0x4a6   : > { %5202 = vpow2.f32 %v4617_v58 }
 0x4a7   : > { %v5185_v37 = vpop.eup %5184 }
 0x4a8   : > { %v5187_v38 = vpop.eup %5186 }
 0x4a9   : > { %1079 = vrot.lane.b32.xlu0 %v5187_v38, %s6053_s25  ;;  %1081 = vrot.lane.b32.xlu1 %v5185_v37, %s6053_s25  ;;  %v5189_v57 = vpop.eup %5188 }
 0x4aa   : > { %v988_v59 = vadd.f32 1.0, %v5189_v57  ;;  %v5191_v60 = vpop.eup %5190 }
 0x4ab   : > { %v5193_v61 = vpop.eup %5192  ;;  %v987_v62 = vadd.f32 1.0, %v5191_v60 }
 0x4ac   : > { %5204 = vrcp.f32 %v988_v59  ;;  %v5195_v63 = vpop.eup %5194  ;;  %v990_v1 = vadd.f32 1.0, %v5193_v61 }
 0x4ad   : > { %1029 = vrot.lane.b32.xlu0 %v1020_v39, %s6054_s24  ;;  %1031 = vrot.lane.b32.xlu1 %v1021_v40, %s6054_s24  ;;  %v5197_v2 = vpop.eup %5196  ;;  %5206 = vrcp.f32 %v987_v62  ;;  %v989_v4 = vadd.f32 1.0, %v5195_v63 }
 0x4ae   : > { %v5199_v5 = vpop.eup %5198  ;;  %5208 = vrcp.f32 %v990_v1  ;;  %v992_v6 = vadd.f32 1.0, %v5197_v2 }
 0x4af   : > { %v5201_v7 = vpop.eup %5200  ;;  %5210 = vrcp.f32 %v989_v4  ;;  %v991_v8 = vadd.f32 1.0, %v5199_v5 }
 0x4b0   : > { %v5203_v10 = vpop.eup %5202  ;;  %5212 = vrcp.f32 %v992_v6  ;;  %v993_v12 = vadd.f32 1.0, %v5201_v7 }
 0x4b1   : > { %1027 = vrot.lane.b32.xlu0 %v865_v36, %s6054_s24  ;;  %1033 = vrot.lane.b32.xlu1 %v1022_v41, %s6054_s24  ;;  %5214 = vrcp.f32 %v991_v8  ;;  %v994_v18 = vadd.f32 1.0, %v5203_v10 }
 0x4b2   : > { %5216 = vrcp.f32 %v993_v12 }
 0x4b3   : > { %5218 = vrcp.f32 %v994_v18 }
 0x4b5   : > { %1039 = vrot.lane.b32.xlu0 %v1025_v43, %s6054_s24  ;;  %1035 = vrot.lane.b32.xlu1 %v1023_v46, %s6054_s24 }
 0x4b6   : > { %v6635_v13 = vpop.eup %5204 }
 0x4b7   : > { %v6639_v20 = vpop.eup %5206 }
 0x4b8   : > { %v6641_v21 = vpop.eup %5208 }
 0x4b9   : > { %1041 = vrot.lane.b32.xlu0 %v1026_v47, %s6054_s24  ;;  %1037 = vrot.lane.b32.xlu1 %v1024_v49, %s6054_s24  ;;  %v6646_v28 = vpop.eup %5210 }
 0x4ba   : > { %v6649_v29 = vpop.eup %5212 }
 0x4bb   : > { %v6654_v34 = vpop.eup %5214 }
 0x4bc   : > { %v6657_v35 = vpop.eup %5216 }
 0x4bd   : > { %v6663_v40 = vpop.eup %5218 }
 0x50e   : > { %v1070_v14 = vpop.permute.xlu0 %1069 }
 0x50f   : > { %v1092_v15 = vmul.f32 %v6635_v13, %v1070_v14  ;;  %v1068_v17 = vpop.permute.xlu1 %1067 }
 0x510   : > { %v1091_v22 = vmul.f32 %v6639_v20, %v1068_v17 }
 0x511   : > { %1109 = vrot.lane.b32.xlu0 %v1092_v15, %s6054_s24 }
 0x513   : > { %v1072_v23 = vpop.permute.xlu0 %1071  ;;  %v1074_v25 = vpop.permute.xlu1 %1073 }
 0x514   : > { %v1094_v26 = vmul.f32 %v6641_v21, %v1074_v25  ;;  %v1093_v30 = vmul.f32 %v6646_v28, %v1072_v23 }
 0x515   : > { %1107 = vrot.lane.b32.xlu0 %v1091_v22, %s6054_s24 }
 0x516   : > { %1113 = vrot.lane.b32.xlu1 %v1094_v26, %s6054_s24 }
 0x517   : > { %v1076_v31 = vpop.permute.xlu0 %1075  ;;  %v1078_v32 = vpop.permute.xlu1 %1077 }
 0x518   : > { %v1096_v33 = vmul.f32 %v6649_v29, %v1078_v32  ;;  %v1095_v37 = vmul.f32 %v6654_v34, %v1076_v31 }
 0x519   : > { %1111 = vrot.lane.b32.xlu0 %v1093_v30, %s6054_s24 }
 0x51a   : > { %1117 = vrot.lane.b32.xlu1 %v1096_v33, %s6054_s24 }
 0x51b   : > { %v1080_v36 = vpop.permute.xlu0 %1079  ;;  %v1082_v39 = vpop.permute.xlu1 %1081 }
 0x51c   : > { %v1097_v38 = vmul.f32 %v6657_v35, %v1080_v36  ;;  %v1098_v41 = vmul.f32 %v6663_v40, %v1082_v39 }
 0x51e   : > { %1115 = vrot.lane.b32.xlu1 %v1095_v37, %s6054_s24  ;;  %1119 = vrot.lane.b32.xlu0 %v1097_v38, %s6054_s24 }
 0x51f   : > { %v1030_v43 = vpop.permute.xlu0 %1029  ;;  %v1032_v46 = vpop.permute.xlu1 %1031 }
 0x520   : > { %v1052_v53 = vmul.f32 %v6635_v13, %v1030_v43  ;;  %v1053_v63 = vmul.f32 %v6646_v28, %v1032_v46 }
 0x522   : > { %1121 = vrot.lane.b32.xlu1 %v1098_v41, %s6054_s24 }
 0x523   : > { %v1028_v47 = vpop.permute.xlu0 %1027  ;;  %v1034_v49 = vpop.permute.xlu1 %1033 }
 0x524   : > { %v1051_v57 = vmul.f32 %v6639_v20, %v1028_v47  ;;  %v1054_v58 = vmul.f32 %v6641_v21, %v1034_v49 }
 0x527   : > { %v1040_v50 = vpop.permute.xlu0 %1039  ;;  %v1036_v51 = vpop.permute.xlu1 %1035 }
 0x528   : > { %v1055_v7 = vmul.f32 %v6654_v34, %v1036_v51  ;;  %v1057_v10 = vmul.f32 %v6657_v35, %v1040_v50 }
 0x52b   : > { %v1042_v52 = vpop.permute.xlu0 %1041  ;;  %v1038_v55 = vpop.permute.xlu1 %1037 }
 0x52c   : > { %v1056_v2 = vmul.f32 %v6649_v29, %v1038_v55  ;;  %v1058_v18 = vmul.f32 %v6663_v40, %v1042_v52 }
 0x583   : > { %v1110_v54 = vpop.permute.xlu0 %1109 }
 0x584   : > { %v6668_v56 = vadd.f32 %v1110_v54, %v1052_v53 }
 0x586   : > { %5220 = vtanh.f32 %v6668_v56 }
 0x587   : > { %v1108_v59 = vpop.permute.xlu0 %1107 }
 0x588   : > { %v6673_v60 = vadd.f32 %v1108_v59, %v1051_v57  ;;  %v1114_v61 = vpop.permute.xlu1 %1113 }
 0x589   : > { %v6675_v62 = vadd.f32 %v1114_v61, %v1054_v58 }
 0x58a   : > { %5222 = vtanh.f32 %v6673_v60 }
 0x58b   : > { %5224 = vtanh.f32 %v6675_v62  ;;  %v1112_v1 = vpop.permute.xlu0 %1111 }
 0x58c   : > { %v6681_v4 = vadd.f32 %v1112_v1, %v1053_v63  ;;  %v1118_v5 = vpop.permute.xlu1 %1117 }
 0x58d   : > { %v6684_v6 = vadd.f32 %v1118_v5, %v1056_v2 }
 0x58e   : > { %5226 = vtanh.f32 %v6681_v4 }
 0x58f   : > { %5228 = vtanh.f32 %v6684_v6 }
 0x590   : > { %v5221_v8 = vpop.eup %5220  ;;  %v1116_v12 = vpop.permute.xlu1 %1115 }
 0x591   : > { %v1120_v14 = vpop.permute.xlu0 %1119  ;;  %v6688_v15 = vadd.f32 %v1116_v12, %v1055_v7  ;;  %1157 = vrot.lane.b32.xlu0 %v5221_v8, %s6053_s25 }
 0x592   : > { %v6692_v17 = vadd.f32 %v1120_v14, %v1057_v10 }
 0x593   : > { %5230 = vtanh.f32 %v6688_v15 }
 0x594   : > { %v5223_v22 = vpop.eup %5222  ;;  %v1122_v23 = vpop.permute.xlu1 %1121  ;;  %5232 = vtanh.f32 %v6692_v17 }
 0x595   : > { %v5225_v25 = vpop.eup %5224  ;;  %v6696_v26 = vadd.f32 %v1122_v23, %v1058_v18  ;;  %1155 = vrot.lane.b32.xlu0 %v5223_v22, %s6053_s25 }
 0x596   : > { %1161 = vrot.lane.b32.xlu1 %v5225_v25, %s6053_s25 }
 0x597   : > { %5234 = vtanh.f32 %v6696_v26 }
 0x598   : > { %v5227_v30 = vpop.eup %5226 }
 0x599   : > { %v5229_v31 = vpop.eup %5228 }
 0x59a   : > { %1159 = vrot.lane.b32.xlu1 %v5227_v30, %s6053_s25 }
 0x59d   : > { %v5231_v32 = vpop.eup %5230 }
 0x59e   : > { %1165 = vrot.lane.b32.xlu1 %v5229_v31, %s6053_s25  ;;  %1163 = vrot.lane.b32.xlu0 %v5231_v32, %s6053_s25  ;;  %v5233_v33 = vpop.eup %5232 }
 0x5a1   : > { %v5235_v36 = vpop.eup %5234 }
 0x5a2   : > { %1169 = vrot.lane.b32.xlu1 %v5235_v36, %s6053_s25  ;;  %1167 = vrot.lane.b32.xlu0 %v5233_v33, %s6053_s25 }
 0x603   : > { %v1158_v37 = vpop.permute.xlu0 %1157 }
 0x604   : > { %v6708_v41 = vmul.f32 %v6635_v13, %v1158_v37 }
 0x606   : > { %v1195_v49 = vrot.slane %v6708_v41, 7 }
 0x607   : > { %v1156_v39 = vpop.permute.xlu0 %1155 }
 0x608   : > { %v1162_v38 = vpop.permute.xlu1 %1161  ;;  %v6711_v43 = vmul.f32 %v6639_v20, %v1156_v39 }
 0x609   : > { %v6718_v50 = vmul.f32 %v6641_v21, %v1162_v38 }
 0x60a   : > { %v1197_v13 = vsel %vm1196_vm5, %v1195_v49, %v6711_v43 }
 0x60b   : > { %v1201_v21 = vrot.slane %v6718_v50, 5 }
 0x60c   : > { %v1160_v46 = vpop.permute.xlu1 %1159 }
 0x60d   : > { %v6714_v47 = vmul.f32 %v6646_v28, %v1160_v46 }
 0x60f   : > { %v1198_v51 = vrot.slane %v6714_v47, 6 }
 0x610   : > { %v1166_v52 = vpop.permute.xlu1 %1165  ;;  %v1164_v53 = vpop.permute.xlu0 %1163 }
 0x611   : > { %v1200_v20 = vsel %vm1199_vm6, %v1198_v51, %v1197_v13  ;;  %v6725_v54 = vmul.f32 %v6649_v29, %v1166_v52  ;;  %v6728_v28 = vmul.f32 %v6654_v34, %v1164_v53 }
 0x612   : > { %v1203_v58 = vsel %vm1202_vm7, %v1201_v21, %v1200_v20 }
 0x613   : > { %v1204_v55 = vrot.slane %v6728_v28, 4  ;;  %v1207_v57 = vrot.slane %v6725_v54, 3 }
 0x614   : > { %v1170_v59 = vpop.permute.xlu1 %1169  ;;  %v1168_v61 = vpop.permute.xlu0 %1167 }
 0x615   : > { %v1206_v63 = vsel %vm1205_vm8, %v1204_v55, %v1203_v58  ;;  %v6736_v29 = vmul.f32 %v6663_v40, %v1170_v59  ;;  %v6739_v1 = vmul.f32 %v6657_v35, %v1168_v61 }
 0x616   : > { %v1209_v5 = vsel %vm1208_vm9, %v1207_v57, %v1206_v63 }
 0x617   : > { %v1213_v34 = vrot.slane %v6736_v29, 1  ;;  %v1210_v2 = vrot.slane %v6739_v1, 2 }
 0x619   : > { %v1212_v7 = vsel %vm1211_vm10, %v1210_v2, %v1209_v5 }
 0x61a   : > { %v1215_v8 = vsel %vm1214_vm11, %v1213_v34, %v1212_v7 }
 0x61b   : > { %1216 = vrot.lane.b32.xlu0 %v1215_v8, %s6054_s24 }
 0x68d   : > { %v1217_v40 = vpop.permute.xlu0 %1216 }
 0x68e   : > { %4835 = vmatmul.mubr.msk.f32.vlgmr.msra.gmra.mrb[2].mxu1 %vm734_vm2, %v1217_v40 }
 0x68f   : > { %4963 = vmatpush3.bf16.msra.mxu1 %v6517_v42  ;;  %4856 = vmatprep.mubr.msk.f32.mxu1 %vm6052_vm4, %v6051_v48 }
 0x690   : > { %4964 = vmatprep.subr.bf16.mxu1 %v6049_v44 }
 0x693   : > { %4966 = vmatpush3.bf16.msra.mxu1 %v6524_v45 }
 0x694   : > { %4973 = vmatprep.subr.bf16.mxu1 %v6049_v44 }
 0x761   : > { %v1286_v35 = vpop.f32.mrb[2].mxu1 }
 0x762   : > { %v4836_v10 = vpop.f32.mrb[3].mxu1  ;;  %v1292_v12 = vrot.slane %v1286_v35, 1  ;;  %v1291_v14 = vrot.slane %v1286_v35, 7  ;;  %v1307_v18 = vadd.f32 %v1286_v35, %v6587_v0  ;;  %v1293_v22 = vrot.slane %v1286_v35, 2 }
 0x763   : > { %v1294_v25 = vrot.slane %v1286_v35, 3  ;;  %v1295_v31 = vrot.slane %v1286_v35, 4  ;;  %v1296_v33 = vrot.slane %v1286_v35, 5  ;;  %v1297_v37 = vrot.slane %v1286_v35, 6 }
 0x764   : > { %v1308_v23 = vadd.f32 %v1292_v12, %v6600_v11  ;;  %v1306_v30 = vadd.f32 %v1291_v14, %v6589_v3  ;;  %5236 = vtanh.f32 %v1307_v18  ;;  %v1309_v32 = vadd.f32 %v1293_v22, %v6597_v9 }
 0x765   : > { %v1310_v36 = vadd.f32 %v1294_v25, %v6607_v19  ;;  %v1311_v38 = vadd.f32 %v1295_v31, %v6605_v16  ;;  %v1312_v39 = vadd.f32 %v1296_v33, %v6613_v27  ;;  %v1313_v46 = vadd.f32 %v1297_v37, %v6611_v24 }
 0x766   : > { %5238 = vtanh.f32 %v1308_v23  ;;  %v4620_v57 = vmul.f32 -1.442695, %v1307_v18  ;;  %v4621_v58 = vmul.f32 -1.442695, %v1308_v23  ;;  %v4619_v59 = vmul.f32 -1.442695, %v1306_v30 }
 0x767   : > { %5240 = vtanh.f32 %v1306_v30  ;;  %v4622_v61 = vmul.f32 -1.442695, %v1309_v32  ;;  %v4623_v63 = vmul.f32 -1.442695, %v1310_v36  ;;  %v4624_v34 = vmul.f32 -1.442695, %v1311_v38 }
 0x768   : > { %5242 = vtanh.f32 %v1309_v32  ;;  %v4625_v2 = vmul.f32 -1.442695, %v1312_v39  ;;  %v4626_v5 = vmul.f32 -1.442695, %v1313_v46 }
 0x769   : > { %5244 = vtanh.f32 %v1310_v36 }
 0x76a   : > { %5246 = vtanh.f32 %v1311_v38 }
 0x76b   : > { %5248 = vtanh.f32 %v1312_v39 }
 0x76c   : > { %5250 = vtanh.f32 %v1313_v46 }
 0x76d   : > { %5252 = vpow2.f32 %v4620_v57 }
 0x76e   : > { %v5237_v49 = vpop.eup %5236  ;;  %5254 = vpow2.f32 %v4621_v58 }
 0x76f   : > { %1412 = vrot.lane.b32.xlu1 %v5237_v49, %s6053_s25  ;;  %5256 = vpow2.f32 %v4619_v59 }
 0x770   : > { %v5239_v51 = vpop.eup %5238  ;;  %5258 = vpow2.f32 %v4622_v61 }
 0x771   : > { %1414 = vrot.lane.b32.xlu0 %v5239_v51, %s6053_s25  ;;  %v5241_v13 = vpop.eup %5240  ;;  %5260 = vpow2.f32 %v4623_v63 }
 0x772   : > { %v5243_v52 = vpop.eup %5242  ;;  %5262 = vpow2.f32 %v4624_v34 }
 0x773   : > { %1410 = vrot.lane.b32.xlu1 %v5241_v13, %s6053_s25  ;;  %v5245_v53 = vpop.eup %5244  ;;  %5264 = vpow2.f32 %v4625_v2 }
 0x774   : > { %v5247_v20 = vpop.eup %5246  ;;  %5266 = vpow2.f32 %v4626_v5 }
 0x775   : > { %1416 = vrot.lane.b32.xlu0 %v5243_v52, %s6053_s25  ;;  %v5249_v21 = vpop.eup %5248 }
 0x776   : > { %v5251_v55 = vpop.eup %5250 }
 0x777   : > { %1418 = vrot.lane.b32.xlu1 %v5245_v53, %s6053_s25  ;;  %v5253_v7 = vpop.eup %5252 }
 0x778   : > { %v5255_v8 = vpop.eup %5254  ;;  %v1339_v40 = vadd.f32 1.0, %v5253_v7 }
 0x779   : > { %1420 = vrot.lane.b32.xlu0 %v5247_v20, %s6053_s25  ;;  %v5257_v35 = vpop.eup %5256  ;;  %v1340_v10 = vadd.f32 1.0, %v5255_v8 }
 0x77a   : > { %v5259_v12 = vpop.eup %5258  ;;  %5268 = vrcp.f32 %v1339_v40  ;;  %v1338_v14 = vadd.f32 1.0, %v5257_v35 }
 0x77b   : > { %1422 = vrot.lane.b32.xlu1 %v5249_v21, %s6053_s25  ;;  %v5261_v18 = vpop.eup %5260  ;;  %5270 = vrcp.f32 %v1340_v10  ;;  %v1341_v22 = vadd.f32 1.0, %v5259_v12  ;;  %v1379_v10 = vrot.slane %v6668_v56, 7  ;;  %v1380_v12 = vrot.slane %v6681_v4, 7 }
 0x77c   : > { %v5263_v23 = vpop.eup %5262  ;;  %5272 = vrcp.f32 %v1338_v14  ;;  %v1342_v25 = vadd.f32 1.0, %v5261_v18 }
 0x77d   : > { %1424 = vrot.lane.b32.xlu0 %v5251_v55, %s6053_s25  ;;  %v5265_v30 = vpop.eup %5264  ;;  %5274 = vrcp.f32 %v1341_v22  ;;  %v1343_v31 = vadd.f32 1.0, %v5263_v23  ;;  %v1378_v23 = vrot.slane %v6673_v60, 7 }
 0x77e   : > { %v5267_v32 = vpop.eup %5266  ;;  %5276 = vrcp.f32 %v1342_v25  ;;  %v1344_v33 = vadd.f32 1.0, %v5265_v30 }
 0x77f   : > { %5278 = vrcp.f32 %v1343_v31  ;;  %v1345_v36 = vadd.f32 1.0, %v5267_v32  ;;  %v1381_v31 = vrot.slane %v6675_v62, 7 }
 0x780   : > { %5280 = vrcp.f32 %v1344_v33 }
 0x781   : > { %5282 = vrcp.f32 %v1345_v36  ;;  %v1382_v36 = vrot.slane %v6688_v15, 7 }
 0x784   : > { %v6770_v37 = vpop.eup %5268 }
 0x785   : > { %v6772_v39 = vpop.eup %5270  ;;  %v1395_v14 = vmul.f32 %v6770_v37, %v1379_v10 }
 0x786   : > { %v6777_v13 = vpop.eup %5272  ;;  %v1396_v22 = vmul.f32 %v6772_v39, %v1380_v12 }
 0x787   : > { %v6780_v53 = vpop.eup %5274  ;;  %v1394_v56 = vmul.f32 %v6777_v13, %v1378_v23 }
 0x788   : > { %v6785_v57 = vpop.eup %5276  ;;  %v1397_v33 = vmul.f32 %v6780_v53, %v1381_v31 }
 0x789   : > { %v6788_v59 = vpop.eup %5278  ;;  %v1398_v62 = vmul.f32 %v6785_v57, %v1382_v36 }
 0x78a   : > { %v6793_v2 = vpop.eup %5280 }
 0x78b   : > { %v6796_v7 = vpop.eup %5282 }
 0x7e1   : > { %v1413_v38 = vpop.permute.xlu1 %1412 }
 0x7e2   : > { %v1435_v46 = vmul.f32 %v6770_v37, %v1413_v38 }
 0x7e3   : > { %v1415_v49 = vpop.permute.xlu0 %1414 }
 0x7e4   : > { %v1436_v51 = vmul.f32 %v6772_v39, %v1415_v49  ;;  %1452 = vrot.lane.b32.xlu1 %v1435_v46, %s6054_s24  ;;  %v1383_v46 = vrot.slane %v6684_v6, 7 }
 0x7e5   : > { %v1411_v52 = vpop.permute.xlu1 %1410 }
 0x7e6   : > { %1454 = vrot.lane.b32.xlu0 %v1436_v51, %s6054_s24  ;;  %v1434_v20 = vmul.f32 %v6777_v13, %v1411_v52  ;;  %v1399_v52 = vmul.f32 %v6788_v59, %v1383_v46 }
 0x7e7   : > { %v1417_v21 = vpop.permute.xlu0 %1416 }
 0x7e8   : > { %v1437_v55 = vmul.f32 %v6780_v53, %v1417_v21  ;;  %1450 = vrot.lane.b32.xlu1 %v1434_v20, %s6054_s24  ;;  %v1384_v20 = vrot.slane %v6692_v17, 7 }
 0x7e9   : > { %v1419_v58 = vpop.permute.xlu1 %1418 }
 0x7ea   : > { %1456 = vrot.lane.b32.xlu0 %v1437_v55, %s6054_s24  ;;  %v1438_v61 = vmul.f32 %v6785_v57, %v1419_v58  ;;  %v1385_v55 = vrot.slane %v6696_v26, 7  ;;  %v1400_v6 = vmul.f32 %v6793_v2, %v1384_v20 }
 0x7eb   : > { %v1421_v63 = vpop.permute.xlu0 %1420 }
 0x7ec   : > { %v1439_v34 = vmul.f32 %v6788_v59, %v1421_v63  ;;  %1458 = vrot.lane.b32.xlu1 %v1438_v61, %s6054_s24  ;;  %v1401_v63 = vmul.f32 %v6796_v7, %v1385_v55 }
 0x7ed   : > { %v1423_v5 = vpop.permute.xlu1 %1422 }
 0x7ee   : > { %1460 = vrot.lane.b32.xlu0 %v1439_v34, %s6054_s24  ;;  %v1440_v8 = vmul.f32 %v6793_v2, %v1423_v5 }
 0x7ef   : > { %v1425_v40 = vpop.permute.xlu0 %1424 }
 0x7f0   : > { %v1441_v35 = vmul.f32 %v6796_v7, %v1425_v40  ;;  %1462 = vrot.lane.b32.xlu1 %v1440_v8, %s6054_s24 }
 0x7f2   : > { %1464 = vrot.lane.b32.xlu0 %v1441_v35, %s6054_s24 }
 0x856   : > { %v1453_v18 = vpop.permute.xlu1 %1452 }
 0x857   : > { %v6807_v25 = vadd.f32 %v1453_v18, %v1395_v14 }
 0x858   : > { %v1455_v30 = vpop.permute.xlu0 %1454 }
 0x859   : > { %v6810_v32 = vadd.f32 %v1455_v30, %v1396_v22  ;;  %5284 = vtanh.f32 %v6807_v25 }
 0x85a   : > { %v1451_v4 = vpop.permute.xlu1 %1450 }
 0x85b   : > { %5286 = vtanh.f32 %v6810_v32  ;;  %v6817_v38 = vadd.f32 %v1451_v4, %v1394_v56 }
 0x85c   : > { %v1457_v60 = vpop.permute.xlu0 %1456 }
 0x85d   : > { %v6820_v49 = vadd.f32 %v1457_v60, %v1397_v33  ;;  %5288 = vtanh.f32 %v6817_v38 }
 0x85e   : > { %v1459_v51 = vpop.permute.xlu1 %1458 }
 0x85f   : > { %5290 = vtanh.f32 %v6820_v49  ;;  %v6827_v21 = vadd.f32 %v1459_v51, %v1398_v62 }
 0x860   : > { %v1461_v15 = vpop.permute.xlu0 %1460 }
 0x861   : > { %v6830_v58 = vadd.f32 %v1461_v15, %v1399_v52  ;;  %5292 = vtanh.f32 %v6827_v21 }
 0x862   : > { %v1463_v61 = vpop.permute.xlu1 %1462 }
 0x863   : > { %5294 = vtanh.f32 %v6830_v58  ;;  %v5285_v34 = vpop.eup %5284  ;;  %v6836_v5 = vadd.f32 %v1463_v61, %v1400_v6 }
 0x864   : > { %v1465_v17 = vpop.permute.xlu0 %1464  ;;  %1500 = vrot.lane.b32.xlu1 %v5285_v34, %s6053_s25 }
 0x865   : > { %v5287_v8 = vpop.eup %5286  ;;  %v6838_v40 = vadd.f32 %v1465_v17, %v1401_v63  ;;  %5296 = vtanh.f32 %v6836_v5 }
 0x866   : > { %1502 = vrot.lane.b32.xlu0 %v5287_v8, %s6053_s25 }
 0x867   : > { %5298 = vtanh.f32 %v6838_v40  ;;  %v5289_v26 = vpop.eup %5288 }
 0x868   : > { %1498 = vrot.lane.b32.xlu1 %v5289_v26, %s6053_s25 }
 0x869   : > { %v5291_v35 = vpop.eup %5290 }
 0x86a   : > { %1504 = vrot.lane.b32.xlu0 %v5291_v35, %s6053_s25 }
 0x86b   : > { %v5293_v10 = vpop.eup %5292 }
 0x86c   : > { %1506 = vrot.lane.b32.xlu1 %v5293_v10, %s6053_s25 }
 0x86d   : > { %v5295_v12 = vpop.eup %5294 }
 0x86e   : > { %1508 = vrot.lane.b32.xlu0 %v5295_v12, %s6053_s25 }
 0x86f   : > { %v5297_v14 = vpop.eup %5296 }
 0x870   : > { %1510 = vrot.lane.b32.xlu1 %v5297_v14, %s6053_s25 }
 0x871   : > { %v5299_v18 = vpop.eup %5298 }
 0x872   : > { %1512 = vrot.lane.b32.xlu0 %v5299_v18, %s6053_s25 }
 0x8d6   : > { %v1501_v22 = vpop.permute.xlu1 %1500 }
 0x8d7   : > { %v6860_v36 = vmul.f32 %v6770_v37, %v1501_v22 }
 0x8d8   : > { %v1503_v23 = vpop.permute.xlu0 %1502 }
 0x8d9   : > { %v6851_v30 = vmul.f32 %v6772_v39, %v1503_v23 }
 0x8da   : > { %v1499_v31 = vpop.permute.xlu1 %1498 }
 0x8db   : > { %v6854_v56 = vmul.f32 %v6777_v13, %v1499_v31  ;;  %v1540_v46 = vrot.slane %v6851_v30, 7 }
 0x8dc   : > { %v1505_v4 = vpop.permute.xlu0 %1504 }
 0x8dd   : > { %v6857_v33 = vmul.f32 %v6780_v53, %v1505_v4  ;;  %v1538_v60 = vrot.slane %v6854_v56, 1 }
 0x8de   : > { %v1507_v51 = vpop.permute.xlu1 %1506 }
 0x8df   : > { %v1542_v62 = vrot.slane %v6857_v33, 6  ;;  %v1539_v39 = vsel %vm1196_vm5, %v6860_v36, %v1538_v60  ;;  %v6868_v13 = vmul.f32 %v6785_v57, %v1507_v51 }
 0x8e0   : > { %v1509_v52 = vpop.permute.xlu0 %1508  ;;  %v1541_v53 = vsel %vm1199_vm6, %v1540_v46, %v1539_v39 }
 0x8e1   : > { %v6872_v20 = vmul.f32 %v6788_v59, %v1509_v52  ;;  %v1543_v37 = vsel %vm1202_vm7, %v1542_v62, %v1541_v53  ;;  %v1544_v15 = vrot.slane %v6868_v13, 5 }
 0x8e2   : > { %v1511_v6 = vpop.permute.xlu1 %1510 }
 0x8e3   : > { %v1546_v55 = vrot.slane %v6872_v20, 4  ;;  %v1545_v61 = vsel %vm1205_vm8, %v1544_v15, %v1543_v37  ;;  %v6879_v63 = vmul.f32 %v6793_v2, %v1511_v6 }
 0x8e4   : > { %v1513_v57 = vpop.permute.xlu0 %1512 }
 0x8e5   : > { %v6882_v34 = vmul.f32 %v6796_v7, %v1513_v57  ;;  %v1547_v17 = vsel %vm1208_vm9, %v1546_v55, %v1545_v61  ;;  %v1548_v59 = vrot.slane %v6879_v63, 3 }
 0x8e7   : > { %v1550_v8 = vrot.slane %v6882_v34, 2  ;;  %v1549_v26 = vsel %vm1211_vm10, %v1548_v59, %v1547_v17 }
 0x8e9   : > { %v1551_v35 = vsel %vm1214_vm11, %v1550_v8, %v1549_v26 }
 0x8ea   : > { %1552 = vrot.lane.b32.xlu1 %v1551_v35, %s6054_s24 }
 0x95c   : > { %v1553_v10 = vpop.permute.xlu1 %1552 }
 0x95d   : > { %4846 = vmatmul.mubr.msk.f32.vlgmr.msra.gmra.mrb[8].mxu0 %vm734_vm2, %v1553_v10 }
 0x95e   : > { %4969 = vmatpush3.bf16.msra.mxu0 %v6517_v42  ;;  %4867 = vmatprep.mubr.msk.f32.mxu0 %vm6052_vm4, %v6051_v48 }
 0x95f   : > { %4970 = vmatprep.subr.bf16.mxu0 %v6049_v44 }
 0x962   : > { %4972 = vmatpush3.bf16.msra.mxu0 %v6524_v45 }
 0x963   : > { %4979 = vmatprep.subr.bf16.mxu0 %v6049_v44 }
 0xa30   : > { %v1622_v2 = vpop.f32.mrb[8].mxu0 }
 0xa31   : > { %v1627_v7 = vrot.slane %v1622_v2, 6  ;;  %v4847_v12 = vpop.f32.mrb[9].mxu0  ;;  %v1629_v18 = vrot.slane %v1622_v2, 1  ;;  %v1628_v22 = vrot.slane %v1622_v2, 7  ;;  %v1644_v23 = vadd.f32 %v1622_v2, %v6600_v11 }
 0xa32   : > { %v1630_v31 = vrot.slane %v1622_v2, 2  ;;  %v1631_v46 = vrot.slane %v1622_v2, 3  ;;  %v1632_v51 = vrot.slane %v1622_v2, 4  ;;  %v1633_v52 = vrot.slane %v1622_v2, 5 }
 0xa33   : > { %v1642_v14 = vadd.f32 %v1627_v7, %v6589_v3  ;;  %v1645_v4 = vadd.f32 %v1629_v18, %v6597_v9  ;;  %v1643_v62 = vadd.f32 %v1628_v22, %v6587_v0  ;;  %v4630_v35 = vmul.f32 -1.442695, %v1644_v23 }
 0xa34   : > { %v1646_v39 = vadd.f32 %v1630_v31, %v6607_v19  ;;  %v1647_v53 = vadd.f32 %v1631_v46, %v6605_v16  ;;  %v1648_v37 = vadd.f32 %v1632_v51, %v6613_v27  ;;  %v1649_v15 = vadd.f32 %v1633_v52, %v6611_v24 }
 0xa35   : > { %5300 = vtanh.f32 %v1642_v14  ;;  %v4628_v26 = vmul.f32 -1.442695, %v1642_v14  ;;  %v4631_v10 = vmul.f32 -1.442695, %v1645_v4  ;;  %v4629_v7 = vmul.f32 -1.442695, %v1643_v62 }
 0xa36   : > { %5302 = vtanh.f32 %v1644_v23  ;;  %v4632_v12 = vmul.f32 -1.442695, %v1646_v39  ;;  %v4633_v22 = vmul.f32 -1.442695, %v1647_v53  ;;  %v4634_v31 = vmul.f32 -1.442695, %v1648_v37 }
 0xa37   : > { %5304 = vtanh.f32 %v1645_v4 }
 0xa38   : > { %5306 = vtanh.f32 %v1643_v62 }
 0xa39   : > { %5308 = vtanh.f32 %v1646_v39 }
 0xa3a   : > { %5310 = vtanh.f32 %v1647_v53 }
 0xa3b   : > { %5312 = vtanh.f32 %v1648_v37 }
 0xa3c   : > { %5314 = vtanh.f32 %v1649_v15 }
 0xa3d   : > { %5316 = vpow2.f32 %v4628_v26 }
 0xa3e   : > { %5318 = vpow2.f32 %v4630_v35 }
 0xa3f   : > { %v5301_v60 = vpop.eup %5300  ;;  %5320 = vpow2.f32 %v4631_v10 }
 0xa40   : > { %1746 = vrot.lane.b32.xlu0 %v5301_v60, %s6053_s25  ;;  %v5303_v55 = vpop.eup %5302  ;;  %5322 = vpow2.f32 %v4629_v7  ;;  %v4635_v60 = vmul.f32 -1.442695, %v1649_v15 }
 0xa41   : > { %v5305_v6 = vpop.eup %5304  ;;  %1750 = vrot.lane.b32.xlu1 %v5303_v55, %s6053_s25  ;;  %5324 = vpow2.f32 %v4632_v12 }
 0xa42   : > { %v5307_v61 = vpop.eup %5306 }
 0xa43   : > { %v5309_v57 = vpop.eup %5308 }
 0xa44   : > { %1752 = vrot.lane.b32.xlu0 %v5305_v6, %s6053_s25  ;;  %v5311_v17 = vpop.eup %5310 }
 0xa45   : > { %1748 = vrot.lane.b32.xlu1 %v5307_v61, %s6053_s25  ;;  %v5313_v59 = vpop.eup %5312 }
 0xa46   : > { %v5315_v8 = vpop.eup %5314 }
 0xa47   : > { %v5317_v2 = vpop.eup %5316 }
 0xa48   : > { %1754 = vrot.lane.b32.xlu0 %v5309_v57, %s6053_s25  ;;  %v1674_v18 = vadd.f32 1.0, %v5317_v2  ;;  %v5319_v46 = vpop.eup %5318 }
 0xa49   : > { %1756 = vrot.lane.b32.xlu1 %v5311_v17, %s6053_s25  ;;  %v5321_v51 = vpop.eup %5320  ;;  %v1676_v14 = vadd.f32 1.0, %v5319_v46 }
 0xa4a   : > { %5326 = vrcp.f32 %v1674_v18  ;;  %v5323_v23 = vpop.eup %5322  ;;  %v1677_v4 = vadd.f32 1.0, %v5321_v51 }
 0xa4b   : > { %5328 = vpow2.f32 %v4633_v22  ;;  %v5325_v52 = vpop.eup %5324  ;;  %v1675_v55 = vadd.f32 1.0, %v5323_v23 }
 0xa4c   : > { %1758 = vrot.lane.b32.xlu0 %v5313_v59, %s6053_s25  ;;  %5330 = vpow2.f32 %v4634_v31  ;;  %v1678_v37 = vadd.f32 1.0, %v5325_v52 }
 0xa4d   : > { %1760 = vrot.lane.b32.xlu1 %v5315_v8, %s6053_s25  ;;  %5332 = vpow2.f32 %v4635_v60 }
 0xa4e   : > { %5334 = vrcp.f32 %v1676_v14 }
 0xa4f   : > { %5336 = vrcp.f32 %v1677_v4 }
 0xa50   : > { %5338 = vrcp.f32 %v1675_v55 }
 0xa51   : > { %5340 = vrcp.f32 %v1678_v37  ;;  %v1714_v37 = vrot.slane %v6817_v38, 7 }
 0xa54   : > { %v6913_v62 = vpop.eup %5326 }
 0xa55   : > { %v5329_v6 = vpop.eup %5328 }
 0xa56   : > { %v5331_v61 = vpop.eup %5330  ;;  %v1679_v15 = vadd.f32 1.0, %v5329_v6 }
 0xa57   : > { %v5333_v57 = vpop.eup %5332  ;;  %v1680_v17 = vadd.f32 1.0, %v5331_v61  ;;  %v1730_v61 = vmul.f32 %v6913_v62, %v1714_v37 }
 0xa58   : > { %5342 = vrcp.f32 %v1679_v15  ;;  %v1681_v59 = vadd.f32 1.0, %v5333_v57  ;;  %v6917_v8 = vpop.eup %5334 }
 0xa59   : > { %5344 = vrcp.f32 %v1680_v17  ;;  %v6919_v35 = vpop.eup %5336  ;;  %v1716_v17 = vrot.slane %v6810_v32, 7 }
 0xa5a   : > { %5346 = vrcp.f32 %v1681_v59  ;;  %v6924_v12 = vpop.eup %5338  ;;  %v1717_v59 = vrot.slane %v6820_v49, 7 }
 0xa5b   : > { %v6927_v22 = vpop.eup %5340 }
 0xa62   : > { %v6932_v51 = vpop.eup %5342 }
 0xa63   : > { %v6935_v23 = vpop.eup %5344 }
 0xa64   : > { %v6940_v55 = vpop.eup %5346 }
 0xab2   : > { %v1747_v39 = vpop.permute.xlu0 %1746 }
 0xab3   : > { %v1770_v53 = vmul.f32 %v6913_v62, %v1747_v39  ;;  %v1751_v26 = vpop.permute.xlu1 %1750 }
 0xab4   : > { %v1772_v10 = vmul.f32 %v6917_v8, %v1751_v26  ;;  %v1732_v26 = vmul.f32 %v6917_v8, %v1716_v17 }
 0xab5   : > { %1786 = vrot.lane.b32.xlu0 %v1770_v53, %s6054_s24 }
 0xab6   : > { %v1753_v2 = vpop.permute.xlu0 %1752  ;;  %1790 = vrot.lane.b32.xlu1 %v1772_v10, %s6054_s24 }
 0xab7   : > { %v1773_v7 = vmul.f32 %v6919_v35, %v1753_v2  ;;  %v1749_v18 = vpop.permute.xlu1 %1748  ;;  %v1733_v2 = vmul.f32 %v6919_v35, %v1717_v59 }
 0xab8   : > { %v1771_v31 = vmul.f32 %v6924_v12, %v1749_v18 }
 0xab9   : > { %1792 = vrot.lane.b32.xlu0 %v1773_v7, %s6054_s24  ;;  %v1715_v7 = vrot.slane %v6807_v25, 7  ;;  %v1719_v25 = vrot.slane %v6830_v58, 7 }
 0xaba   : > { %v1755_v60 = vpop.permute.xlu0 %1754  ;;  %1788 = vrot.lane.b32.xlu1 %v1771_v31, %s6054_s24  ;;  %v1718_v31 = vrot.slane %v6827_v21, 7  ;;  %v1720_v21 = vrot.slane %v6836_v5, 7 }
 0xabb   : > { %v1774_v46 = vmul.f32 %v6927_v22, %v1755_v60  ;;  %v1757_v14 = vpop.permute.xlu1 %1756  ;;  %v1731_v32 = vmul.f32 %v6924_v12, %v1715_v7 }
 0xabc   : > { %v1775_v4 = vmul.f32 %v6932_v51, %v1757_v14  ;;  %v1734_v14 = vmul.f32 %v6927_v22, %v1718_v31  ;;  %v1736_v37 = vmul.f32 %v6935_v23, %v1720_v21 }
 0xabd   : > { %1794 = vrot.lane.b32.xlu0 %v1774_v46, %s6054_s24 }
 0xabe   : > { %v1759_v52 = vpop.permute.xlu0 %1758  ;;  %1796 = vrot.lane.b32.xlu1 %v1775_v4, %s6054_s24 }
 0xabf   : > { %v1776_v39 = vmul.f32 %v6935_v23, %v1759_v52  ;;  %v1761_v6 = vpop.permute.xlu1 %1760 }
 0xac0   : > { %v1777_v53 = vmul.f32 %v6940_v55, %v1761_v6  ;;  %v1735_v6 = vmul.f32 %v6932_v51, %v1719_v25 }
 0xac1   : > { %1798 = vrot.lane.b32.xlu0 %v1776_v39, %s6054_s24 }
 0xac2   : > { %1800 = vrot.lane.b32.xlu1 %v1777_v53, %s6054_s24 }
 0xb27   : > { %v1787_v15 = vpop.permute.xlu0 %1786 }
 0xb28   : > { %v6947_v57 = vadd.f32 %v1787_v15, %v1730_v61  ;;  %v1791_v10 = vpop.permute.xlu1 %1790  ;;  %v1721_v61 = vrot.slane %v6838_v40, 7 }
 0xb29   : > { %v6955_v18 = vadd.f32 %v1791_v10, %v1732_v26 }
 0xb2a   : > { %5348 = vtanh.f32 %v6947_v57  ;;  %v1737_v5 = vmul.f32 %v6940_v55, %v1721_v61 }
 0xb2b   : > { %v1793_v38 = vpop.permute.xlu0 %1792  ;;  %5350 = vtanh.f32 %v6955_v18 }
 0xb2c   : > { %v6958_v60 = vadd.f32 %v1793_v38, %v1733_v2  ;;  %v1789_v49 = vpop.permute.xlu1 %1788 }
 0xb2d   : > { %v6966_v4 = vadd.f32 %v1789_v49, %v1731_v32 }
 0xb2e   : > { %5352 = vtanh.f32 %v6958_v60 }
 0xb2f   : > { %v1795_v52 = vpop.permute.xlu0 %1794  ;;  %5354 = vtanh.f32 %v6966_v4 }
 0xb30   : > { %v6969_v39 = vadd.f32 %v1795_v52, %v1734_v14  ;;  %v1797_v53 = vpop.permute.xlu1 %1796  ;;  %v3607_v14 = vsel %vm3606_vm12, %v6711_v43, %v6854_v56 }
 0xb31   : > { %v6976_v15 = vadd.f32 %v1797_v53, %v1735_v6  ;;  %v3609_v53 = vsel %vm3606_vm12, %v6714_v47, %v6851_v30  ;;  %v3608_v47 = vsel %vm3606_vm12, %v6708_v41, %v6860_v36  ;;  %v3611_v30 = vsel %vm3606_vm12, %v6728_v28, %v6868_v13 }
 0xb32   : > { %5356 = vtanh.f32 %v6969_v39  ;;  %v3612_v28 = vsel %vm3606_vm12, %v6725_v54, %v6872_v20 }
 0xb33   : > { %v1799_v58 = vpop.permute.xlu0 %1798  ;;  %5358 = vtanh.f32 %v6976_v15 }
 0xb34   : > { %v5349_v46 = vpop.eup %5348  ;;  %v6978_v17 = vadd.f32 %v1799_v58, %v1736_v37  ;;  %v1801_v59 = vpop.permute.xlu1 %1800 }
 0xb35   : > { %1834 = vrot.lane.b32.xlu0 %v5349_v46, %s6053_s25  ;;  %v5351_v26 = vpop.eup %5350  ;;  %v6983_v10 = vadd.f32 %v1801_v59, %v1737_v5 }
 0xb36   : > { %5360 = vtanh.f32 %v6978_v17  ;;  %1838 = vrot.lane.b32.xlu1 %v5351_v26, %s6053_s25 }
 0xb37   : > { %5362 = vtanh.f32 %v6983_v10 }
 0xb38   : > { %v5353_v2 = vpop.eup %5352 }
 0xb39   : > { %1840 = vrot.lane.b32.xlu0 %v5353_v2, %s6053_s25  ;;  %v5355_v40 = vpop.eup %5354 }
 0xb3a   : > { %1836 = vrot.lane.b32.xlu1 %v5355_v40, %s6053_s25 }
 0xb3c   : > { %v5357_v7 = vpop.eup %5356 }
 0xb3d   : > { %1842 = vrot.lane.b32.xlu0 %v5357_v7, %s6053_s25  ;;  %v5359_v38 = vpop.eup %5358  ;;  %v3613_v7 = vsel %vm3606_vm12, %v6739_v1, %v6879_v63  ;;  %v3614_v1 = vsel %vm3606_vm12, %v6736_v29, %v6882_v34 }
 0xb3e   : > { %1844 = vrot.lane.b32.xlu1 %v5359_v38, %s6053_s25 }
 0xb40   : > { %v5361_v31 = vpop.eup %5360 }
 0xb41   : > { %1846 = vrot.lane.b32.xlu0 %v5361_v31, %s6053_s25  ;;  %v5363_v46 = vpop.eup %5362 }
 0xb42   : > { %1848 = vrot.lane.b32.xlu1 %v5363_v46, %s6053_s25 }
 0xba7   : > { %v1835_v32 = vpop.permute.xlu0 %1834 }
 0xba8   : > { %v1858_v49 = vmul.f32 %v6913_v62, %v1835_v32  ;;  %v1839_v52 = vpop.permute.xlu1 %1838  ;;  %v3610_v62 = vsel %vm3606_vm12, %v6718_v50, %v6857_v33 }
 0xba9   : > { %v1860_v21 = vmul.f32 %v6917_v8, %v1839_v52 }
 0xbaa   : > { %v6998_v25 = vsel %vm3615_vm13, %v3607_v14, %v1858_v49  ;;  %v1874_v33 = vrot.slane %v1858_v49, 2 }
 0xbab   : > { %v1841_v6 = vpop.permute.xlu0 %1840  ;;  %v7009_v43 = vsel %vm3615_vm13, %v3609_v53, %v1860_v21 }
 0xbac   : > { %v1861_v37 = vmul.f32 %v6919_v35, %v1841_v6  ;;  %v1837_v56 = vpop.permute.xlu1 %1836 }
 0xbad   : > { %v1859_v8 = vmul.f32 %v6924_v12, %v1837_v56 }
 0xbae   : > { %v7012_v61 = vsel %vm3615_vm13, %v3610_v62, %v1861_v37  ;;  %v1878_v59 = vrot.slane %v1861_v37, 7 }
 0xbaf   : > { %v1843_v58 = vpop.permute.xlu0 %1842  ;;  %v1875_v35 = vrot.slane %v1859_v8, 1  ;;  %v7023_v5 = vsel %vm3615_vm13, %v3608_v47, %v1859_v8 }
 0xbb0   : > { %v1862_v50 = vmul.f32 %v6927_v22, %v1843_v58  ;;  %v1845_v26 = vpop.permute.xlu1 %1844 }
 0xbb1   : > { %v1876_v40 = vsel %vm1196_vm5, %v1875_v35, %v1874_v33  ;;  %v1863_v41 = vmul.f32 %v6932_v51, %v1845_v26 }
 0xbb2   : > { %v1880_v2 = vrot.slane %v1862_v50, 6  ;;  %v7026_v12 = vsel %vm3615_vm13, %v3611_v30, %v1862_v50  ;;  %v1877_v13 = vsel %vm1199_vm6, %v1860_v21, %v1876_v40 }
 0xbb3   : > { %v1847_v36 = vpop.permute.xlu0 %1846  ;;  %v1879_v38 = vsel %vm1202_vm7, %v1878_v59, %v1877_v13  ;;  %v1882_v31 = vrot.slane %v1863_v41, 5  ;;  %v7040_v46 = vsel %vm3615_vm13, %v3612_v28, %v1863_v41 }
 0xbb4   : > { %v1864_v22 = vmul.f32 %v6935_v23, %v1847_v36  ;;  %v1881_v51 = vsel %vm1205_vm8, %v1880_v2, %v1879_v38  ;;  %v1849_v32 = vpop.permute.xlu1 %1848 }
 0xbb5   : > { %v1865_v20 = vmul.f32 %v6940_v55, %v1849_v32  ;;  %v1883_v23 = vsel %vm1208_vm9, %v1882_v31, %v1881_v51 }
 0xbb6   : > { %v1884_v49 = vrot.slane %v1864_v22, 4  ;;  %v7044_v54 = vsel %vm3615_vm13, %v3613_v7, %v1864_v22 }
 0xbb7   : > { %v1886_v14 = vrot.slane %v1865_v20, 3  ;;  %v7053_v52 = vsel %vm3615_vm13, %v3614_v1, %v1865_v20 }
 0xbb8   : > { %v1885_v63 = vsel %vm1211_vm10, %v1884_v49, %v1883_v23 }
 0xbb9   : > { %v1887_v21 = vsel %vm1214_vm11, %v1886_v14, %v1885_v63 }
 0xbba   : > { %1888 = vrot.lane.b32.xlu0 %v1887_v21, %s6054_s24 }
 0xc2c   : > { %v1889_v6 = vpop.permute.xlu0 %1888 }
 0xc2d   : > { %4857 = vmatmul.mubr.msk.f32.vlgmr.msra.gmra.mrb[4].mxu1 %vm734_vm2, %v1889_v6 }
 0xc2e   : > { %4975 = vmatpush3.bf16.msra.mxu1 %v6517_v42  ;;  %4878 = vmatprep.mubr.msk.f32.mxu1 %vm6052_vm4, %v6051_v48 }
 0xc2f   : > { %4976 = vmatprep.subr.bf16.mxu1 %v6049_v44 }
 0xc32   : > { %4978 = vmatpush3.bf16.msra.mxu1 %v6524_v45 }
 0xc33   : > { %4985 = vmatprep.subr.bf16.mxu1 %v6049_v44 }
 0xd00   : > { %v1958_v29 = vpop.f32.mrb[4].mxu1 }
 0xd01   : > { %v4858_v34 = vpop.f32.mrb[5].mxu1  ;;  %v1964_v55 = vrot.slane %v1958_v29, 6  ;;  %v1966_v53 = vrot.slane %v1958_v29, 1  ;;  %v1963_v62 = vrot.slane %v1958_v29, 5  ;;  %v1981_v56 = vadd.f32 %v1958_v29, %v6597_v9 }
 0xd02   : > { %v1967_v8 = vrot.slane %v1958_v29, 2  ;;  %v1965_v47 = vrot.slane %v1958_v29, 7  ;;  %v1969_v50 = vrot.slane %v1958_v29, 4  ;;  %v1968_v35 = vrot.slane %v1958_v29, 3 }
 0xd03   : > { %v1979_v37 = vadd.f32 %v1964_v55, %v6587_v0  ;;  %v1982_v58 = vadd.f32 %v1966_v53, %v6607_v19  ;;  %v1978_v30 = vadd.f32 %v1963_v62, %v6589_v3  ;;  %v4640_v51 = vmul.f32 -1.442695, %v1981_v56 }
 0xd04   : > { %v1983_v33 = vadd.f32 %v1967_v8, %v6605_v16  ;;  %v1980_v59 = vadd.f32 %v1965_v47, %v6600_v11  ;;  %v1985_v26 = vadd.f32 %v1969_v50, %v6611_v24  ;;  %v1984_v40 = vadd.f32 %v1968_v35, %v6613_v27 }
 0xd05   : > { %5364 = vtanh.f32 %v1979_v37  ;;  %v4638_v31 = vmul.f32 -1.442695, %v1979_v37  ;;  %v4641_v32 = vmul.f32 -1.442695, %v1982_v58  ;;  %v4637_v49 = vmul.f32 -1.442695, %v1978_v30 }
 0xd06   : > { %5366 = vtanh.f32 %v1981_v56  ;;  %v4642_v20 = vmul.f32 -1.442695, %v1983_v33  ;;  %v4639_v23 = vmul.f32 -1.442695, %v1980_v59  ;;  %v4644_v1 = vmul.f32 -1.442695, %v1985_v26 }
 0xd07   : > { %5368 = vtanh.f32 %v1982_v58  ;;  %v4643_v14 = vmul.f32 -1.442695, %v1984_v40 }
 0xd08   : > { %5370 = vtanh.f32 %v1978_v30 }
 0xd09   : > { %5372 = vtanh.f32 %v1983_v33 }
 0xd0a   : > { %5374 = vtanh.f32 %v1980_v59 }
 0xd0b   : > { %5376 = vtanh.f32 %v1985_v26 }
 0xd0c   : > { %5378 = vtanh.f32 %v1984_v40 }
 0xd0d   : > { %5380 = vpow2.f32 %v4638_v31 }
 0xd0e   : > { %5382 = vpow2.f32 %v4640_v51 }
 0xd0f   : > { %v5365_v2 = vpop.eup %5364  ;;  %5384 = vpow2.f32 %v4641_v32 }
 0xd10   : > { %2084 = vrot.lane.b32.xlu0 %v5365_v2, %s6053_s25  ;;  %v5367_v41 = vpop.eup %5366  ;;  %5386 = vpow2.f32 %v4637_v49 }
 0xd11   : > { %2088 = vrot.lane.b32.xlu1 %v5367_v41, %s6053_s25  ;;  %v5369_v36 = vpop.eup %5368  ;;  %5388 = vpow2.f32 %v4642_v20 }
 0xd12   : > { %v5371_v28 = vpop.eup %5370  ;;  %5390 = vpow2.f32 %v4639_v23 }
 0xd13   : > { %v5373_v13 = vpop.eup %5372  ;;  %5392 = vpow2.f32 %v4644_v1 }
 0xd14   : > { %2090 = vrot.lane.b32.xlu0 %v5369_v36, %s6053_s25  ;;  %v5375_v22 = vpop.eup %5374  ;;  %5394 = vpow2.f32 %v4643_v14 }
 0xd15   : > { %2082 = vrot.lane.b32.xlu1 %v5371_v28, %s6053_s25  ;;  %v5377_v7 = vpop.eup %5376 }
 0xd16   : > { %v5379_v38 = vpop.eup %5378 }
 0xd17   : > { %v5381_v63 = vpop.eup %5380 }
 0xd18   : > { %2092 = vrot.lane.b32.xlu0 %v5373_v13, %s6053_s25  ;;  %v5383_v21 = vpop.eup %5382  ;;  %v2011_v6 = vadd.f32 1.0, %v5381_v63 }
 0xd19   : > { %2086 = vrot.lane.b32.xlu1 %v5375_v22, %s6053_s25  ;;  %v5385_v29 = vpop.eup %5384  ;;  %v2013_v34 = vadd.f32 1.0, %v5383_v21 }
 0xd1a   : > { %v5387_v55 = vpop.eup %5386  ;;  %5396 = vrcp.f32 %v2011_v6  ;;  %v2014_v53 = vadd.f32 1.0, %v5385_v29 }
 0xd1b   : > { %v5389_v37 = vpop.eup %5388  ;;  %5398 = vrcp.f32 %v2013_v34  ;;  %v2010_v62 = vadd.f32 1.0, %v5387_v55  ;;  %v2051_v34 = vrot.slane %v6966_v4, 7  ;;  %v2053_v55 = vrot.slane %v6958_v60, 7 }
 0xd1c   : > { %2096 = vrot.lane.b32.xlu0 %v5377_v7, %s6053_s25  ;;  %v5391_v56 = vpop.eup %5390  ;;  %5400 = vrcp.f32 %v2014_v53  ;;  %v2015_v8 = vadd.f32 1.0, %v5389_v37  ;;  %v2055_v60 = vrot.slane %v6976_v15, 7 }
 0xd1d   : > { %2094 = vrot.lane.b32.xlu1 %v5379_v38, %s6053_s25  ;;  %v5393_v58 = vpop.eup %5392  ;;  %5402 = vrcp.f32 %v2010_v62  ;;  %v2012_v47 = vadd.f32 1.0, %v5391_v56  ;;  %v2054_v62 = vrot.slane %v6969_v39, 7 }
 0xd1e   : > { %v5395_v30 = vpop.eup %5394  ;;  %5404 = vrcp.f32 %v2015_v8  ;;  %v2017_v50 = vadd.f32 1.0, %v5393_v58 }
 0xd1f   : > { %5406 = vrcp.f32 %v2012_v47  ;;  %v2016_v59 = vadd.f32 1.0, %v5395_v30  ;;  %v2050_v47 = vrot.slane %v6947_v57, 7 }
 0xd20   : > { %5408 = vrcp.f32 %v2017_v50 }
 0xd21   : > { %5410 = vrcp.f32 %v2016_v59 }
 0xd24   : > { %v7080_v33 = vpop.eup %5396 }
 0xd25   : > { %v7083_v2 = vpop.eup %5398  ;;  %v2067_v53 = vmul.f32 %v7080_v33, %v2051_v34 }
 0xd26   : > { %v7087_v36 = vpop.eup %5400  ;;  %v2069_v56 = vmul.f32 %v7083_v2, %v2053_v55 }
 0xd27   : > { %v7091_v22 = vpop.eup %5402  ;;  %v2070_v4 = vmul.f32 %v7087_v36, %v2054_v62 }
 0xd28   : > { %v7095_v31 = vpop.eup %5404  ;;  %v2066_v39 = vmul.f32 %v7091_v22, %v2050_v47 }
 0xd29   : > { %v7099_v49 = vpop.eup %5406  ;;  %v2071_v57 = vmul.f32 %v7095_v31, %v2055_v60 }
 0xd2a   : > { %v7103_v1 = vpop.eup %5408 }
 0xd2b   : > { %v7107_v21 = vpop.eup %5410 }
 0xd82   : > { %v2085_v35 = vpop.permute.xlu0 %2084 }
 0xd83   : > { %v2107_v26 = vmul.f32 %v7080_v33, %v2085_v35  ;;  %v2089_v40 = vpop.permute.xlu1 %2088 }
 0xd84   : > { %v2109_v41 = vmul.f32 %v7083_v2, %v2089_v40 }
 0xd85   : > { %2124 = vrot.lane.b32.xlu0 %v2107_v26, %s6054_s24  ;;  %v2052_v26 = vrot.slane %v6955_v18, 7 }
 0xd86   : > { %v2091_v28 = vpop.permute.xlu0 %2090  ;;  %2128 = vrot.lane.b32.xlu1 %v2109_v41, %s6054_s24 }
 0xd87   : > { %v2110_v13 = vmul.f32 %v7087_v36, %v2091_v28  ;;  %v2083_v7 = vpop.permute.xlu1 %2082  ;;  %v2057_v28 = vrot.slane %v6983_v10, 7  ;;  %v2068_v15 = vmul.f32 %v7099_v49, %v2052_v26 }
 0xd88   : > { %v2106_v38 = vmul.f32 %v7091_v22, %v2083_v7 }
 0xd89   : > { %2130 = vrot.lane.b32.xlu0 %v2110_v13, %s6054_s24  ;;  %v2073_v18 = vmul.f32 %v7103_v1, %v2057_v28 }
 0xd8a   : > { %v2093_v51 = vpop.permute.xlu0 %2092  ;;  %2122 = vrot.lane.b32.xlu1 %v2106_v38, %s6054_s24  ;;  %v2056_v38 = vrot.slane %v6978_v17, 7 }
 0xd8b   : > { %v2111_v32 = vmul.f32 %v7095_v31, %v2093_v51  ;;  %v2087_v20 = vpop.permute.xlu1 %2086 }
 0xd8c   : > { %v2108_v23 = vmul.f32 %v7099_v49, %v2087_v20  ;;  %v2072_v10 = vmul.f32 %v7107_v21, %v2056_v38 }
 0xd8d   : > { %2132 = vrot.lane.b32.xlu0 %v2111_v32, %s6054_s24 }
 0xd8e   : > { %v2097_v63 = vpop.permute.xlu0 %2096  ;;  %2126 = vrot.lane.b32.xlu1 %v2108_v23, %s6054_s24 }
 0xd8f   : > { %v2113_v14 = vmul.f32 %v7103_v1, %v2097_v63  ;;  %v2095_v6 = vpop.permute.xlu1 %2094 }
 0xd90   : > { %v2112_v29 = vmul.f32 %v7107_v21, %v2095_v6 }
 0xd91   : > { %2136 = vrot.lane.b32.xlu0 %v2113_v14, %s6054_s24 }
 0xd92   : > { %2134 = vrot.lane.b32.xlu1 %v2112_v29, %s6054_s24 }
 0xdf7   : > { %v2125_v37 = vpop.permute.xlu0 %2124 }
 0xdf8   : > { %v7117_v8 = vadd.f32 %v2125_v37, %v2067_v53  ;;  %v2129_v58 = vpop.permute.xlu1 %2128 }
 0xdf9   : > { %v7120_v30 = vadd.f32 %v2129_v58, %v2069_v56 }
 0xdfa   : > { %5412 = vtanh.f32 %v7117_v8 }
 0xdfb   : > { %v2131_v50 = vpop.permute.xlu0 %2130  ;;  %5414 = vtanh.f32 %v7120_v30 }
 0xdfc   : > { %v7127_v35 = vadd.f32 %v2131_v50, %v2070_v4  ;;  %v2123_v59 = vpop.permute.xlu1 %2122 }
 0xdfd   : > { %v7130_v40 = vadd.f32 %v2123_v59, %v2066_v39 }
 0xdfe   : > { %5416 = vtanh.f32 %v7127_v35 }
 0xdff   : > { %v2133_v41 = vpop.permute.xlu0 %2132  ;;  %5418 = vtanh.f32 %v7130_v40 }
 0xe00   : > { %v7137_v13 = vadd.f32 %v2133_v41, %v2071_v57  ;;  %v2127_v7 = vpop.permute.xlu1 %2126 }
 0xe01   : > { %v7140_v51 = vadd.f32 %v2127_v7, %v2068_v15 }
 0xe02   : > { %5420 = vtanh.f32 %v7137_v13 }
 0xe03   : > { %v2137_v32 = vpop.permute.xlu0 %2136  ;;  %5422 = vtanh.f32 %v7140_v51 }
 0xe04   : > { %v5413_v20 = vpop.eup %5412  ;;  %v7146_v23 = vadd.f32 %v2137_v32, %v2073_v18  ;;  %v2135_v63 = vpop.permute.xlu1 %2134 }
 0xe05   : > { %2172 = vrot.lane.b32.xlu0 %v5413_v20, %s6053_s25  ;;  %v5415_v14 = vpop.eup %5414  ;;  %v7149_v6 = vadd.f32 %v2135_v63, %v2072_v10 }
 0xe06   : > { %5424 = vtanh.f32 %v7146_v23  ;;  %2176 = vrot.lane.b32.xlu1 %v5415_v14, %s6053_s25 }
 0xe07   : > { %5426 = vtanh.f32 %v7149_v6 }
 0xe08   : > { %v5417_v17 = vpop.eup %5416 }
 0xe09   : > { %2178 = vrot.lane.b32.xlu0 %v5417_v17, %s6053_s25  ;;  %v5419_v29 = vpop.eup %5418 }
 0xe0a   : > { %2170 = vrot.lane.b32.xlu1 %v5419_v29, %s6053_s25 }
 0xe0c   : > { %v5421_v34 = vpop.eup %5420 }
 0xe0d   : > { %2180 = vrot.lane.b32.xlu0 %v5421_v34, %s6053_s25  ;;  %v5423_v55 = vpop.eup %5422 }
 0xe0e   : > { %2174 = vrot.lane.b32.xlu1 %v5423_v55, %s6053_s25 }
 0xe10   : > { %v5425_v53 = vpop.eup %5424 }
 0xe11   : > { %2184 = vrot.lane.b32.xlu0 %v5425_v53, %s6053_s25  ;;  %v5427_v37 = vpop.eup %5426 }
 0xe12   : > { %2182 = vrot.lane.b32.xlu1 %v5427_v37, %s6053_s25 }
 0xe77   : > { %v2173_v62 = vpop.permute.xlu0 %2172 }
 0xe78   : > { %v2195_v56 = vmul.f32 %v7080_v33, %v2173_v62  ;;  %v2177_v58 = vpop.permute.xlu1 %2176 }
 0xe79   : > { %v2197_v47 = vmul.f32 %v7083_v2, %v2177_v58 }
 0xe7a   : > { %v7164_v4 = vsel %vm3624_vm14, %v7023_v5, %v2195_v56 }
 0xe7b   : > { %v2179_v50 = vpop.permute.xlu0 %2178  ;;  %v7168_v60 = vsel %vm3624_vm14, %v7012_v61, %v2197_v47 }
 0xe7c   : > { %v2198_v39 = vmul.f32 %v7087_v36, %v2179_v50  ;;  %v2171_v59 = vpop.permute.xlu1 %2170 }
 0xe7d   : > { %v2194_v26 = vmul.f32 %v7091_v22, %v2171_v59  ;;  %v2211_v22 = vrot.slane %v2195_v56, 2 }
 0xe7e   : > { %v7174_v33 = vsel %vm3624_vm14, %v7026_v12, %v2198_v39  ;;  %v2216_v32 = vrot.slane %v2198_v39, 7 }
 0xe7f   : > { %v2181_v57 = vpop.permute.xlu0 %2180  ;;  %v7178_v2 = vsel %vm3624_vm14, %v6998_v25, %v2194_v26  ;;  %v2210_v41 = vrot.slane %v2194_v26, 3 }
 0xe80   : > { %v2199_v5 = vmul.f32 %v7095_v31, %v2181_v57  ;;  %v2175_v28 = vpop.permute.xlu1 %2174 }
 0xe81   : > { %v2196_v61 = vmul.f32 %v7099_v49, %v2175_v28  ;;  %v2212_v38 = vsel %vm1196_vm5, %v2211_v22, %v2210_v41 }
 0xe82   : > { %v7184_v36 = vsel %vm3624_vm14, %v7040_v46, %v2199_v5  ;;  %v2218_v31 = vrot.slane %v2199_v5, 6 }
 0xe83   : > { %v2185_v15 = vpop.permute.xlu0 %2184  ;;  %v2213_v7 = vrot.slane %v2196_v61, 1  ;;  %v7188_v12 = vsel %vm3624_vm14, %v7009_v43, %v2196_v61 }
 0xe84   : > { %v2201_v25 = vmul.f32 %v7103_v1, %v2185_v15  ;;  %v2183_v18 = vpop.permute.xlu1 %2182 }
 0xe85   : > { %v2214_v49 = vsel %vm1199_vm6, %v2213_v7, %v2212_v38  ;;  %v2200_v20 = vmul.f32 %v7107_v21, %v2183_v18 }
 0xe86   : > { %v7196_v46 = vsel %vm3624_vm14, %v7053_v52, %v2201_v25  ;;  %v2215_v10 = vsel %vm1202_vm7, %v2197_v47, %v2214_v49  ;;  %v2222_v63 = vrot.slane %v2201_v25, 4 }
 0xe87   : > { %v2220_v43 = vrot.slane %v2200_v20, 5  ;;  %v7201_v1 = vsel %vm3624_vm14, %v7044_v54, %v2200_v20  ;;  %v2217_v14 = vsel %vm1205_vm8, %v2216_v32, %v2215_v10 }
 0xe88   : > { %v2219_v17 = vsel %vm1208_vm9, %v2218_v31, %v2217_v14 }
 0xe89   : > { %v2221_v29 = vsel %vm1211_vm10, %v2220_v43, %v2219_v17 }
 0xe8a   : > { %v2223_v21 = vsel %vm1214_vm11, %v2222_v63, %v2221_v29 }
 0xe8b   : > { %2224 = vrot.lane.b32.xlu1 %v2223_v21, %s6054_s24 }
 0xefd   : > { %v2225_v52 = vpop.permute.xlu1 %2224 }
 0xefe   : > { %4868 = vmatmul.mubr.msk.f32.vlgmr.msra.gmra.mrb[10].mxu0 %vm734_vm2, %v2225_v52 }
 0xeff   : > { %4981 = vmatpush3.bf16.msra.mxu0 %v6517_v42  ;;  %4889 = vmatprep.mubr.msk.f32.mxu0 %vm6052_vm4, %v6051_v48 }
 0xf00   : > { %4982 = vmatprep.subr.bf16.mxu0 %v6049_v44 }
 0xf03   : > { %4984 = vmatpush3.bf16.msra.mxu0 %v6524_v45 }
 0xfd1   : > { %v2294_v54 = vpop.f32.mrb[10].mxu0 }
 0xfd2   : > { %v2299_v34 = vrot.slane %v2294_v54, 4  ;;  %v4869_v55 = vpop.f32.mrb[11].mxu0  ;;  %v2301_v37 = vrot.slane %v2294_v54, 6  ;;  %v2303_v62 = vrot.slane %v2294_v54, 1  ;;  %v2300_v58 = vrot.slane %v2294_v54, 5 }
 0xfd3   : > { %v2318_v47 = vadd.f32 %v2294_v54, %v6607_v19  ;;  %v2304_v39 = vrot.slane %v2294_v54, 2  ;;  %v2302_v26 = vrot.slane %v2294_v54, 7  ;;  %v2305_v41 = vrot.slane %v2294_v54, 3 }
 0xfd4   : > { %v2314_v53 = vadd.f32 %v2299_v34, %v6589_v3  ;;  %v2316_v56 = vadd.f32 %v2301_v37, %v6600_v11  ;;  %v2319_v59 = vadd.f32 %v2303_v62, %v6605_v16  ;;  %v2315_v57 = vadd.f32 %v2300_v58, %v6587_v0 }
 0xfd5   : > { %v2320_v5 = vadd.f32 %v2304_v39, %v6613_v27  ;;  %v2317_v28 = vadd.f32 %v2302_v26, %v6597_v9  ;;  %v2321_v22 = vadd.f32 %v2305_v41, %v6611_v24  ;;  %v4650_v20 = vmul.f32 -1.442695, %v2318_v47 }
 0xfd6   : > { %5428 = vtanh.f32 %v2314_v53  ;;  %v4646_v32 = vmul.f32 -1.442695, %v2314_v53  ;;  %v4648_v49 = vmul.f32 -1.442695, %v2316_v56  ;;  %v4651_v63 = vmul.f32 -1.442695, %v2319_v59 }
 0xfd7   : > { %5430 = vtanh.f32 %v2316_v56  ;;  %v4647_v43 = vmul.f32 -1.442695, %v2315_v57  ;;  %v4652_v17 = vmul.f32 -1.442695, %v2320_v5  ;;  %v4649_v29 = vmul.f32 -1.442695, %v2317_v28 }
 0xfd8   : > { %5432 = vtanh.f32 %v2318_v47  ;;  %v4653_v52 = vmul.f32 -1.442695, %v2321_v22 }
 0xfd9   : > { %5434 = vtanh.f32 %v2319_v59 }
 0xfda   : > { %5436 = vtanh.f32 %v2315_v57 }
 0xfdb   : > { %5438 = vtanh.f32 %v2320_v5 }
 0xfdc   : > { %5440 = vtanh.f32 %v2317_v28 }
 0xfdd   : > { %5442 = vtanh.f32 %v2321_v22 }
 0xfde   : > { %5444 = vpow2.f32 %v4646_v32 }
 0xfdf   : > { %5446 = vpow2.f32 %v4648_v49 }
 0xfe0   : > { %v5429_v50 = vpop.eup %5428  ;;  %5448 = vpow2.f32 %v4650_v20 }
 0xfe1   : > { %2418 = vrot.lane.b32.xlu0 %v5429_v50, %s6053_s25  ;;  %v5431_v61 = vpop.eup %5430  ;;  %5450 = vpow2.f32 %v4651_v63 }
 0xfe2   : > { %v5433_v15 = vpop.eup %5432  ;;  %5452 = vpow2.f32 %v4647_v43 }
 0xfe3   : > { %2426 = vrot.lane.b32.xlu1 %v5433_v15, %s6053_s25  ;;  %v5435_v7 = vpop.eup %5434 }
 0xfe4   : > { %v5437_v25 = vpop.eup %5436 }
 0xfe5   : > { %2422 = vrot.lane.b32.xlu0 %v5431_v61, %s6053_s25  ;;  %v5439_v38 = vpop.eup %5438 }
 0xfe6   : > { %v5441_v31 = vpop.eup %5440 }
 0xfe7   : > { %2420 = vrot.lane.b32.xlu1 %v5437_v25, %s6053_s25  ;;  %v5443_v18 = vpop.eup %5442 }
 0xfe8   : > { %v5445_v10 = vpop.eup %5444 }
 0xfe9   : > { %2428 = vrot.lane.b32.xlu0 %v5435_v7, %s6053_s25  ;;  %v2346_v14 = vadd.f32 1.0, %v5445_v10  ;;  %v5447_v21 = vpop.eup %5446 }
 0xfea   : > { %v5449_v54 = vpop.eup %5448  ;;  %v2348_v34 = vadd.f32 1.0, %v5447_v21 }
 0xfeb   : > { %2424 = vrot.lane.b32.xlu1 %v5441_v31, %s6053_s25  ;;  %5454 = vrcp.f32 %v2346_v14  ;;  %v5451_v55 = vpop.eup %5450  ;;  %v2350_v53 = vadd.f32 1.0, %v5449_v54 }
 0xfec   : > { %5456 = vpow2.f32 %v4652_v17  ;;  %v5453_v37 = vpop.eup %5452  ;;  %v2351_v58 = vadd.f32 1.0, %v5451_v55 }
 0xfed   : > { %2430 = vrot.lane.b32.xlu0 %v5439_v38, %s6053_s25  ;;  %5458 = vpow2.f32 %v4649_v29  ;;  %v2347_v39 = vadd.f32 1.0, %v5453_v37 }
 0xfee   : > { %5460 = vpow2.f32 %v4653_v52 }
 0xfef   : > { %2432 = vrot.lane.b32.xlu1 %v5443_v18, %s6053_s25  ;;  %5462 = vrcp.f32 %v2348_v34  ;;  %v2386_v34 = vrot.slane %v7130_v40, 7 }
 0xff0   : > { %5464 = vrcp.f32 %v2350_v53 }
 0xff1   : > { %5466 = vrcp.f32 %v2351_v58  ;;  %v2390_v58 = vrot.slane %v7127_v35, 7 }
 0xff2   : > { %5468 = vrcp.f32 %v2347_v39  ;;  %v2391_v39 = vrot.slane %v7137_v13, 7 }
 0xff5   : > { %v7230_v62 = vpop.eup %5454 }
 0xff6   : > { %v5457_v47 = vpop.eup %5456  ;;  %v2402_v55 = vmul.f32 %v7230_v62, %v2386_v34 }
 0xff7   : > { %v5459_v59 = vpop.eup %5458  ;;  %v2352_v26 = vadd.f32 1.0, %v5457_v47 }
 0xff8   : > { %v2349_v57 = vadd.f32 1.0, %v5459_v59  ;;  %v5461_v5 = vpop.eup %5460 }
 0xff9   : > { %5470 = vrcp.f32 %v2352_v26  ;;  %v7234_v41 = vpop.eup %5462  ;;  %v2353_v61 = vadd.f32 1.0, %v5461_v5  ;;  %v2387_v5 = vrot.slane %v7117_v8, 7  ;;  %v2389_v8 = vrot.slane %v7120_v30, 7 }
 0xffa   : > { %5472 = vrcp.f32 %v2349_v57  ;;  %v7237_v15 = vpop.eup %5464 }
 0xffb   : > { %v7241_v38 = vpop.eup %5466  ;;  %5474 = vrcp.f32 %v2353_v61  ;;  %v2406_v59 = vmul.f32 %v7237_v15, %v2390_v58  ;;  %v2392_v61 = vrot.slane %v7149_v6, 7 }
 0xffc   : > { %v7245_v32 = vpop.eup %5468 }
 0xffd   : > { %v2403_v13 = vmul.f32 %v7245_v32, %v2387_v5 }
0x1003   : > { %v7249_v10 = vpop.eup %5470 }
0x1004   : > { %v7253_v14 = vpop.eup %5472 }
0x1005   : > { %v7258_v21 = vpop.eup %5474  ;;  %v2405_v6 = vmul.f32 %v7253_v14, %v2389_v8 }
0x1053   : > { %v2419_v56 = vpop.permute.xlu0 %2418 }
0x1054   : > { %v2442_v50 = vmul.f32 %v7230_v62, %v2419_v56  ;;  %v2388_v56 = vrot.slane %v7140_v51, 7  ;;  %v2407_v51 = vmul.f32 %v7241_v38, %v2391_v39 }
0x1055   : > { %v2427_v7 = vpop.permute.xlu1 %2426 }
0x1056   : > { %2458 = vrot.lane.b32.xlu0 %v2442_v50, %s6054_s24  ;;  %v2446_v25 = vmul.f32 %v7237_v15, %v2427_v7  ;;  %v2404_v47 = vmul.f32 %v7234_v41, %v2388_v56 }
0x1057   : > { %v2423_v28 = vpop.permute.xlu0 %2422 }
0x1058   : > { %v2444_v22 = vmul.f32 %v7234_v41, %v2423_v28  ;;  %2466 = vrot.lane.b32.xlu1 %v2446_v25, %s6054_s24 }
0x1059   : > { %v2421_v49 = vpop.permute.xlu1 %2420 }
0x105a   : > { %2462 = vrot.lane.b32.xlu0 %v2444_v22, %s6054_s24  ;;  %v2443_v20 = vmul.f32 %v7245_v32, %v2421_v49 }
0x105b   : > { %v2429_v31 = vpop.permute.xlu0 %2428 }
0x105c   : > { %v2447_v18 = vmul.f32 %v7241_v38, %v2429_v31  ;;  %2460 = vrot.lane.b32.xlu1 %v2443_v20, %s6054_s24  ;;  %v2408_v31 = vmul.f32 %v7249_v10, %v2392_v61 }
0x105d   : > { %v2425_v17 = vpop.permute.xlu1 %2424 }
0x105e   : > { %2468 = vrot.lane.b32.xlu0 %v2447_v18, %s6054_s24  ;;  %v2445_v29 = vmul.f32 %v7253_v14, %v2425_v17 }
0x105f   : > { %v2431_v63 = vpop.permute.xlu0 %2430 }
0x1060   : > { %v2448_v43 = vmul.f32 %v7249_v10, %v2431_v63  ;;  %2464 = vrot.lane.b32.xlu1 %v2445_v29, %s6054_s24  ;;  %v2393_v63 = vrot.slane %v7146_v23, 7 }
0x1061   : > { %v2433_v52 = vpop.permute.xlu1 %2432 }
0x1062   : > { %2470 = vrot.lane.b32.xlu0 %v2448_v43, %s6054_s24  ;;  %v2449_v54 = vmul.f32 %v7258_v21, %v2433_v52  ;;  %v2409_v17 = vmul.f32 %v7258_v21, %v2393_v63 }
0x1064   : > { %2472 = vrot.lane.b32.xlu1 %v2449_v54, %s6054_s24 }
0x10c8   : > { %v2459_v53 = vpop.permute.xlu0 %2458 }
0x10c9   : > { %v7264_v37 = vadd.f32 %v2459_v53, %v2402_v55 }
0x10ca   : > { %v2467_v40 = vpop.permute.xlu1 %2466 }
0x10cb   : > { %5476 = vtanh.f32 %v7264_v37  ;;  %v7275_v28 = vadd.f32 %v2467_v40, %v2406_v59 }
0x10cc   : > { %v2463_v50 = vpop.permute.xlu0 %2462 }
0x10cd   : > { %v7272_v26 = vadd.f32 %v2463_v50, %v2404_v47 }
0x10ce   : > { %v2461_v7 = vpop.permute.xlu1 %2460 }
0x10cf   : > { %5478 = vtanh.f32 %v7272_v26  ;;  %v7286_v25 = vadd.f32 %v2461_v7, %v2403_v13 }
0x10d0   : > { %v2469_v35 = vpop.permute.xlu0 %2468  ;;  %5480 = vtanh.f32 %v7275_v28 }
0x10d1   : > { %v7283_v22 = vadd.f32 %v2469_v35, %v2407_v51 }
0x10d2   : > { %v2465_v20 = vpop.permute.xlu1 %2464 }
0x10d3   : > { %5482 = vtanh.f32 %v7283_v22  ;;  %v7295_v43 = vadd.f32 %v2465_v20, %v2405_v6 }
0x10d4   : > { %v2471_v18 = vpop.permute.xlu0 %2470  ;;  %5484 = vtanh.f32 %v7286_v25 }
0x10d5   : > { %v5477_v57 = vpop.eup %5476  ;;  %v7292_v49 = vadd.f32 %v2471_v18, %v2408_v31 }
0x10d6   : > { %2506 = vrot.lane.b32.xlu0 %v5477_v57, %s6053_s25  ;;  %v2473_v29 = vpop.permute.xlu1 %2472 }
0x10d7   : > { %5486 = vtanh.f32 %v7292_v49  ;;  %v7301_v54 = vadd.f32 %v2473_v29, %v2409_v17 }
0x10d8   : > { %5488 = vtanh.f32 %v7295_v43 }
0x10d9   : > { %v5479_v30 = vpop.eup %5478  ;;  %5490 = vtanh.f32 %v7301_v54 }
0x10da   : > { %2510 = vrot.lane.b32.xlu0 %v5479_v30, %s6053_s25  ;;  %v5481_v52 = vpop.eup %5480 }
0x10db   : > { %2514 = vrot.lane.b32.xlu1 %v5481_v52, %s6053_s25 }
0x10dd   : > { %v5483_v34 = vpop.eup %5482 }
0x10de   : > { %2516 = vrot.lane.b32.xlu0 %v5483_v34, %s6053_s25  ;;  %v5485_v23 = vpop.eup %5484 }
0x10df   : > { %2508 = vrot.lane.b32.xlu1 %v5485_v23, %s6053_s25 }
0x10e1   : > { %v5487_v55 = vpop.eup %5486 }
0x10e2   : > { %2518 = vrot.lane.b32.xlu0 %v5487_v55, %s6053_s25  ;;  %v5489_v53 = vpop.eup %5488 }
0x10e3   : > { %2512 = vrot.lane.b32.xlu1 %v5489_v53, %s6053_s25  ;;  %v5491_v56 = vpop.eup %5490 }
0x10e7   : > { %2520 = vrot.lane.b32.xlu1 %v5491_v56, %s6053_s25 }
0x1148   : > { %v2507_v58 = vpop.permute.xlu0 %2506 }
0x1149   : > { %v2530_v47 = vmul.f32 %v7230_v62, %v2507_v58 }
0x114b   : > { %v7313_v50 = vsel %vm3633_vm15, %v7178_v2, %v2530_v47  ;;  %v2546_v7 = vrot.slane %v2530_v47, 4 }
0x114c   : > { %v2511_v39 = vpop.permute.xlu0 %2510 }
0x114d   : > { %v2532_v59 = vmul.f32 %v7234_v41, %v2511_v39  ;;  %v2515_v40 = vpop.permute.xlu1 %2514 }
0x114e   : > { %v2534_v57 = vmul.f32 %v7237_v15, %v2515_v40 }
0x114f   : > { %v7319_v5 = vsel %vm3633_vm15, %v7188_v12, %v2532_v59  ;;  %v2549_v13 = vrot.slane %v2532_v59, 2 }
0x1150   : > { %v2517_v51 = vpop.permute.xlu0 %2516  ;;  %v7323_v35 = vsel %vm3633_vm15, %v7174_v33, %v2534_v57 }
0x1151   : > { %v2535_v62 = vmul.f32 %v7241_v38, %v2517_v51  ;;  %v2509_v61 = vpop.permute.xlu1 %2508 }
0x1152   : > { %v2531_v2 = vmul.f32 %v7245_v32, %v2509_v61 }
0x1153   : > { %v7329_v41 = vsel %vm3633_vm15, %v7184_v36, %v2535_v62 }
0x1154   : > { %v2519_v15 = vpop.permute.xlu0 %2518  ;;  %v2547_v8 = vrot.slane %v2531_v2, 3  ;;  %v7333_v12 = vsel %vm3633_vm15, %v7164_v4, %v2531_v2  ;;  %v2554_v4 = vrot.slane %v2535_v62, 7 }
0x1155   : > { %v2536_v33 = vmul.f32 %v7249_v10, %v2519_v15  ;;  %v2513_v31 = vpop.permute.xlu1 %2512 }
0x1156   : > { %v2548_v38 = vsel %vm1196_vm5, %v2547_v8, %v2546_v7  ;;  %v2533_v18 = vmul.f32 %v7253_v14, %v2513_v31 }
0x1157   : > { %v7340_v32 = vsel %vm3633_vm15, %v7201_v1, %v2536_v33  ;;  %v2550_v36 = vsel %vm1199_vm6, %v2549_v13, %v2548_v38  ;;  %v2556_v30 = vrot.slane %v2536_v33, 6 }
0x1158   : > { %v2551_v6 = vrot.slane %v2533_v18, 1  ;;  %v7345_v20 = vsel %vm3633_vm15, %v7168_v60, %v2533_v18 }
0x1159   : > { %v2521_v63 = vpop.permute.xlu1 %2520 }
0x115a   : > { %v2552_v10 = vsel %vm1202_vm7, %v2551_v6, %v2550_v36  ;;  %v2537_v17 = vmul.f32 %v7258_v21, %v2521_v63 }
0x115b   : > { %v2553_v14 = vsel %vm1205_vm8, %v2534_v57, %v2552_v10 }
0x115c   : > { %v2558_v29 = vrot.slane %v2537_v17, 5  ;;  %v7352_v1 = vsel %vm3633_vm15, %v7196_v46, %v2537_v17  ;;  %v2555_v52 = vsel %vm1208_vm9, %v2554_v4, %v2553_v14 }
0x115d   : > { %v2557_v34 = vsel %vm1211_vm10, %v2556_v30, %v2555_v52 }
0x115e   : > { %v2559_v60 = vsel %vm1214_vm11, %v2558_v29, %v2557_v34 }
0x115f   : > { %2560 = vrot.lane.b32.xlu0 %v2559_v60, %s6054_s24 }
0x11d1   : > { %v2561_v23 = vpop.permute.xlu0 %2560 }
0x11d2   : > { %4879 = vmatmul.mubr.msk.f32.vlgmr.msra.gmra.mrb[6].mxu1 %vm734_vm2, %v2561_v23 }
0x11d3   : > { %4987 = vmatpush3.bf16.msra.mxu1 %v6517_v42  ;;  %4900 = vmatprep.mubr.msk.f32.mxu1 %vm6052_vm4, %v6051_v48  ;;  %vm3575_vm4 = vcmask 260096  }
0x11d4   : > { %4988 = vmatprep.subr.bf16.mxu1 %v6049_v44 }
0x11d7   : > { %4990 = vmatpush3.bf16.msra.mxu1 %v6524_v45 }
0x12a5   : > { %v2630_v46 = vpop.f32.mrb[6].mxu1 }
0x12a6   : > { %v2635_v21 = vrot.slane %v2630_v46, 3  ;;  %v4880_v55 = vpop.f32.mrb[7].mxu1  ;;  %v2636_v56 = vrot.slane %v2630_v46, 4  ;;  %v2637_v58 = vrot.slane %v2630_v46, 5  ;;  %v2638_v47 = vrot.slane %v2630_v46, 6 }
0x12a7   : > { %v2639_v59 = vrot.slane %v2630_v46, 7  ;;  %v2640_v40 = vrot.slane %v2630_v46, 1  ;;  %v2641_v57 = vrot.slane %v2630_v46, 2  ;;  %v2655_v62 = vadd.f32 %v2630_v46, %v6605_v16 }
0x12a8   : > { %v2650_v53 = vadd.f32 %v2635_v21, %v6589_v3  ;;  %v2651_v39 = vadd.f32 %v2636_v56, %v6587_v0  ;;  %v2652_v42 = vadd.f32 %v2637_v58, %v6600_v11  ;;  %v2653_v48 = vadd.f32 %v2638_v47, %v6597_v9 }
0x12a9   : > { %v2654_v45 = vadd.f32 %v2639_v59, %v6607_v19  ;;  %v2656_v51 = vadd.f32 %v2640_v40, %v6613_v27  ;;  %v2657_v61 = vadd.f32 %v2641_v57, %v6611_v24  ;;  %v4660_v17 = vmul.f32 -1.442695, %v2655_v62 }
0x12aa   : > { %5492 = vtanh.f32 %v2650_v53  ;;  %v4655_v38 = vmul.f32 -1.442695, %v2650_v53  ;;  %v4656_v18 = vmul.f32 -1.442695, %v2651_v39  ;;  %v4657_v36 = vmul.f32 -1.442695, %v2652_v42 }
0x12ab   : > { %5494 = vtanh.f32 %v2651_v39  ;;  %v4658_v6 = vmul.f32 -1.442695, %v2653_v48  ;;  %v4659_v63 = vmul.f32 -1.442695, %v2654_v45  ;;  %v4661_v30 = vmul.f32 -1.442695, %v2656_v51 }
0x12ac   : > { %5496 = vtanh.f32 %v2652_v42  ;;  %v4662_v14 = vmul.f32 -1.442695, %v2657_v61 }
0x12ad   : > { %5498 = vtanh.f32 %v2653_v48 }
0x12ae   : > { %5500 = vtanh.f32 %v2654_v45 }
0x12af   : > { %5502 = vtanh.f32 %v2656_v51 }
0x12b0   : > { %5504 = vtanh.f32 %v2655_v62 }
0x12b1   : > { %5506 = vtanh.f32 %v2657_v61 }
0x12b2   : > { %5508 = vpow2.f32 %v4655_v38 }
0x12b3   : > { %5510 = vpow2.f32 %v4656_v18 }
0x12b4   : > { %v5493_v44 = vpop.eup %5492  ;;  %5512 = vpow2.f32 %v4657_v36 }
0x12b5   : > { %2754 = vrot.lane.b32.xlu1 %v5493_v44, %s6053_s25  ;;  %v5495_v2 = vpop.eup %5494  ;;  %5514 = vpow2.f32 %v4658_v6 }
0x12b6   : > { %v5497_v13 = vpop.eup %5496  ;;  %2756 = vrot.lane.b32.xlu0 %v5495_v2, %s6053_s25  ;;  %5516 = vpow2.f32 %v4659_v63 }
0x12b7   : > { %v5499_v15 = vpop.eup %5498  ;;  %5518 = vpow2.f32 %v4661_v30 }
0x12b8   : > { %v5501_v7 = vpop.eup %5500 }
0x12b9   : > { %2758 = vrot.lane.b32.xlu1 %v5497_v13, %s6053_s25  ;;  %v5503_v8 = vpop.eup %5502 }
0x12ba   : > { %2760 = vrot.lane.b32.xlu0 %v5499_v15, %s6053_s25  ;;  %v5505_v33 = vpop.eup %5504 }
0x12bb   : > { %v5507_v31 = vpop.eup %5506 }
0x12bc   : > { %v5509_v4 = vpop.eup %5508 }
0x12bd   : > { %2762 = vrot.lane.b32.xlu1 %v5501_v7, %s6053_s25  ;;  %v2682_v10 = vadd.f32 1.0, %v5509_v4  ;;  %v5511_v29 = vpop.eup %5510 }
0x12be   : > { %2766 = vrot.lane.b32.xlu0 %v5503_v8, %s6053_s25  ;;  %v5513_v52 = vpop.eup %5512  ;;  %v2683_v34 = vadd.f32 1.0, %v5511_v29 }
0x12bf   : > { %5520 = vrcp.f32 %v2682_v10  ;;  %v5515_v60 = vpop.eup %5514  ;;  %v2684_v23 = vadd.f32 1.0, %v5513_v52 }
0x12c0   : > { %5522 = vpow2.f32 %v4660_v17  ;;  %v5517_v46 = vpop.eup %5516  ;;  %v2685_v55 = vadd.f32 1.0, %v5515_v60  ;;  %v2722_v17 = vrot.slane %v7264_v37, 7  ;;  %v2724_v60 = vrot.slane %v7272_v26, 7 }
0x12c1   : > { %2764 = vrot.lane.b32.xlu1 %v5505_v33, %s6053_s25  ;;  %5524 = vpow2.f32 %v4662_v14  ;;  %v5519_v21 = vpop.eup %5518  ;;  %v2686_v58 = vadd.f32 1.0, %v5517_v46 }
0x12c2   : > { %2768 = vrot.lane.b32.xlu0 %v5507_v31, %s6053_s25  ;;  %5526 = vrcp.f32 %v2683_v34  ;;  %v2688_v59 = vadd.f32 1.0, %v5519_v21  ;;  %v2723_v34 = vrot.slane %v7286_v25, 7 }
0x12c3   : > { %5528 = vrcp.f32 %v2684_v23 }
0x12c4   : > { %5530 = vrcp.f32 %v2685_v55  ;;  %v2725_v55 = vrot.slane %v7295_v43, 7 }
0x12c5   : > { %5532 = vrcp.f32 %v2686_v58  ;;  %v2726_v58 = vrot.slane %v7275_v28, 7  ;;  %v2727_v28 = vrot.slane %v7283_v22, 7 }
0x12c6   : > { %5534 = vrcp.f32 %v2688_v59 }
0x12c9   : > { %v7380_v53 = vpop.eup %5520 }
0x12ca   : > { %v5523_v47 = vpop.eup %5522  ;;  %v2738_v14 = vmul.f32 %v7380_v53, %v2722_v17 }
0x12cb   : > { %v5525_v42 = vpop.eup %5524  ;;  %v2687_v40 = vadd.f32 1.0, %v5523_v47 }
0x12cc   : > { %v2689_v48 = vadd.f32 1.0, %v5525_v42  ;;  %v7384_v44 = vpop.eup %5526  ;;  %v2728_v42 = vrot.slane %v7292_v49, 7  ;;  %v2729_v49 = vrot.slane %v7301_v54, 7 }
0x12cd   : > { %5536 = vrcp.f32 %v2687_v40  ;;  %v7386_v57 = vpop.eup %5528  ;;  %v2739_v23 = vmul.f32 %v7384_v44, %v2723_v34 }
0x12ce   : > { %5538 = vrcp.f32 %v2689_v48  ;;  %v7391_v2 = vpop.eup %5530  ;;  %v2740_v21 = vmul.f32 %v7386_v57, %v2724_v60 }
0x12cf   : > { %v7394_v15 = vpop.eup %5532  ;;  %v2741_v25 = vmul.f32 %v7391_v2, %v2725_v55 }
0x12d0   : > { %v7399_v31 = vpop.eup %5534  ;;  %v2742_v59 = vmul.f32 %v7394_v15, %v2726_v58 }
0x12d7   : > { %v7402_v18 = vpop.eup %5536 }
0x12d8   : > { %v7407_v63 = vpop.eup %5538 }
0x12d9   : > { %v2745_v22 = vmul.f32 %v7407_v63, %v2729_v49 }
0x1327   : > { %v2755_v56 = vpop.permute.xlu1 %2754 }
0x1328   : > { %v2778_v39 = vmul.f32 %v7380_v53, %v2755_v56  ;;  %v2757_v45 = vpop.permute.xlu0 %2756 }
0x1329   : > { %v2779_v51 = vmul.f32 %v7384_v44, %v2757_v45  ;;  %v2744_v45 = vmul.f32 %v7399_v31, %v2728_v42 }
0x132a   : > { %2794 = vrot.lane.b32.xlu1 %v2778_v39, %s6054_s24 }
0x132b   : > { %v2759_v62 = vpop.permute.xlu1 %2758  ;;  %2796 = vrot.lane.b32.xlu0 %v2779_v51, %s6054_s24 }
0x132c   : > { %v2780_v61 = vmul.f32 %v7386_v57, %v2759_v62  ;;  %v2761_v13 = vpop.permute.xlu0 %2760  ;;  %v2743_v62 = vmul.f32 %v7402_v18, %v2727_v28 }
0x132d   : > { %v2781_v7 = vmul.f32 %v7391_v2, %v2761_v13 }
0x132e   : > { %2798 = vrot.lane.b32.xlu1 %v2780_v61, %s6054_s24 }
0x132f   : > { %v2763_v8 = vpop.permute.xlu1 %2762  ;;  %2800 = vrot.lane.b32.xlu0 %v2781_v7, %s6054_s24 }
0x1330   : > { %v2782_v33 = vmul.f32 %v7394_v15, %v2763_v8  ;;  %v2767_v38 = vpop.permute.xlu0 %2766 }
0x1331   : > { %v2784_v36 = vmul.f32 %v7399_v31, %v2767_v38 }
0x1332   : > { %2802 = vrot.lane.b32.xlu1 %v2782_v33, %s6054_s24 }
0x1333   : > { %v2765_v6 = vpop.permute.xlu1 %2764  ;;  %2806 = vrot.lane.b32.xlu0 %v2784_v36, %s6054_s24 }
0x1334   : > { %v2783_v4 = vmul.f32 %v7402_v18, %v2765_v6  ;;  %v2769_v30 = vpop.permute.xlu0 %2768 }
0x1335   : > { %v2785_v10 = vmul.f32 %v7407_v63, %v2769_v30 }
0x1336   : > { %2804 = vrot.lane.b32.xlu1 %v2783_v4, %s6054_s24 }
0x1337   : > { %2808 = vrot.lane.b32.xlu0 %v2785_v10, %s6054_s24 }
0x139c   : > { %v2795_v29 = vpop.permute.xlu1 %2794 }
0x139d   : > { %v7414_v52 = vadd.f32 %v2795_v29, %v2738_v14  ;;  %v2797_v46 = vpop.permute.xlu0 %2796 }
0x139e   : > { %v7422_v56 = vadd.f32 %v2797_v46, %v2739_v23 }
0x139f   : > { %5540 = vtanh.f32 %v7414_v52 }
0x13a0   : > { %v2799_v37 = vpop.permute.xlu1 %2798  ;;  %5542 = vtanh.f32 %v7422_v56 }
0x13a1   : > { %v7425_v47 = vadd.f32 %v2799_v37, %v2740_v21  ;;  %v2801_v26 = vpop.permute.xlu0 %2800 }
0x13a2   : > { %v7432_v43 = vadd.f32 %v2801_v26, %v2741_v25 }
0x13a3   : > { %5544 = vtanh.f32 %v7425_v47 }
0x13a4   : > { %v2803_v40 = vpop.permute.xlu1 %2802  ;;  %5546 = vtanh.f32 %v7432_v43 }
0x13a5   : > { %v7436_v48 = vadd.f32 %v2803_v40, %v2742_v59  ;;  %v2807_v51 = vpop.permute.xlu0 %2806 }
0x13a6   : > { %v7443_v61 = vadd.f32 %v2807_v51, %v2744_v45 }
0x13a7   : > { %5548 = vtanh.f32 %v7436_v48 }
0x13a8   : > { %v2805_v13 = vpop.permute.xlu1 %2804  ;;  %5550 = vtanh.f32 %v7443_v61 }
0x13a9   : > { %v5541_v39 = vpop.eup %5540  ;;  %v7445_v7 = vadd.f32 %v2805_v13, %v2743_v62  ;;  %v2809_v8 = vpop.permute.xlu0 %2808 }
0x13aa   : > { %2842 = vrot.lane.b32.xlu1 %v5541_v39, %s6053_s25  ;;  %v5543_v33 = vpop.eup %5542  ;;  %v7450_v38 = vadd.f32 %v2809_v8, %v2745_v22 }
0x13ab   : > { %5552 = vtanh.f32 %v7445_v7  ;;  %2844 = vrot.lane.b32.xlu0 %v5543_v33, %s6053_s25 }
0x13ac   : > { %5554 = vtanh.f32 %v7450_v38 }
0x13ad   : > { %v5545_v36 = vpop.eup %5544 }
0x13ae   : > { %2846 = vrot.lane.b32.xlu1 %v5545_v36, %s6053_s25  ;;  %v5547_v54 = vpop.eup %5546 }
0x13af   : > { %2848 = vrot.lane.b32.xlu0 %v5547_v54, %s6053_s25 }
0x13b1   : > { %v5549_v6 = vpop.eup %5548 }
0x13b2   : > { %2850 = vrot.lane.b32.xlu1 %v5549_v6, %s6053_s25  ;;  %v5551_v4 = vpop.eup %5550 }
0x13b3   : > { %2854 = vrot.lane.b32.xlu0 %v5551_v4, %s6053_s25 }
0x13b5   : > { %v5553_v30 = vpop.eup %5552 }
0x13b6   : > { %2852 = vrot.lane.b32.xlu1 %v5553_v30, %s6053_s25  ;;  %v5555_v10 = vpop.eup %5554 }
0x13b7   : > { %2856 = vrot.lane.b32.xlu0 %v5555_v10, %s6053_s25 }
0x141c   : > { %v2843_v17 = vpop.permute.xlu1 %2842 }
0x141d   : > { %v2866_v14 = vmul.f32 %v7380_v53, %v2843_v17  ;;  %v2845_v34 = vpop.permute.xlu0 %2844 }
0x141e   : > { %v2867_v60 = vmul.f32 %v7384_v44, %v2845_v34 }
0x141f   : > { %v7463_v29 = vsel %vm3642_vm0, %v7313_v50, %v2866_v14  ;;  %v2882_v23 = vrot.slane %v2866_v14, 5 }
0x1420   : > { %v2847_v46 = vpop.permute.xlu1 %2846  ;;  %v2883_v55 = vrot.slane %v2867_v60, 4  ;;  %v7469_v37 = vsel %vm3642_vm0, %v7333_v12, %v2867_v60 }
0x1421   : > { %v2868_v21 = vmul.f32 %v7386_v57, %v2847_v46  ;;  %v2849_v58 = vpop.permute.xlu0 %2848 }
0x1422   : > { %v2884_v50 = vsel %vm1196_vm5, %v2883_v55, %v2882_v23  ;;  %v2869_v39 = vmul.f32 %v7391_v2, %v2849_v58 }
0x1423   : > { %v2885_v25 = vrot.slane %v2868_v21, 3  ;;  %v7473_v53 = vsel %vm3642_vm0, %v7319_v5, %v2868_v21 }
0x1424   : > { %v2851_v44 = vpop.permute.xlu1 %2850  ;;  %v2887_v59 = vrot.slane %v2869_v39, 2  ;;  %v7481_v12 = vsel %vm3642_vm0, %v7345_v20, %v2869_v39 }
0x1425   : > { %v2886_v26 = vsel %vm1199_vm6, %v2885_v25, %v2884_v50  ;;  %v2870_v57 = vmul.f32 %v7394_v15, %v2851_v44  ;;  %v2855_v42 = vpop.permute.xlu0 %2854 }
0x1426   : > { %v2872_v28 = vmul.f32 %v7399_v31, %v2855_v42  ;;  %v2888_v2 = vsel %vm1202_vm7, %v2887_v59, %v2886_v26 }
0x1427   : > { %v2889_v40 = vrot.slane %v2870_v57, 1  ;;  %v7485_v5 = vsel %vm3642_vm0, %v7323_v35, %v2870_v57 }
0x1428   : > { %v2853_v45 = vpop.permute.xlu1 %2852  ;;  %v7493_v62 = vsel %vm3642_vm0, %v7340_v32, %v2872_v28  ;;  %v2892_v20 = vrot.slane %v2872_v28, 7 }
0x1429   : > { %v2890_v51 = vsel %vm1205_vm8, %v2889_v40, %v2888_v2  ;;  %v2871_v15 = vmul.f32 %v7402_v18, %v2853_v45  ;;  %v2857_v49 = vpop.permute.xlu0 %2856 }
0x142a   : > { %v2873_v31 = vmul.f32 %v7407_v63, %v2857_v49 }
0x142b   : > { %v2891_v13 = vsel %vm1208_vm9, %v2871_v15, %v2890_v51  ;;  %v7498_v35 = vsel %vm3642_vm0, %v7329_v41, %v2871_v15 }
0x142c   : > { %v2893_v22 = vsel %vm1211_vm10, %v2892_v20, %v2891_v13  ;;  %v2894_v8 = vrot.slane %v2873_v31, 6  ;;  %v7504_v18 = vsel %vm3642_vm0, %v7352_v1, %v2873_v31 }
0x142e   : > { %v2895_v32 = vsel %vm1214_vm11, %v2894_v8, %v2893_v22 }
0x142f   : > { %2896 = vrot.lane.b32.xlu1 %v2895_v32, %s6054_s24 }
0x14a1   : > { %v2897_v33 = vpop.permute.xlu1 %2896 }
0x14a2   : > { %4890 = vmatmul.mubr.msk.f32.vlgmr.msra.gmra.mrb[12].mxu0 %vm734_vm2, %v2897_v33 }
0x1575   : > { %v2966_v36 = vpop.f32.mrb[12].mxu0 }
0x1576   : > { %v2971_v54 = vrot.slane %v2966_v36, 2  ;;  %v4891_v41 = vpop.f32.mrb[13].mxu0  ;;  %v2972_v63 = vrot.slane %v2966_v36, 3  ;;  %v2973_v4 = vrot.slane %v2966_v36, 4  ;;  %v2974_v30 = vrot.slane %v2966_v36, 5 }
0x1577   : > { %v2975_v1 = vrot.slane %v2966_v36, 6  ;;  %v2976_v14 = vrot.slane %v2966_v36, 7  ;;  %v2977_v23 = vrot.slane %v2966_v36, 1  ;;  %v2992_v58 = vadd.f32 %v2966_v36, %v6613_v27 }
0x1578   : > { %v2986_v6 = vadd.f32 %v2971_v54, %v6589_v3  ;;  %v2987_v10 = vadd.f32 %v2972_v63, %v6587_v0  ;;  %v2988_v17 = vadd.f32 %v2973_v4, %v6600_v11  ;;  %v2989_v34 = vadd.f32 %v2974_v30, %v6597_v9 }
0x1579   : > { %v2990_v46 = vadd.f32 %v2975_v1, %v6607_v19  ;;  %v2991_v21 = vadd.f32 %v2976_v14, %v6605_v16  ;;  %v2993_v55 = vadd.f32 %v2977_v23, %v6611_v24  ;;  %v4670_v13 = vmul.f32 -1.442695, %v2992_v58 }
0x157a   : > { %5556 = vtanh.f32 %v2986_v6  ;;  %v4664_v42 = vmul.f32 -1.442695, %v2986_v6  ;;  %v4665_v40 = vmul.f32 -1.442695, %v2987_v10  ;;  %v4666_v28 = vmul.f32 -1.442695, %v2988_v17 }
0x157b   : > { %5558 = vtanh.f32 %v2987_v10  ;;  %v4667_v2 = vmul.f32 -1.442695, %v2989_v34  ;;  %v4668_v51 = vmul.f32 -1.442695, %v2990_v46  ;;  %v4669_v15 = vmul.f32 -1.442695, %v2991_v21 }
0x157c   : > { %5560 = vtanh.f32 %v2988_v17  ;;  %v4671_v49 = vmul.f32 -1.442695, %v2993_v55 }
0x157d   : > { %5562 = vtanh.f32 %v2989_v34 }
0x157e   : > { %5564 = vtanh.f32 %v2990_v46 }
0x157f   : > { %5566 = vtanh.f32 %v2991_v21 }
0x1580   : > { %5568 = vtanh.f32 %v2993_v55 }
0x1581   : > { %5570 = vtanh.f32 %v2992_v58 }
0x1582   : > { %5572 = vpow2.f32 %v4664_v42 }
0x1583   : > { %5574 = vpow2.f32 %v4665_v40 }
0x1584   : > { %v5557_v60 = vpop.eup %5556  ;;  %5576 = vpow2.f32 %v4666_v28 }
0x1585   : > { %3090 = vrot.lane.b32.xlu0 %v5557_v60, %s6053_s25  ;;  %v5559_v25 = vpop.eup %5558  ;;  %5578 = vpow2.f32 %v4667_v2 }
0x1586   : > { %v5561_v50 = vpop.eup %5560  ;;  %3092 = vrot.lane.b32.xlu1 %v5559_v25, %s6053_s25  ;;  %5580 = vpow2.f32 %v4668_v51 }
0x1587   : > { %v5563_v39 = vpop.eup %5562  ;;  %5582 = vpow2.f32 %v4669_v15 }
0x1588   : > { %v5565_v44 = vpop.eup %5564 }
0x1589   : > { %3094 = vrot.lane.b32.xlu0 %v5561_v50, %s6053_s25  ;;  %v5567_v26 = vpop.eup %5566 }
0x158a   : > { %3096 = vrot.lane.b32.xlu1 %v5563_v39, %s6053_s25  ;;  %v5569_v57 = vpop.eup %5568 }
0x158b   : > { %v5571_v59 = vpop.eup %5570 }
0x158c   : > { %v5573_v45 = vpop.eup %5572 }
0x158d   : > { %3098 = vrot.lane.b32.xlu0 %v5565_v44, %s6053_s25  ;;  %v3018_v20 = vadd.f32 1.0, %v5573_v45  ;;  %v5575_v31 = vpop.eup %5574 }
0x158e   : > { %3100 = vrot.lane.b32.xlu1 %v5567_v26, %s6053_s25  ;;  %v5577_v22 = vpop.eup %5576  ;;  %v3019_v8 = vadd.f32 1.0, %v5575_v31 }
0x158f   : > { %5584 = vrcp.f32 %v3018_v20  ;;  %v5579_v32 = vpop.eup %5578  ;;  %v3020_v33 = vadd.f32 1.0, %v5577_v22 }
0x1590   : > { %5586 = vpow2.f32 %v4671_v49  ;;  %v5581_v36 = vpop.eup %5580  ;;  %v3021_v41 = vadd.f32 1.0, %v5579_v32  ;;  %v3058_v49 = vrot.slane %v7414_v52, 7  ;;  %v3060_v32 = vrot.slane %v7425_v47, 7 }
0x1591   : > { %3104 = vrot.lane.b32.xlu0 %v5569_v57, %s6053_s25  ;;  %5588 = vpow2.f32 %v4670_v13  ;;  %v5583_v54 = vpop.eup %5582  ;;  %v3022_v4 = vadd.f32 1.0, %v5581_v36 }
0x1592   : > { %3102 = vrot.lane.b32.xlu1 %v5571_v59, %s6053_s25  ;;  %5590 = vrcp.f32 %v3019_v8  ;;  %v3023_v1 = vadd.f32 1.0, %v5583_v54  ;;  %v3059_v8 = vrot.slane %v7422_v56, 7 }
0x1593   : > { %5592 = vrcp.f32 %v3020_v33 }
0x1594   : > { %5594 = vrcp.f32 %v3021_v41  ;;  %v3061_v41 = vrot.slane %v7432_v43, 7 }
0x1595   : > { %5596 = vrcp.f32 %v3022_v4  ;;  %v3062_v4 = vrot.slane %v7436_v48, 7  ;;  %v3065_v48 = vrot.slane %v7450_v38, 7 }
0x1596   : > { %5598 = vrcp.f32 %v3023_v1 }
0x1599   : > { %v7525_v6 = vpop.eup %5584 }
0x159a   : > { %v5587_v30 = vpop.eup %5586  ;;  %v3074_v13 = vmul.f32 %v7525_v6, %v3058_v49 }
0x159b   : > { %v5589_v17 = vpop.eup %5588  ;;  %v3025_v14 = vadd.f32 1.0, %v5587_v30 }
0x159c   : > { %v3024_v34 = vadd.f32 1.0, %v5589_v17  ;;  %v7529_v60 = vpop.eup %5590  ;;  %v3063_v17 = vrot.slane %v7445_v7, 7  ;;  %v3064_v7 = vrot.slane %v7443_v61, 7 }
0x159d   : > { %5600 = vrcp.f32 %v3025_v14  ;;  %v7531_v46 = vpop.eup %5592  ;;  %v3075_v33 = vmul.f32 %v7529_v60, %v3059_v8 }
0x159e   : > { %5602 = vrcp.f32 %v3024_v34  ;;  %v7536_v25 = vpop.eup %5594  ;;  %v3076_v54 = vmul.f32 %v7531_v46, %v3060_v32 }
0x159f   : > { %v7539_v39 = vpop.eup %5596  ;;  %v3077_v56 = vmul.f32 %v7536_v25, %v3061_v41 }
0x15a0   : > { %v7544_v59 = vpop.eup %5598  ;;  %v3078_v1 = vmul.f32 %v7539_v39, %v3062_v4 }
0x15a7   : > { %v7547_v40 = vpop.eup %5600 }
0x15a8   : > { %v7552_v51 = vpop.eup %5602 }
0x15a9   : > { %v3080_v38 = vmul.f32 %v7552_v51, %v3064_v7 }
0x15f7   : > { %v3091_v63 = vpop.permute.xlu0 %3090 }
0x15f8   : > { %v3114_v10 = vmul.f32 %v7525_v6, %v3091_v63  ;;  %v3093_v23 = vpop.permute.xlu1 %3092 }
0x15f9   : > { %v3115_v21 = vmul.f32 %v7529_v60, %v3093_v23  ;;  %v3079_v23 = vmul.f32 %v7544_v59, %v3063_v17 }
0x15fa   : > { %3130 = vrot.lane.b32.xlu0 %v3114_v10, %s6054_s24 }
0x15fb   : > { %v3095_v55 = vpop.permute.xlu0 %3094  ;;  %3132 = vrot.lane.b32.xlu1 %v3115_v21, %s6054_s24 }
0x15fc   : > { %v3116_v58 = vmul.f32 %v7531_v46, %v3095_v55  ;;  %v3097_v50 = vpop.permute.xlu1 %3096  ;;  %v3081_v55 = vmul.f32 %v7547_v40, %v3065_v48 }
0x15fd   : > { %v3117_v44 = vmul.f32 %v7536_v25, %v3097_v50 }
0x15fe   : > { %3134 = vrot.lane.b32.xlu0 %v3116_v58, %s6054_s24 }
0x15ff   : > { %v3099_v26 = vpop.permute.xlu0 %3098  ;;  %3136 = vrot.lane.b32.xlu1 %v3117_v44, %s6054_s24 }
0x1600   : > { %v3118_v57 = vmul.f32 %v7539_v39, %v3099_v26  ;;  %v3101_v42 = vpop.permute.xlu1 %3100 }
0x1601   : > { %v3119_v28 = vmul.f32 %v7544_v59, %v3101_v42 }
0x1602   : > { %3138 = vrot.lane.b32.xlu0 %v3118_v57, %s6054_s24 }
0x1603   : > { %v3105_v2 = vpop.permute.xlu0 %3104  ;;  %3140 = vrot.lane.b32.xlu1 %v3119_v28, %s6054_s24 }
0x1604   : > { %v3121_v45 = vmul.f32 %v7547_v40, %v3105_v2  ;;  %v3103_v15 = vpop.permute.xlu1 %3102 }
0x1605   : > { %v3120_v20 = vmul.f32 %v7552_v51, %v3103_v15 }
0x1606   : > { %3144 = vrot.lane.b32.xlu0 %v3121_v45, %s6054_s24 }
0x1607   : > { %3142 = vrot.lane.b32.xlu1 %v3120_v20, %s6054_s24 }
0x166c   : > { %v3131_v31 = vpop.permute.xlu0 %3130 }
0x166d   : > { %v7559_v22 = vadd.f32 %v3131_v31, %v3074_v13  ;;  %v3133_v36 = vpop.permute.xlu1 %3132 }
0x166e   : > { %v7567_v63 = vadd.f32 %v3133_v36, %v3075_v33 }
0x166f   : > { %5604 = vtanh.f32 %v7559_v22 }
0x1670   : > { %v3135_v52 = vpop.permute.xlu0 %3134  ;;  %5606 = vtanh.f32 %v7567_v63 }
0x1671   : > { %v7570_v30 = vadd.f32 %v3135_v52, %v3076_v54  ;;  %v3137_v47 = vpop.permute.xlu1 %3136 }
0x1672   : > { %v7577_v43 = vadd.f32 %v3137_v47, %v3077_v56 }
0x1673   : > { %5608 = vtanh.f32 %v7570_v30 }
0x1674   : > { %v3139_v14 = vpop.permute.xlu0 %3138  ;;  %5610 = vtanh.f32 %v7577_v43 }
0x1675   : > { %v7581_v34 = vadd.f32 %v3139_v14, %v3078_v1  ;;  %v3141_v21 = vpop.permute.xlu1 %3140 }
0x1676   : > { %v7588_v58 = vadd.f32 %v3141_v21, %v3079_v23 }
0x1677   : > { %5612 = vtanh.f32 %v7581_v34 }
0x1678   : > { %v3145_v50 = vpop.permute.xlu0 %3144  ;;  %5614 = vtanh.f32 %v7588_v58 }
0x1679   : > { %v5605_v10 = vpop.eup %5604  ;;  %v7590_v44 = vadd.f32 %v3145_v50, %v3081_v55  ;;  %v3143_v26 = vpop.permute.xlu1 %3142 }
0x167a   : > { %3178 = vrot.lane.b32.xlu0 %v5605_v10, %s6053_s25  ;;  %v5607_v57 = vpop.eup %5606  ;;  %v7595_v42 = vadd.f32 %v3143_v26, %v3080_v38 }
0x167b   : > { %5616 = vtanh.f32 %v7590_v44  ;;  %3180 = vrot.lane.b32.xlu1 %v5607_v57, %s6053_s25 }
0x167c   : > { %5618 = vtanh.f32 %v7595_v42 }
0x167d   : > { %v5609_v28 = vpop.eup %5608 }
0x167e   : > { %3182 = vrot.lane.b32.xlu0 %v5609_v28, %s6053_s25  ;;  %v5611_v61 = vpop.eup %5610 }
0x167f   : > { %3184 = vrot.lane.b32.xlu1 %v5611_v61, %s6053_s25 }
0x1681   : > { %v5613_v2 = vpop.eup %5612 }
0x1682   : > { %3186 = vrot.lane.b32.xlu0 %v5613_v2, %s6053_s25  ;;  %v5615_v45 = vpop.eup %5614 }
0x1683   : > { %3188 = vrot.lane.b32.xlu1 %v5615_v45, %s6053_s25 }
0x1685   : > { %v5617_v15 = vpop.eup %5616 }
0x1686   : > { %3192 = vrot.lane.b32.xlu0 %v5617_v15, %s6053_s25  ;;  %v5619_v20 = vpop.eup %5618 }
0x1687   : > { %3190 = vrot.lane.b32.xlu1 %v5619_v20, %s6053_s25 }
0x16ec   : > { %v3179_v49 = vpop.permute.xlu0 %3178 }
0x16ed   : > { %v3202_v13 = vmul.f32 %v7525_v6, %v3179_v49  ;;  %v3181_v8 = vpop.permute.xlu1 %3180 }
0x16ee   : > { %v3203_v32 = vmul.f32 %v7529_v60, %v3181_v8 }
0x16ef   : > { %v7608_v31 = vsel %vm3651_vm1, %v7463_v29, %v3202_v13  ;;  %v3218_v33 = vrot.slane %v3202_v13, 6 }
0x16f0   : > { %v3183_v36 = vpop.permute.xlu0 %3182  ;;  %v3219_v41 = vrot.slane %v3203_v32, 5  ;;  %v7614_v52 = vsel %vm3651_vm1, %v7469_v37, %v3203_v32 }
0x16f1   : > { %v3204_v54 = vmul.f32 %v7531_v46, %v3183_v36  ;;  %v3185_v4 = vpop.permute.xlu1 %3184 }
0x16f2   : > { %v3220_v29 = vsel %vm1196_vm5, %v3219_v41, %v3218_v33  ;;  %v3205_v10 = vmul.f32 %v7536_v25, %v3185_v4 }
0x16f3   : > { %v3221_v56 = vrot.slane %v3204_v54, 4  ;;  %v7618_v6 = vsel %vm3651_vm1, %v7473_v53, %v3204_v54 }
0x16f4   : > { %v3187_v60 = vpop.permute.xlu0 %3186  ;;  %v3223_v1 = vrot.slane %v3205_v10, 3  ;;  %v7626_v37 = vsel %vm3651_vm1, %v7481_v12, %v3205_v10 }
0x16f5   : > { %v3222_v47 = vsel %vm1199_vm6, %v3221_v56, %v3220_v29  ;;  %v3206_v46 = vmul.f32 %v7539_v39, %v3187_v60  ;;  %v3189_v17 = vpop.permute.xlu1 %3188 }
0x16f6   : > { %v3207_v48 = vmul.f32 %v7544_v59, %v3189_v17  ;;  %v3224_v25 = vsel %vm1202_vm7, %v3223_v1, %v3222_v47 }
0x16f7   : > { %v3225_v14 = vrot.slane %v3206_v46, 2  ;;  %v7630_v53 = vsel %vm3651_vm1, %v7485_v5, %v3206_v46 }
0x16f8   : > { %v3193_v23 = vpop.permute.xlu0 %3192  ;;  %v3227_v55 = vrot.slane %v3207_v48, 1  ;;  %v7638_v12 = vsel %vm3651_vm1, %v7498_v35, %v3207_v48 }
0x16f9   : > { %v3226_v21 = vsel %vm1205_vm8, %v3225_v14, %v3224_v25  ;;  %v3209_v39 = vmul.f32 %v7547_v40, %v3193_v23  ;;  %v3191_v7 = vpop.permute.xlu1 %3190 }
0x16fa   : > { %v3208_v59 = vmul.f32 %v7552_v51, %v3191_v7  ;;  %v3228_v38 = vsel %vm1208_vm9, %v3227_v55, %v3226_v21 }
0x16fb   : > { %v3230_v50 = vrot.slane %v3209_v39, 7  ;;  %v7642_v5 = vsel %vm3651_vm1, %v7504_v18, %v3209_v39 }
0x16fc   : > { %v3229_v26 = vsel %vm1211_vm10, %v3208_v59, %v3228_v38  ;;  %v7649_v40 = vsel %vm3651_vm1, %v7493_v62, %v3208_v59 }
0x16fd   : > { %v3231_v57 = vsel %vm1214_vm11, %v3230_v50, %v3229_v26 }
0x16fe   : > { %3232 = vrot.lane.b32.xlu0 %v3231_v57, %s6054_s24 }
0x1770   : > { %v3233_v35 = vpop.permute.xlu0 %3232 }
0x1771   : > { %4901 = vmatmul.mubr.msk.f32.vlgmr.msra.gmra.mrb[8].mxu1 %vm734_vm2, %v3233_v35 }
0x1844   : > { %v3302_v28 = vpop.f32.mrb[8].mxu1 }
0x1845   : > { %v3307_v18 = vrot.slane %v3302_v28, 1  ;;  %v4902_v61 = vpop.f32.mrb[9].mxu1  ;;  %v3308_v2 = vrot.slane %v3302_v28, 2  ;;  %v3309_v45 = vrot.slane %v3302_v28, 3  ;;  %v3310_v15 = vrot.slane %v3302_v28, 4 }
0x1846   : > { %v3311_v62 = vrot.slane %v3302_v28, 5  ;;  %v3312_v13 = vrot.slane %v3302_v28, 6  ;;  %v3313_v33 = vrot.slane %v3302_v28, 7 }
0x1847   : > { %v3322_v51 = vadd.f32 %v3307_v18, %v6589_v3  ;;  %v3323_v20 = vadd.f32 %v3308_v2, %v6587_v0  ;;  %v3324_v49 = vadd.f32 %v3309_v45, %v6600_v11  ;;  %v3325_v8 = vadd.f32 %v3310_v15, %v6597_v9 }
0x1848   : > { %v3326_v36 = vadd.f32 %v3311_v62, %v6607_v19  ;;  %v3327_v3 = vadd.f32 %v3312_v13, %v6605_v16  ;;  %v3328_v54 = vadd.f32 %v3313_v33, %v6613_v27  ;;  %v3329_v0 = vadd.f32 %v3302_v28, %v6611_v24 }
0x1849   : > { %5620 = vtanh.f32 %v3322_v51  ;;  %v4673_v4 = vmul.f32 -1.442695, %v3322_v51  ;;  %v4674_v56 = vmul.f32 -1.442695, %v3323_v20  ;;  %v4675_v29 = vmul.f32 -1.442695, %v3324_v49 }
0x184a   : > { %5622 = vtanh.f32 %v3323_v20  ;;  %v4676_v10 = vmul.f32 -1.442695, %v3325_v8  ;;  %v4677_v47 = vmul.f32 -1.442695, %v3326_v36  ;;  %v4678_v46 = vmul.f32 -1.442695, %v3327_v3 }
0x184b   : > { %5624 = vtanh.f32 %v3324_v49  ;;  %v4679_v17 = vmul.f32 -1.442695, %v3328_v54  ;;  %v4680_v14 = vmul.f32 -1.442695, %v3329_v0 }
0x184c   : > { %5626 = vtanh.f32 %v3325_v8 }
0x184d   : > { %5628 = vtanh.f32 %v3326_v36 }
0x184e   : > { %5630 = vtanh.f32 %v3327_v3 }
0x184f   : > { %5632 = vtanh.f32 %v3328_v54 }
0x1850   : > { %5634 = vtanh.f32 %v3329_v0 }
0x1851   : > { %5636 = vpow2.f32 %v4673_v4  ;;  %v3394_v4 = vrot.slane %v7559_v22, 7 }
0x1852   : > { %5638 = vpow2.f32 %v4674_v56 }
0x1853   : > { %v5621_v32 = vpop.eup %5620  ;;  %5640 = vpow2.f32 %v4675_v29 }
0x1854   : > { %3426 = vrot.lane.b32.xlu1 %v5621_v32, %s6053_s25  ;;  %v5623_v11 = vpop.eup %5622  ;;  %5642 = vpow2.f32 %v4676_v10 }
0x1855   : > { %v5625_v9 = vpop.eup %5624  ;;  %3428 = vrot.lane.b32.xlu0 %v5623_v11, %s6053_s25  ;;  %5644 = vpow2.f32 %v4677_v47  ;;  %v3396_v47 = vrot.slane %v7570_v30, 7 }
0x1856   : > { %v5627_v19 = vpop.eup %5626  ;;  %5646 = vpow2.f32 %v4678_v46 }
0x1857   : > { %v5629_v41 = vpop.eup %5628 }
0x1858   : > { %3430 = vrot.lane.b32.xlu1 %v5625_v9, %s6053_s25  ;;  %v5631_v16 = vpop.eup %5630 }
0x1859   : > { %3432 = vrot.lane.b32.xlu0 %v5627_v19, %s6053_s25  ;;  %v5633_v27 = vpop.eup %5632 }
0x185a   : > { %v5635_v24 = vpop.eup %5634 }
0x185b   : > { %v5637_v60 = vpop.eup %5636 }
0x185c   : > { %3434 = vrot.lane.b32.xlu1 %v5629_v41, %s6053_s25  ;;  %v3354_v1 = vadd.f32 1.0, %v5637_v60  ;;  %v5639_v48 = vpop.eup %5638  ;;  %v3395_v60 = vrot.slane %v7567_v63, 7 }
0x185d   : > { %3436 = vrot.lane.b32.xlu0 %v5631_v16, %s6053_s25  ;;  %v5641_v25 = vpop.eup %5640  ;;  %v3355_v23 = vadd.f32 1.0, %v5639_v48 }
0x185e   : > { %5648 = vrcp.f32 %v3354_v1  ;;  %v5643_v21 = vpop.eup %5642  ;;  %v3356_v39 = vadd.f32 1.0, %v5641_v25  ;;  %v3398_v25 = vrot.slane %v7581_v34, 7 }
0x185f   : > { %5650 = vpow2.f32 %v4679_v17  ;;  %v5645_v55 = vpop.eup %5644  ;;  %v3357_v50 = vadd.f32 1.0, %v5643_v21 }
0x1860   : > { %3438 = vrot.lane.b32.xlu1 %v5633_v27, %s6053_s25  ;;  %5652 = vpow2.f32 %v4680_v14  ;;  %v5647_v7 = vpop.eup %5646  ;;  %v3358_v26 = vadd.f32 1.0, %v5645_v55  ;;  %v3397_v14 = vrot.slane %v7577_v43, 7  ;;  %v3400_v43 = vrot.slane %v7595_v42, 7 }
0x1861   : > { %3440 = vrot.lane.b32.xlu0 %v5635_v24, %s6053_s25  ;;  %5654 = vrcp.f32 %v3355_v23  ;;  %v3359_v28 = vadd.f32 1.0, %v5647_v7 }
0x1862   : > { %5656 = vrcp.f32 %v3356_v39 }
0x1863   : > { %5658 = vrcp.f32 %v3357_v50  ;;  %v3399_v50 = vrot.slane %v7588_v58, 7  ;;  %v3401_v58 = vrot.slane %v7590_v44, 7 }
0x1864   : > { %5660 = vrcp.f32 %v3358_v26 }
0x1865   : > { %5662 = vrcp.f32 %v3359_v28 }
0x1868   : > { %v7670_v59 = vpop.eup %5648 }
0x1869   : > { %v5651_v57 = vpop.eup %5650  ;;  %v3410_v56 = vmul.f32 %v7670_v59, %v3394_v4 }
0x186a   : > { %v5653_v18 = vpop.eup %5652  ;;  %v3360_v61 = vadd.f32 1.0, %v5651_v57 }
0x186b   : > { %v3361_v51 = vadd.f32 1.0, %v5653_v18  ;;  %v7674_v2 = vpop.eup %5654 }
0x186c   : > { %5664 = vrcp.f32 %v3360_v61  ;;  %v7676_v15 = vpop.eup %5656  ;;  %v3411_v46 = vmul.f32 %v7674_v2, %v3395_v60 }
0x186d   : > { %5666 = vrcp.f32 %v3361_v51  ;;  %v7681_v13 = vpop.eup %5658  ;;  %v3412_v17 = vmul.f32 %v7676_v15, %v3396_v47 }
0x186e   : > { %v7684_v32 = vpop.eup %5660  ;;  %v3413_v21 = vmul.f32 %v7681_v13, %v3397_v14 }
0x186f   : > { %v7689_v54 = vpop.eup %5662  ;;  %v3414_v7 = vmul.f32 %v7684_v32, %v3398_v25 }
0x1870   : > { %v3415_v28 = vmul.f32 %v7689_v54, %v3399_v50 }
0x1876   : > { %v7692_v11 = vpop.eup %5664 }
0x1877   : > { %v7697_v16 = vpop.eup %5666  ;;  %v3416_v51 = vmul.f32 %v7692_v11, %v3400_v43 }
0x18c6   : > { %v3427_v38 = vpop.permute.xlu1 %3426 }
0x18c7   : > { %v3450_v35 = vmul.f32 %v7670_v59, %v3427_v38  ;;  %v3429_v45 = vpop.permute.xlu0 %3428 }
0x18c8   : > { %v3451_v20 = vmul.f32 %v7674_v2, %v3429_v45 }
0x18c9   : > { %3466 = vrot.lane.b32.xlu1 %v3450_v35, %s6054_s24 }
0x18ca   : > { %v3431_v62 = vpop.permute.xlu1 %3430  ;;  %3468 = vrot.lane.b32.xlu0 %v3451_v20, %s6054_s24 }
0x18cb   : > { %v3452_v49 = vmul.f32 %v7676_v15, %v3431_v62  ;;  %v3433_v8 = vpop.permute.xlu0 %3432 }
0x18cc   : > { %v3453_v33 = vmul.f32 %v7681_v13, %v3433_v8 }
0x18cd   : > { %3470 = vrot.lane.b32.xlu1 %v3452_v49, %s6054_s24 }
0x18ce   : > { %v3435_v36 = vpop.permute.xlu1 %3434  ;;  %3472 = vrot.lane.b32.xlu0 %v3453_v33, %s6054_s24  ;;  %v3417_v33 = vmul.f32 %v7697_v16, %v3401_v58 }
0x18cf   : > { %v3454_v3 = vmul.f32 %v7684_v32, %v3435_v36  ;;  %v3437_v0 = vpop.permute.xlu0 %3436 }
0x18d0   : > { %v3455_v9 = vmul.f32 %v7689_v54, %v3437_v0 }
0x18d1   : > { %3474 = vrot.lane.b32.xlu1 %v3454_v3, %s6054_s24 }
0x18d2   : > { %v3439_v19 = vpop.permute.xlu1 %3438  ;;  %3476 = vrot.lane.b32.xlu0 %v3455_v9, %s6054_s24 }
0x18d3   : > { %v3456_v41 = vmul.f32 %v7692_v11, %v3439_v19  ;;  %v3441_v27 = vpop.permute.xlu0 %3440 }
0x18d4   : > { %v3457_v24 = vmul.f32 %v7697_v16, %v3441_v27 }
0x18d5   : > { %3478 = vrot.lane.b32.xlu1 %v3456_v41, %s6054_s24 }
0x18d6   : > { %3480 = vrot.lane.b32.xlu0 %v3457_v24, %s6054_s24 }
0x193b   : > { %v3467_v29 = vpop.permute.xlu1 %3466 }
0x193c   : > { %v7704_v10 = vadd.f32 %v3467_v29, %v3410_v56  ;;  %v3469_v1 = vpop.permute.xlu0 %3468 }
0x193d   : > { %v3491_v48 = vadd.f32 %v3469_v1, %v3411_v46 }
0x193e   : > { %5668 = vtanh.f32 %v7704_v10 }
0x193f   : > { %v3471_v22 = vpop.permute.xlu1 %3470  ;;  %5670 = vtanh.f32 %v3491_v48  ;;  %v3585_v55 = vrot.slane %v3491_v48, 7 }
0x1940   : > { %v3492_v23 = vadd.f32 %v3471_v22, %v3412_v17  ;;  %v3473_v63 = vpop.permute.xlu0 %3472 }
0x1941   : > { %v3493_v38 = vadd.f32 %v3473_v63, %v3413_v21 }
0x1942   : > { %5672 = vtanh.f32 %v3492_v23  ;;  %v3586_v30 = vrot.slane %v3492_v23, 6 }
0x1943   : > { %v3475_v26 = vpop.permute.xlu1 %3474  ;;  %5674 = vtanh.f32 %v3493_v38  ;;  %v3588_v35 = vrot.slane %v3493_v38, 5 }
0x1944   : > { %v3587_v34 = vsel %vm1196_vm5, %v3586_v30, %v3585_v55  ;;  %v3494_v57 = vadd.f32 %v3475_v26, %v3414_v7  ;;  %v3477_v18 = vpop.permute.xlu0 %3476 }
0x1945   : > { %v3495_v45 = vadd.f32 %v3477_v18, %v3415_v28  ;;  %v3589_v20 = vsel %vm1199_vm6, %v3588_v35, %v3587_v34 }
0x1946   : > { %5676 = vtanh.f32 %v3494_v57  ;;  %v3590_v61 = vrot.slane %v3494_v57, 4 }
0x1947   : > { %v3479_v62 = vpop.permute.xlu1 %3478  ;;  %5678 = vtanh.f32 %v3495_v45  ;;  %v3592_v8 = vrot.slane %v3495_v45, 3 }
0x1948   : > { %v5669_v39 = vpop.eup %5668  ;;  %v3591_v42 = vsel %vm1202_vm7, %v3590_v61, %v3589_v20  ;;  %v3496_v49 = vadd.f32 %v3479_v62, %v3416_v51  ;;  %v3481_v36 = vpop.permute.xlu0 %3480 }
0x1949   : > { %3514 = vrot.lane.b32.xlu1 %v5669_v39, %s6053_s25  ;;  %v5671_v0 = vpop.eup %5670  ;;  %v3497_v9 = vadd.f32 %v3481_v36, %v3417_v33  ;;  %v3593_v19 = vsel %vm1205_vm8, %v3592_v8, %v3591_v42 }
0x194a   : > { %5680 = vtanh.f32 %v3496_v49  ;;  %v3594_v3 = vrot.slane %v3496_v49, 2  ;;  %3516 = vrot.lane.b32.xlu0 %v5671_v0, %s6053_s25 }
0x194b   : > { %5682 = vtanh.f32 %v3497_v9  ;;  %v3596_v27 = vrot.slane %v3497_v9, 1 }
0x194c   : > { %v5673_v41 = vpop.eup %5672  ;;  %v3595_v44 = vsel %vm1208_vm9, %v3594_v3, %v3593_v19 }
0x194d   : > { %3518 = vrot.lane.b32.xlu1 %v5673_v41, %s6053_s25  ;;  %v5675_v24 = vpop.eup %5674  ;;  %v7730_v4 = vsel %vm1211_vm10, %v3596_v27, %v3595_v44 }
0x194e   : > { %3520 = vrot.lane.b32.xlu0 %v5675_v24, %s6053_s25 }
0x1950   : > { %v5677_v56 = vpop.eup %5676 }
0x1951   : > { %3522 = vrot.lane.b32.xlu1 %v5677_v56, %s6053_s25  ;;  %v5679_v29 = vpop.eup %5678 }
0x1952   : > { %3524 = vrot.lane.b32.xlu0 %v5679_v29, %s6053_s25 }
0x1954   : > { %v5681_v60 = vpop.eup %5680 }
0x1955   : > { %3526 = vrot.lane.b32.xlu1 %v5681_v60, %s6053_s25  ;;  %v5683_v47 = vpop.eup %5682 }
0x1956   : > { %3528 = vrot.lane.b32.xlu0 %v5683_v47, %s6053_s25 }
0x19bb   : > { %v3515_v46 = vpop.permute.xlu1 %3514 }
0x19bc   : > { %v7738_v1 = vmul.f32 %v7670_v59, %v3515_v46  ;;  %v3517_v14 = vpop.permute.xlu0 %3516 }
0x19bd   : > { %v3539_v48 = vmul.f32 %v7674_v2, %v3517_v14 }
0x19be   : > { %v7743_v17 = vsel %vm3660_vm3, %v7608_v31, %v7738_v1 }
0x19bf   : > { %3677 = vrot.lane.b32.xlu1 %v7743_v17, %s6054_s24  ;;  %v3519_v22 = vpop.permute.xlu1 %3518  ;;  %v7751_v23 = vsel %vm3660_vm3, %v7614_v52, %v3539_v48  ;;  %v3554_v59 = vrot.slane %v3539_v48, 7 }
0x19c0   : > { %v3540_v25 = vmul.f32 %v7676_v15, %v3519_v22  ;;  %3679 = vrot.lane.b32.xlu0 %v7751_v23, %s6054_s24  ;;  %v3521_v21 = vpop.permute.xlu0 %3520 }
0x19c1   : > { %v3541_v55 = vmul.f32 %v7681_v13, %v3521_v21 }
0x19c2   : > { %v3555_v31 = vrot.slane %v3540_v25, 6  ;;  %v7757_v39 = vsel %vm3660_vm3, %v7618_v6, %v3540_v25 }
0x19c3   : > { %3681 = vrot.lane.b32.xlu1 %v7757_v39, %s6054_s24  ;;  %v3523_v2 = vpop.permute.xlu1 %3522  ;;  %v3557_v63 = vrot.slane %v3541_v55, 5  ;;  %v7766_v30 = vsel %vm3660_vm3, %v7626_v37, %v3541_v55 }
0x19c4   : > { %v3556_v15 = vsel %vm1196_vm5, %v3555_v31, %v3554_v59  ;;  %v3542_v52 = vmul.f32 %v7684_v32, %v3523_v2  ;;  %3683 = vrot.lane.b32.xlu0 %v7766_v30, %s6054_s24  ;;  %v3525_v6 = vpop.permute.xlu0 %3524  ;;  %vm3573_vm5 = vcmask 261127  }
0x19c5   : > { %v3543_v50 = vmul.f32 %v7689_v54, %v3525_v6  ;;  %v3558_v38 = vsel %vm1199_vm6, %v3557_v63, %v3556_v15 }
0x19c6   : > { %v3559_v7 = vrot.slane %v3542_v52, 4  ;;  %v7772_v13 = vsel %vm3660_vm3, %v7630_v53, %v3542_v52 }
0x19c7   : > { %3685 = vrot.lane.b32.xlu1 %v7772_v13, %s6054_s24  ;;  %v3527_v32 = vpop.permute.xlu1 %3526  ;;  %v3561_v43 = vrot.slane %v3543_v50, 3  ;;  %v3666_v34 = vsel %vm3660_vm3, %v7638_v12, %v3543_v50 }
0x19c8   : > { %v3560_v37 = vsel %vm1202_vm7, %v3559_v7, %v3558_v38  ;;  %v3544_v26 = vmul.f32 %v7692_v11, %v3527_v32  ;;  %3687 = vrot.lane.b32.xlu0 %v3666_v34, %s6054_s24  ;;  %v3529_v53 = vpop.permute.xlu0 %3528 }
0x19c9   : > { %v3545_v35 = vmul.f32 %v7697_v16, %v3529_v53  ;;  %v3562_v28 = vsel %vm1205_vm8, %v3561_v43, %v3560_v37 }
0x19ca   : > { %v3563_v57 = vrot.slane %v3544_v26, 2  ;;  %v7785_v54 = vsel %vm3660_vm3, %v7649_v40, %v3544_v26 }
0x19cb   : > { %3689 = vrot.lane.b32.xlu1 %v7785_v54, %s6054_s24  ;;  %v3565_v18 = vrot.slane %v3545_v35, 1  ;;  %v3668_v12 = vsel %vm3660_vm3, %v7642_v5, %v3545_v35 }
0x19cc   : > { %v3564_v11 = vsel %vm1208_vm9, %v3563_v57, %v3562_v28  ;;  %3691 = vrot.lane.b32.xlu0 %v3668_v12, %s6054_s24 }
0x19cd   : > { %v7796_v61 = vsel %vm1211_vm10, %v3565_v18, %v3564_v11 }
0x1a31   : > { %v3678_v40 = vpop.permute.xlu1 %3677 }
0x1a32   : > { %v3701_v51 = vsel %vm734_vm2, %v3678_v40, 0.0  ;;  %v3680_v16 = vpop.permute.xlu0 %3679 }
0x1a33   : > { %3702 = vadd.xlane.f32.xlu1 %v3701_v51  ;;  %v3704_v58 = vsel %vm734_vm2, %v3680_v16, 0.0 }
0x1a34   : > { %3705 = vadd.xlane.f32.xlu0 %v3704_v58 }
0x1a35   : > { %v3682_v45 = vpop.permute.xlu1 %3681 }
0x1a36   : > { %v3707_v20 = vsel %vm734_vm2, %v3682_v45, 0.0  ;;  %v3684_v62 = vpop.permute.xlu0 %3683  ;;  %v4681_v45 = vld [vmem:[%s8269_s8] ss:$0 sm:$0xff] }
0x1a37   : > { %v3710_v42 = vsel %vm734_vm2, %v3684_v62, 0.0 }
0x1a38   : > { %3711 = vadd.xlane.f32.xlu1 %v3710_v42  ;;  %3708 = vadd.xlane.f32.xlu0 %v3707_v20  ;;  %v4682_v20 = vld [vmem:[%s8270_s14] ss:$0 sm:$0xff] }
0x1a39   : > { %v3686_v5 = vpop.permute.xlu1 %3685 }
0x1a3a   : > { %v3713_v49 = vsel %vm734_vm2, %v3686_v5, 0.0  ;;  %v3688_v8 = vpop.permute.xlu0 %3687 }
0x1a3b   : > { %v3716_v33 = vsel %vm734_vm2, %v3688_v8, 0.0 }
0x1a3c   : > { %3717 = vadd.xlane.f32.xlu1 %v3716_v33  ;;  %3714 = vadd.xlane.f32.xlu0 %v3713_v49 }
0x1a3d   : > { %v3690_v36 = vpop.permute.xlu1 %3689 }
0x1a3e   : > { %v3719_v3 = vsel %vm734_vm2, %v3690_v36, 0.0  ;;  %v3692_v0 = vpop.permute.xlu0 %3691 }
0x1a3f   : > { %v3722_v9 = vsel %vm734_vm2, %v3692_v0, 0.0 }
0x1a40   : > { %3723 = vadd.xlane.f32.xlu1 %v3722_v9  ;;  %3720 = vadd.xlane.f32.xlu0 %v3719_v3 }
0x1ac0   : > { %v3703_v19 = vpop.xlane.xlu1 %3702 }
0x1ac1   : > { %v3726_v41 = vmul.f32 0.03125, %v3703_v19  ;;  %v3706_v24 = vpop.xlane.xlu0 %3705 }
0x1ac2   : > { %v3727_v56 = vmul.f32 0.03125, %v3706_v24 }
0x1ac3   : > { %v7807_v44 = vsub.f32 %v7743_v17, %v3726_v41 }
0x1ac4   : > { %v7813_v29 = vsub.f32 %v7751_v23, %v3727_v56 }
0x1ac5   : > { %v3742_v27 = vmul.f32 %v7807_v44, %v7807_v44  ;;  %v3709_v60 = vpop.xlane.xlu0 %3708  ;;  %v3712_v47 = vpop.xlane.xlu1 %3711 }
0x1ac6   : > { %v3743_v46 = vmul.f32 %v7813_v29, %v7813_v29  ;;  %v3728_v14 = vmul.f32 0.03125, %v3709_v60  ;;  %v3729_v48 = vmul.f32 0.03125, %v3712_v47 }
0x1ac7   : > { %3758 = vrot.lane.b32.xlu0 %v3742_v27, %s6054_s24 }
0x1ac8   : > { %v7818_v17 = vsub.f32 %v7757_v39, %v3728_v14  ;;  %v7821_v22 = vsub.f32 %v7766_v30, %v3729_v48  ;;  %3760 = vrot.lane.b32.xlu1 %v3743_v46, %s6054_s24 }
0x1ac9   : > { %v3715_v25 = vpop.xlane.xlu0 %3714  ;;  %v3718_v59 = vpop.xlane.xlu1 %3717 }
0x1aca   : > { %v3744_v23 = vmul.f32 %v7818_v17, %v7818_v17  ;;  %v3745_v21 = vmul.f32 %v7821_v22, %v7821_v22  ;;  %v3730_v31 = vmul.f32 0.03125, %v3715_v25  ;;  %v3731_v55 = vmul.f32 0.03125, %v3718_v59 }
0x1acc   : > { %v7829_v2 = vsub.f32 %v7772_v13, %v3730_v31  ;;  %v7831_v39 = vsub.f32 %v3666_v34, %v3731_v55  ;;  %3762 = vrot.lane.b32.xlu1 %v3744_v23, %s6054_s24  ;;  %3764 = vrot.lane.b32.xlu0 %v3745_v21, %s6054_s24 }
0x1acd   : > { %v3721_v15 = vpop.xlane.xlu0 %3720  ;;  %v3724_v52 = vpop.xlane.xlu1 %3723 }
0x1ace   : > { %v3746_v63 = vmul.f32 %v7829_v2, %v7829_v2  ;;  %v3747_v30 = vmul.f32 %v7831_v39, %v7831_v39  ;;  %v3732_v6 = vmul.f32 0.03125, %v3721_v15  ;;  %v3733_v7 = vmul.f32 0.03125, %v3724_v52 }
0x1ad0   : > { %v7840_v50 = vsub.f32 %v7785_v54, %v3732_v6  ;;  %v7842_v13 = vsub.f32 %v3668_v12, %v3733_v7  ;;  %3766 = vrot.lane.b32.xlu1 %v3746_v63, %s6054_s24  ;;  %3768 = vrot.lane.b32.xlu0 %v3747_v30, %s6054_s24 }
0x1ad2   : > { %v3748_v38 = vmul.f32 %v7840_v50, %v7840_v50  ;;  %v3749_v32 = vmul.f32 %v7842_v13, %v7842_v13 }
0x1ad4   : > { %3770 = vrot.lane.b32.xlu1 %v3748_v38, %s6054_s24  ;;  %3772 = vrot.lane.b32.xlu0 %v3749_v32, %s6054_s24 }
0x1b39   : > { %v3759_v37 = vpop.permute.xlu0 %3758 }
0x1b3a   : > { %v3761_v26 = vpop.permute.xlu1 %3760  ;;  %v3782_v51 = vsel %vm734_vm2, %v3759_v37, 0.0 }
0x1b3b   : > { %v3785_v43 = vsel %vm734_vm2, %v3761_v26, 0.0 }
0x1b3c   : > { %3786 = vadd.xlane.f32.xlu0 %v3785_v43 }
0x1b3e   : > { %v3765_v34 = vpop.permute.xlu0 %3764  ;;  %v3763_v53 = vpop.permute.xlu1 %3762 }
0x1b3f   : > { %v3788_v57 = vsel %vm734_vm2, %v3763_v53, 0.0  ;;  %v3791_v16 = vsel %vm734_vm2, %v3765_v34, 0.0 }
0x1b40   : > { %3789 = vadd.xlane.f32.xlu0 %v3788_v57 }
0x1b42   : > { %v3769_v54 = vpop.permute.xlu0 %3768  ;;  %v3767_v35 = vpop.permute.xlu1 %3766 }
0x1b43   : > { %v3794_v28 = vsel %vm734_vm2, %v3767_v35, 0.0  ;;  %v3797_v58 = vsel %vm734_vm2, %v3769_v54, 0.0 }
0x1b44   : > { %3795 = vadd.xlane.f32.xlu0 %v3794_v28 }
0x1b46   : > { %v3773_v11 = vpop.permute.xlu0 %3772  ;;  %v3771_v18 = vpop.permute.xlu1 %3770 }
0x1b47   : > { %v3803_v12 = vsel %vm734_vm2, %v3773_v11, 0.0  ;;  %v3800_v40 = vsel %vm734_vm2, %v3771_v18, 0.0 }
0x1b48   : > { %3804 = vadd.xlane.f32.xlu1 %v3803_v12  ;;  %3801 = vadd.xlane.f32.xlu0 %v3800_v40 }
0x1b4c   : > { %3783 = vadd.xlane.f32.xlu1 %v3782_v51 }
0x1b50   : > { %3792 = vadd.xlane.f32.xlu1 %v3791_v16 }
0x1b54   : > { %3798 = vadd.xlane.f32.xlu1 %v3797_v58 }
0x1b5e   : > { %3844 = vrot.lane.b32.xlu0 %v4681_v45, %s6055_s13 }
0x1b62   : > { %3569 = vrot.lane.b32.xlu0 %v7796_v61, %s6054_s24 }
0x1b65   : > { %3861 = vrot.lane.b32.xlu1 %v4682_v20, %s6055_s13 }
0x1b66   : > { %3600 = vrot.lane.b32.xlu0 %v7730_v4, %s6055_s13 }
0x1b69   : > { %3567 = vrot.lane.b32.xlu1 %v7738_v1, %s6054_s24 }
0x1b6d   : > { %3598 = vrot.lane.b32.xlu1 %v7704_v10, %s6055_s13 }
0x1bc9   : > { %v3787_v62 = vpop.xlane.xlu0 %3786 }
0x1bca   : > { %v3807_v42 = vmul.f32 0.03125, %v3787_v62 }
0x1bcc   : > { %v3815_v49 = vadd.f32 1e-05, %v3807_v42 }
0x1bcd   : > { %v3790_v5 = vpop.xlane.xlu0 %3789 }
0x1bce   : > { %5684 = vrsqrt.f32 %v3815_v49  ;;  %v3808_v33 = vmul.f32 0.03125, %v3790_v5 }
0x1bd0   : > { %v3816_v0 = vadd.f32 1e-05, %v3808_v33 }
0x1bd1   : > { %v3796_v8 = vpop.xlane.xlu0 %3795 }
0x1bd2   : > { %v3810_v3 = vmul.f32 0.03125, %v3796_v8  ;;  %5686 = vrsqrt.f32 %v3816_v0 }
0x1bd4   : > { %v3818_v41 = vadd.f32 1e-05, %v3810_v3 }
0x1bd5   : > { %v3802_v61 = vpop.xlane.xlu0 %3801  ;;  %v3805_v36 = vpop.xlane.xlu1 %3804 }
0x1bd6   : > { %v3812_v27 = vmul.f32 0.03125, %v3802_v61  ;;  %v3813_v1 = vmul.f32 0.03125, %v3805_v36 }
0x1bd8   : > { %v5685_v24 = vpop.eup %5684  ;;  %v3820_v46 = vadd.f32 1e-05, %v3812_v27  ;;  %v3821_v14 = vadd.f32 1e-05, %v3813_v1 }
0x1bd9   : > { %v7872_v9 = vpop.permute.xlu0 %3844  ;;  %v3784_v19 = vpop.xlane.xlu1 %3783  ;;  %v3831_v25 = vmul.f32 %v5685_v24, %v7813_v29 }
0x1bda   : > { %v3806_v4 = vmul.f32 0.03125, %v3784_v19 }
0x1bdb   : > { %v3848_v55 = vmul.f32 %v7872_v9, %v3831_v25 }
0x1bdc   : > { %v3814_v10 = vadd.f32 1e-05, %v3806_v4  ;;  %v5687_v63 = vpop.eup %5686 }
0x1bdd   : > { %v3570_v56 = vpop.permute.xlu0 %3569  ;;  %v3793_v60 = vpop.xlane.xlu1 %3792  ;;  %v3832_v32 = vmul.f32 %v5687_v63, %v7818_v17 }
0x1bde   : > { %5688 = vrsqrt.f32 %v3814_v10  ;;  %3576 = vst.msk [vmem:[#allocation2 + $0x1] sm:$0x7f] %vm3575_vm4, %v3570_v56  ;;  %v3809_v47 = vmul.f32 0.03125, %v3793_v60 }
0x1bdf   : > { %5690 = vrsqrt.f32 %v3818_v41  ;;  %v3849_v35 = vmul.f32 %v7872_v9, %v3832_v32 }
0x1be0   : > { %v3817_v48 = vadd.f32 1e-05, %v3809_v47 }
0x1be1   : > { %v3601_v59 = vpop.permute.xlu0 %3600  ;;  %v3799_v23 = vpop.xlane.xlu1 %3798 }
0x1be2   : > { %5692 = vrsqrt.f32 %v3817_v48  ;;  %3605 = vst.msk [vmem:[#allocation3 + $0x1] sm:$0x7f] %vm3575_vm4, %v3601_v59  ;;  %v3811_v21 = vmul.f32 0.03125, %v3799_v23 }
0x1be3   : > { %5694 = vrsqrt.f32 %v3820_v46 }
0x1be4   : > { %5696 = vrsqrt.f32 %v3821_v14  ;;  %v3819_v31 = vadd.f32 1e-05, %v3811_v21 }
0x1be5   : > { %v3862_v15 = vpop.permute.xlu1 %3861 }
0x1be6   : > { %5698 = vrsqrt.f32 %v3819_v31  ;;  %v3865_v52 = vadd.f32 %v3862_v15, %v3848_v55  ;;  %v3866_v18 = vadd.f32 %v3862_v15, %v3849_v35 }
0x1be8   : > { %v5689_v30 = vpop.eup %5688  ;;  %3882 = vrot.lane.b32.xlu0 %v3865_v52, %s6054_s24 }
0x1be9   : > { %v5691_v29 = vpop.eup %5690  ;;  %v3568_v6 = vpop.permute.xlu1 %3567  ;;  %v3830_v7 = vmul.f32 %v5689_v30, %v7807_v44 }
0x1bea   : > { %3574 = vst.msk [vmem:[#allocation2 - $0x7] sm:$0x80] %vm3573_vm5, %v3568_v6  ;;  %v3834_v26 = vmul.f32 %v5691_v29, %v7829_v2 }
0x1beb   : > { %v3847_v38 = vmul.f32 %v7872_v9, %v3830_v7 }
0x1bec   : > { %v5693_v37 = vpop.eup %5692  ;;  %v3851_v17 = vmul.f32 %v7872_v9, %v3834_v26 }
0x1bed   : > { %v5695_v43 = vpop.eup %5694  ;;  %v3599_v34 = vpop.permute.xlu1 %3598  ;;  %v3864_v53 = vadd.f32 %v3862_v15, %v3847_v38  ;;  %v3833_v57 = vmul.f32 %v5693_v37, %v7821_v22 }
0x1bee   : > { %v5697_v54 = vpop.eup %5696  ;;  %3604 = vst.msk [vmem:[#allocation3 - $0x7] sm:$0x80] %vm3573_vm5, %v3599_v34  ;;  %v3836_v11 = vmul.f32 %v5695_v43, %v7840_v50  ;;  %v3868_v16 = vadd.f32 %v3862_v15, %v3851_v17 }
0x1bef   : > { %3880 = vrot.lane.b32.xlu1 %v3864_v53, %s6054_s24  ;;  %v3850_v44 = vmul.f32 %v7872_v9, %v3833_v57  ;;  %v3837_v22 = vmul.f32 %v5697_v54, %v7842_v13 }
0x1bf0   : > { %v5699_v28 = vpop.eup %5698  ;;  %v3853_v58 = vmul.f32 %v7872_v9, %v3836_v11 }
0x1bf1   : > { %v3867_v2 = vadd.f32 %v3862_v15, %v3850_v44  ;;  %v3835_v12 = vmul.f32 %v5699_v28, %v7831_v39  ;;  %v3854_v50 = vmul.f32 %v7872_v9, %v3837_v22 }
0x1bf2   : > { %v3870_v13 = vadd.f32 %v3862_v15, %v3853_v58 }
0x1bf3   : > { %3886 = vrot.lane.b32.xlu0 %v3867_v2, %s6054_s24  ;;  %3884 = vrot.lane.b32.xlu1 %v3866_v18, %s6054_s24  ;;  %v3852_v40 = vmul.f32 %v7872_v9, %v3835_v12  ;;  %v3871_v39 = vadd.f32 %v3862_v15, %v3854_v50 }
0x1bf5   : > { %v3869_v51 = vadd.f32 %v3862_v15, %v3852_v40 }
0x1bf7   : > { %3890 = vrot.lane.b32.xlu0 %v3869_v51, %s6054_s24  ;;  %3888 = vrot.lane.b32.xlu1 %v3868_v16, %s6054_s24 }
0x1bfb   : > { %3894 = vrot.lane.b32.xlu0 %v3871_v39, %s6054_s24  ;;  %3892 = vrot.lane.b32.xlu1 %v3870_v13, %s6054_s24 }
0x1c5a   : > { %v3883_v45 = vpop.permute.xlu0 %3882 }
0x1c5b   : > { %3905 = vst.msk [vmem:[%s6474_s19 + $0x8] sm:$0xff] %vm734_vm2, %v3883_v45 }
0x1c61   : > { %v3881_v20 = vpop.permute.xlu1 %3880 }
0x1c62   : > { %3904 = vst.msk [vmem:[%s6474_s19] sm:$0xff] %vm734_vm2, %v3881_v20 }
0x1c65   : > { %v3887_v62 = vpop.permute.xlu0 %3886  ;;  %v3885_v42 = vpop.permute.xlu1 %3884 }
0x1c66   : > { %3907 = vst.msk [vmem:[%s6474_s19 + $0x18] sm:$0xff] %vm734_vm2, %v3887_v62  ;;  %3906 = vst.msk [vmem:[%s6474_s19 + $0x10] sm:$0xff] %vm734_vm2, %v3885_v42 }
0x1c69   : > { %v3891_v5 = vpop.permute.xlu0 %3890  ;;  %v3889_v49 = vpop.permute.xlu1 %3888 }
0x1c6a   : > { %3909 = vst.msk [vmem:[%s6474_s19 + $0x28] sm:$0xff] %vm734_vm2, %v3891_v5  ;;  %3908 = vst.msk [vmem:[%s6474_s19 + $0x20] sm:$0xff] %vm734_vm2, %v3889_v49 }
0x1c6d   : > { %v3895_v8 = vpop.permute.xlu0 %3894  ;;  %v3893_v33 = vpop.permute.xlu1 %3892 }
0x1c6e   : > { %3911 = vst.msk [vmem:[%s6474_s19 + $0x38] sm:$0xff] %vm734_vm2, %v3895_v8  ;;  %3910 = vst.msk [vmem:[%s6474_s19 + $0x30] sm:$0xff] %vm734_vm2, %v3893_v33 }
0x1c6f PF: > { %v3937_v61 = vld [vmem:[%s6460_s6] sm:$0xff]  ;;  %v3938_v36 = vld [vmem:[%s6460_s6 + $0x8] sm:$0xff]  ;;  %v3939_v3 = vld [vmem:[%s6460_s6 + $0x10] sm:$0xff]  ;;  %vm3948_vm6 = vcmask 261120   ;;  %v6056_v38 = vmov 0   ;;  %vm4238_vm2 = vcmask 7168  }
0x1c70   : > { %v4991_v0 = vpack.c.bf16 %v3938_v36, %v3937_v61  ;;  %v3940_v9 = vld [vmem:[%s6460_s6 + $0x18] sm:$0xff]  ;;  %v3929_v19 = vld [vmem:[%s6474_s19] sm:$0xff]  ;;  %v3930_v27 = vld [vmem:[%s6474_s19 + $0x8] sm:$0xff]  ;;  %5701 = vset.pattern.permute.xlu1 %v6056_v38  ;;  %5700 = vset.pattern.permute.xlu0 %v6056_v38  ;;  %s8272_s9 = sld [smem:[#allocation25_spill]] }
0x1c71   : > { %v4995_v4 = vpack.c.bf16 %v3940_v9, %v3939_v3  ;;  %4911 = vmatprep.mubr.msk.f32.mxu0 %vm3948_vm6, %v3929_v19  ;;  %v3933_v41 = vld [vmem:[%s6474_s19 + $0x20] sm:$0xff]  ;;  %v3934_v1 = vld [vmem:[%s6474_s19 + $0x28] sm:$0xff]  ;;  %v3931_v10 = vld [vmem:[%s6474_s19 + $0x10] sm:$0xff] }
0x1c72   : > { %4992 = vmatprep.subr.bf16.mxu0 %v4991_v0  ;;  %5001 = vmatprep.subr.bf16.mxu1 %v4991_v0  ;;  %v3932_v56 = vld [vmem:[%s6474_s19 + $0x18] sm:$0xff]  ;;  %v4683_v47 = vld [vmem:[%s511_s26] ss:$0 sm:$0xff]  ;;  %v7967_v32 = vld [vmem:[#allocation4 + $0x8] sm:$0xff] }
0x1c73   : > { %4994 = vmatpush3.bf16.msra.mxu0 %v4991_v0  ;;  %5003 = vmatpush3.bf16.msra.mxu1 %v4991_v0  ;;  %v7969_v37 = vld [vmem:[#allocation4 + $0x28] sm:$0xff]  ;;  %v7977_v57 = vld [vmem:[#allocation4] sm:$0xff]  ;;  %v7979_v54 = vld [vmem:[#allocation4 + $0x18] sm:$0xff] }
0x1c74   : > { %4996 = vmatprep.subr.bf16.mxu0 %v4995_v4  ;;  %5002 = vmatprep.subr.bf16.mxu1 %v4995_v4  ;;  %v7996_v18 = vld [vmem:[#allocation4 + $0x20] sm:$0xff]  ;;  %v7998_v12 = vld [vmem:[#allocation4 + $0x10] sm:$0xff]  ;;  %v8016_v39 = vld [vmem:[#allocation4 + $0x38] sm:$0xff] }
0x1c75   : > { %4917 = vmatprep.mubr.msk.f32.mxu1 %vm3948_vm6, %v3933_v41  ;;  %v3935_v24 = vld [vmem:[%s6474_s19 + $0x30] sm:$0xff]  ;;  %v3936_v60 = vld [vmem:[%s6474_s19 + $0x38] sm:$0xff]  ;;  %v8018_v13 = vld [vmem:[#allocation4 + $0x30] sm:$0xff] }
0x1c76   : > { %p4692_p9 = scmp.ne.s32.totalorder %s8272_s9, 1 }
0x1c77   : > { %4998 = vmatpush3.bf16.msra.mxu0 %v4995_v4  ;;  %5004 = vmatpush3.bf16.msra.mxu1 %v4995_v4 }
0x1c7a   : > { %4912 = vmatmul.mubr.msk.f32.vlgmr.msra.gmra.mrb[0].mxu0 %vm3948_vm6, %v3930_v27  ;;  %4918 = vmatmul.mubr.msk.f32.vlgmr.msra.gmra.mrb[0].mxu1 %vm3948_vm6, %v3934_v1 }
0x1c7b   : > { %4914 = vmatprep.mubr.msk.f32.mxu0 %vm3948_vm6, %v3931_v10  ;;  %4920 = vmatprep.mubr.msk.f32.mxu1 %vm3948_vm6, %v3935_v24 }
0x1c7e   : > { %4915 = vmatmul.mubr.msk.f32.gmra.mrb[2].mxu0 %vm3948_vm6, %v3932_v56  ;;  %4921 = vmatmul.mubr.msk.f32.gmra.mrb[2].mxu1 %vm3948_vm6, %v3936_v60 }
0x1d4d   : > { %v4913_v46 = vpop.f32.mrb[0].mxu0  ;;  %v4919_v14 = vpop.f32.mrb[0].mxu1 }
0x1d4e   : > { %v7943_v48 = vadd.f32 %v4913_v46, %v4683_v47  ;;  %v4039_v25 = vpop.f32.mrb[1].mxu0  ;;  %v7945_v59 = vadd.f32 %v4919_v14, %v4683_v47  ;;  %v4059_v23 = vpop.f32.mrb[1].mxu1 }
0x1d4f   : > { %v7949_v55 = vadd.f32 %v4683_v47, %v4039_v25  ;;  %v7957_v29 = vadd.f32 %v4683_v47, %v4059_v23 }
0x1d50   : > { %4088 = vmax.xlane.f32.xlu0 %v7943_v48  ;;  %4096 = vmax.xlane.f32.xlu1 %v7945_v59 }
0x1d51   : > { %v4916_v21 = vpop.f32.mrb[2].mxu0  ;;  %v4922_v31 = vpop.f32.mrb[2].mxu1 }
0x1d52   : > { %v7951_v15 = vadd.f32 %v4916_v21, %v4683_v47  ;;  %v4049_v52 = vpop.f32.mrb[3].mxu0  ;;  %v4069_v63 = vpop.f32.mrb[3].mxu1  ;;  %v7961_v6 = vadd.f32 %v4922_v31, %v4683_v47 }
0x1d53   : > { %v7955_v30 = vadd.f32 %v4683_v47, %v4049_v52  ;;  %v7963_v7 = vadd.f32 %v4683_v47, %v4069_v63 }
0x1d54   : > { %4086 = vmax.xlane.f32.xlu0 %v7949_v55  ;;  %4092 = vmax.xlane.f32.xlu1 %v7951_v15 }
0x1d58   : > { %4094 = vmax.xlane.f32.xlu0 %v7957_v29  ;;  %4090 = vmax.xlane.f32.xlu1 %v7955_v30 }
0x1d5c   : > { %4100 = vmax.xlane.f32.xlu1 %v7961_v6  ;;  %4098 = vmax.xlane.f32.xlu0 %v7963_v7 }
0x1ddd   : > { %v4089_v26 = vpop.xlane.xlu0 %4088  ;;  %v4097_v43 = vpop.xlane.xlu1 %4096 }
0x1dde   : > { %v7972_v34 = vmax.f32 %v7967_v32, %v4089_v26  ;;  %v7975_v53 = vmax.f32 %v7969_v37, %v4097_v43 }
0x1de0   : > { %v4119_v44 = vsub.f32 %v7967_v32, %v7972_v34  ;;  %4248 = vst.msk [vmem:[#allocation4 + $0x8] sm:$0xff] %vm4238_vm2, %v7972_v34  ;;  %4157 = vperm.xlu1 %5701, %v7972_v34   ;;  %v4123_v35 = vsub.f32 %v7969_v37, %v7975_v53  ;;  %4252 = vst.msk [vmem:[#allocation4 + $0x28] sm:$0xff] %vm4238_vm2, %v7975_v53 }
0x1de1   : > { %v4087_v28 = vpop.xlane.xlu0 %4086  ;;  %v4093_v17 = vpop.xlane.xlu1 %4092 }
0x1de2   : > { %v7991_v11 = vmax.f32 %v7977_v57, %v4087_v28  ;;  %v7994_v2 = vmax.f32 %v7979_v54, %v4093_v17  ;;  %v4136_v28 = vmul.f32 1.442695, %v4123_v35 }
0x1de4   : > { %v4118_v22 = vsub.f32 %v7977_v57, %v7991_v11  ;;  %4247 = vst.msk [vmem:[#allocation4] sm:$0xff] %vm4238_vm2, %v7991_v11  ;;  %4177 = vperm.xlu1 %5701, %v7975_v53   ;;  %4152 = vperm.xlu0 %5700, %v7991_v11   ;;  %v4121_v40 = vsub.f32 %v7979_v54, %v7994_v2  ;;  %4250 = vst.msk [vmem:[#allocation4 + $0x18] sm:$0xff] %vm4238_vm2, %v7994_v2  ;;  %v4115_v11 = vld [vmem:[#allocation5 + $0x28] sm:$0xff] }
0x1de5   : > { %v4095_v51 = vpop.xlane.xlu0 %4094  ;;  %v4091_v16 = vpop.xlane.xlu1 %4090 }
0x1de6   : > { %v8011_v50 = vmax.f32 %v7996_v18, %v4095_v51  ;;  %v8014_v58 = vmax.f32 %v7998_v12, %v4091_v16  ;;  %v4132_v32 = vmul.f32 1.442695, %v4121_v40  ;;  %v4110_v16 = vld [vmem:[#allocation5] sm:$0xff] }
0x1de8   : > { %v4122_v45 = vsub.f32 %v7996_v18, %v8011_v50  ;;  %4251 = vst.msk [vmem:[#allocation4 + $0x20] sm:$0xff] %vm4238_vm2, %v8011_v50  ;;  %4172 = vperm.xlu1 %5701, %v8011_v50   ;;  %v4120_v20 = vsub.f32 %v7998_v12, %v8014_v58  ;;  %4249 = vst.msk [vmem:[#allocation4 + $0x10] sm:$0xff] %vm4238_vm2, %v8014_v58  ;;  %v4114_v50 = vld [vmem:[#allocation5 + $0x20] sm:$0xff] }
0x1de9   : > { %v4101_v62 = vpop.xlane.xlu1 %4100  ;;  %v4099_v42 = vpop.xlane.xlu0 %4098 }
0x1dea   : > { %v8030_v5 = vmax.f32 %v8016_v39, %v4101_v62  ;;  %v8033_v49 = vmax.f32 %v8018_v13, %v4099_v42  ;;  %v4134_v17 = vmul.f32 1.442695, %v4122_v45  ;;  %v4130_v37 = vmul.f32 1.442695, %v4120_v20 }
0x1dec   : > { %4167 = vperm.xlu1 %5701, %v7994_v2   ;;  %v4125_v8 = vsub.f32 %v8016_v39, %v8030_v5  ;;  %4254 = vst.msk [vmem:[#allocation4 + $0x38] sm:$0xff] %vm4238_vm2, %v8030_v5  ;;  %v4124_v33 = vsub.f32 %v8018_v13, %v8033_v49  ;;  %4253 = vst.msk [vmem:[#allocation4 + $0x30] sm:$0xff] %vm4238_vm2, %v8033_v49 }
0x1dee   : > { %v4138_v18 = vmul.f32 1.442695, %v4124_v33 }
0x1df0   : > { %4162 = vperm.xlu1 %5701, %v8014_v58   ;;  %v4140_v58 = vmul.f32 1.442695, %v4125_v8 }
0x1df4   : > { %4182 = vperm.xlu1 %5701, %v8033_v49   ;;  %v4113_v49 = vld [vmem:[#allocation5 + $0x18] sm:$0xff] }
0x1df8   : > { %4187 = vperm.xlu1 %5701, %v8030_v5   ;;  %v4112_v5 = vld [vmem:[#allocation5 + $0x10] sm:$0xff] }
0x1e5f   : > { %v4158_v61 = vpop.permute.xlu1 %4157 }
0x1e60   : > { %v4191_v36 = vsub.f32 %v7943_v48, %v4158_v61 }
0x1e62   : > { %v4200_v3 = vmul.f32 1.442695, %v4191_v36 }
0x1e63   : > { %v4178_v0 = vpop.permute.xlu1 %4177  ;;  %v4153_v9 = vpop.permute.xlu0 %4152 }
0x1e64   : > { %5702 = vpow2.f32 %v4200_v3  ;;  %v4195_v19 = vsub.f32 %v7945_v59, %v4178_v0  ;;  %v4190_v4 = vsub.f32 %v7949_v55, %v4153_v9 }
0x1e66   : > { %v4208_v41 = vmul.f32 1.442695, %v4195_v19  ;;  %v4198_v27 = vmul.f32 1.442695, %v4190_v4  ;;  %v4116_v4 = vld [vmem:[#allocation5 + $0x30] sm:$0xff] }
0x1e67   : > { %v4173_v1 = vpop.permute.xlu1 %4172 }
0x1e68   : > { %5704 = vpow2.f32 %v4208_v41  ;;  %v4194_v10 = vsub.f32 %v7957_v29, %v4173_v1 }
0x1e69   : > { %5706 = vpow2.f32 %v4198_v27 }
0x1e6a   : > { %v4206_v24 = vmul.f32 1.442695, %v4194_v10 }
0x1e6b   : > { %v4168_v56 = vpop.permute.xlu1 %4167 }
0x1e6c   : > { %5708 = vpow2.f32 %v4206_v24  ;;  %v4193_v60 = vsub.f32 %v7951_v15, %v4168_v56  ;;  %v4117_v24 = vld [vmem:[#allocation5 + $0x38] sm:$0xff] }
0x1e6e   : > { %v5703_v47 = vpop.eup %5702  ;;  %v4204_v46 = vmul.f32 1.442695, %v4193_v60 }
0x1e6f   : > { %4216 = vadd.xlane.f32.xlu0 %v5703_v47  ;;  %v4163_v14 = vpop.permute.xlu1 %4162 }
0x1e70   : > { %5710 = vpow2.f32 %v4204_v46  ;;  %v4192_v48 = vsub.f32 %v7955_v30, %v4163_v14 }
0x1e72   : > { %v5705_v25 = vpop.eup %5704  ;;  %v4202_v59 = vmul.f32 1.442695, %v4192_v48 }
0x1e73   : > { %4224 = vadd.xlane.f32.xlu1 %v5705_v25  ;;  %v4183_v23 = vpop.permute.xlu1 %4182  ;;  %v5707_v31 = vpop.eup %5706 }
0x1e74   : > { %5712 = vpow2.f32 %v4202_v59  ;;  %v4196_v21 = vsub.f32 %v7963_v7, %v4183_v23  ;;  %v4128_v7 = vmul.f32 1.442695, %v4119_v44  ;;  %v4111_v44 = vld [vmem:[#allocation5 + $0x8] sm:$0xff] }
0x1e76   : > { %v5709_v55 = vpop.eup %5708  ;;  %v4210_v52 = vmul.f32 1.442695, %v4196_v21 }
0x1e77   : > { %4222 = vadd.xlane.f32.xlu0 %v5709_v55  ;;  %v4188_v63 = vpop.permute.xlu1 %4187  ;;  %4214 = vadd.xlane.f32.xlu1 %v5707_v31 }
0x1e78   : > { %5714 = vpow2.f32 %v4210_v52  ;;  %v4197_v15 = vsub.f32 %v7961_v6, %v4188_v63  ;;  %v4126_v6 = vmul.f32 1.442695, %v4118_v22  ;;  %v4259_v63 = vld [vmem:[#allocation4] sm:$0xff] (!%p4692_p9) }
0x1e7a   : > { %v5711_v29 = vpop.eup %5710  ;;  %v4212_v38 = vmul.f32 1.442695, %v4197_v15 }
0x1e7b   : > { %4220 = vadd.xlane.f32.xlu1 %v5711_v29 }
0x1e7c   : > { %5716 = vpow2.f32 %v4212_v38  ;;  %v4260_v38 = vld [vmem:[#allocation4 + $0x8] sm:$0xff] (!%p4692_p9) }
0x1e7d   : > { %5718 = vpow2.f32 %v4128_v7 }
0x1e7e   : > { %v5713_v30 = vpop.eup %5712  ;;  %5720 = vpow2.f32 %v4136_v28 }
0x1e7f   : > { %4218 = vadd.xlane.f32.xlu0 %v5713_v30  ;;  %5722 = vpow2.f32 %v4126_v6 }
0x1e80   : > { %5724 = vpow2.f32 %v4134_v17  ;;  %v4262_v17 = vld [vmem:[#allocation4 + $0x18] sm:$0xff] (!%p4692_p9) }
0x1e81   : > { %5726 = vpow2.f32 %v4132_v32 }
0x1e82   : > { %v5715_v26 = vpop.eup %5714  ;;  %5728 = vpow2.f32 %v4130_v37  ;;  %v4263_v37 = vld [vmem:[#allocation4 + $0x20] sm:$0xff] (!%p4692_p9) }
0x1e83   : > { %4226 = vadd.xlane.f32.xlu0 %v5715_v26  ;;  %5730 = vpow2.f32 %v4138_v18 }
0x1e84   : > { %5732 = vpow2.f32 %v4140_v58 }
0x1e86   : > { %v5717_v43 = vpop.eup %5716 }
0x1e87   : > { %4228 = vadd.xlane.f32.xlu1 %v5717_v43  ;;  %v5719_v34 = vpop.eup %5718  ;;  %v4261_v43 = vld [vmem:[#allocation4 + $0x10] sm:$0xff] (!%p4692_p9) }
0x1e88   : > { %v4143_v53 = vmul.f32 %v5719_v34, %v4111_v44  ;;  %v5721_v57 = vpop.eup %5720 }
0x1e89   : > { %v5723_v54 = vpop.eup %5722  ;;  %v4147_v2 = vmul.f32 %v5721_v57, %v4115_v11  ;;  %v4264_v11 = vld [vmem:[#allocation4 + $0x28] sm:$0xff] (!%p4692_p9) }
0x1e8a   : > { %v5725_v40 = vpop.eup %5724  ;;  %v4142_v45 = vmul.f32 %v5723_v54, %v4110_v16 }
0x1e8b   : > { %v4146_v20 = vmul.f32 %v5725_v40, %v4114_v50  ;;  %v5727_v13 = vpop.eup %5726  ;;  %v4266_v50 = vld [vmem:[#allocation4 + $0x38] sm:$0xff] (!%p4692_p9) }
0x1e8c   : > { %v4145_v36 = vmul.f32 %v5727_v13, %v4113_v49  ;;  %v5729_v3 = vpop.eup %5728 }
0x1e8d   : > { %v4144_v0 = vmul.f32 %v5729_v3, %v4112_v5  ;;  %v5731_v9 = vpop.eup %5730 }
0x1e8e   : > { %v4148_v27 = vmul.f32 %v5731_v9, %v4116_v4  ;;  %v5733_v1 = vpop.eup %5732 }
0x1e8f   : > { %v4149_v60 = vmul.f32 %v5733_v1, %v4117_v24 }
0x1efc   : > { %v4217_v35 = vpop.xlane.xlu0 %4216 }
0x1efd   : > { %v4231_v22 = vadd.f32 %v4217_v35, %v4143_v53 }
0x1eff   : > { %4240 = vst.msk [vmem:[#allocation5 + $0x8] sm:$0xff] %vm4238_vm2, %v4231_v22 }
0x1f00   : > { %v4225_v51 = vpop.xlane.xlu1 %4224 }
0x1f01   : > { %v4235_v12 = vadd.f32 %v4225_v51, %v4147_v2  ;;  %v4265_v2 = vld [vmem:[#allocation4 + $0x30] sm:$0xff] (!%p4692_p9) }
0x1f03   : > { %4244 = vst.msk [vmem:[#allocation5 + $0x28] sm:$0xff] %vm4238_vm2, %v4235_v12 }
0x1f04   : > { %v4215_v62 = vpop.xlane.xlu1 %4214  ;;  %v4223_v42 = vpop.xlane.xlu0 %4222 }
0x1f05   : > { %v4230_v33 = vadd.f32 %v4215_v62, %v4142_v45  ;;  %v4234_v61 = vadd.f32 %v4223_v42, %v4146_v20 }
0x1f06   : > { %v4268_v48 = vld [vmem:[#allocation5 + $0x8] sm:$0xff] (!%p4692_p9) }
0x1f07   : > { %4239 = vst.msk [vmem:[#allocation5] sm:$0xff] %vm4238_vm2, %v4230_v33  ;;  %4243 = vst.msk [vmem:[#allocation5 + $0x20] sm:$0xff] %vm4238_vm2, %v4234_v61 }
0x1f08   : > { %v4221_v39 = vpop.xlane.xlu1 %4220 }
0x1f09   : > { %v4233_v8 = vadd.f32 %v4221_v39, %v4145_v36 }
0x1f0a   : > { %v4272_v21 = vld [vmem:[#allocation5 + $0x28] sm:$0xff] (!%p4692_p9) }
0x1f0b   : > { %4242 = vst.msk [vmem:[#allocation5 + $0x18] sm:$0xff] %vm4238_vm2, %v4233_v8 }
0x1f0c   : > { %v4219_v19 = vpop.xlane.xlu0 %4218 }
0x1f0d   : > { %v4232_v41 = vadd.f32 %v4219_v19, %v4144_v0 }
0x1f0e   : > { %v4267_v14 = vld [vmem:[#allocation5] sm:$0xff] (!%p4692_p9) }
0x1f0f   : > { %4241 = vst.msk [vmem:[#allocation5 + $0x10] sm:$0xff] %vm4238_vm2, %v4232_v41  ;;  %5734 = vlog2.f32 (!%p4692_p9), %v4267_v14  ;;  %v4271_v23 = vld [vmem:[#allocation5 + $0x20] sm:$0xff] (!%p4692_p9) }
0x1f10   : > { %v4227_v10 = vpop.xlane.xlu0 %4226  ;;  %5736 = vlog2.f32 (!%p4692_p9), %v4268_v48 }
0x1f11   : > { %v4236_v56 = vadd.f32 %v4227_v10, %v4148_v27  ;;  %4258 = sbr.rel (%p4692_p9) target bundleno = 7983 (0x1f2f), region = 88 }
0x1f12   : > { %v4270_v59 = vld [vmem:[#allocation5 + $0x18] sm:$0xff] (!%p4692_p9) }
0x1f13   : > { %4245 = vst.msk [vmem:[#allocation5 + $0x30] sm:$0xff] %vm4238_vm2, %v4236_v56 }
0x1f14   : > { %v4229_v47 = vpop.xlane.xlu1 %4228 }
0x1f15   : > { %v4237_v46 = vadd.f32 %v4229_v47, %v4149_v60 }
0x1f16   : > { %v4269_v25 = vld [vmem:[#allocation5 + $0x10] sm:$0xff] (!%p4692_p9) }
0x1f17   : > { %4246 = vst.msk [vmem:[#allocation5 + $0x38] sm:$0xff] %vm4238_vm2, %v4237_v46  ;;  %5738 = vlog2.f32 (!%p4692_p9), %v4269_v25 }
0x1f18   : > { %5740 = vlog2.f32 %v4270_v59 }
0x1f19   : > { %5742 = vlog2.f32 %v4271_v23  ;;  %v5735_v52 = vpop.eup %5734 }
0x1f1a   : > { %v4273_v31 = vld [vmem:[#allocation5 + $0x30] sm:$0xff]  ;;  %5744 = vlog2.f32 %v4272_v21  ;;  %v5737_v15 = vpop.eup %5736  ;;  %v4276_v29 = vmul.f32 0.6931472, %v5735_v52 }
0x1f1b   : > { %5746 = vlog2.f32 %v4273_v31  ;;  %v4278_v26 = vmul.f32 0.6931472, %v5737_v15 }
0x1f1c   : > { %v4291_v28 = vadd.f32 %v4276_v29, %v4259_v63 }
0x1f1d   : > { %v4292_v34 = vadd.f32 %v4278_v26, %v4260_v38 }
0x1f1e   : > { %v4274_v55 = vld [vmem:[#allocation5 + $0x38] sm:$0xff]  ;;  %4299 = vst.msk [vmem:[%s6476_s4] sm:$0xff] %vm4238_vm2, %v4291_v28 }
0x1f1f   : > { %5748 = vlog2.f32 %v4274_v55  ;;  %4300 = vst.msk [vmem:[%s6476_s4 + $0x8] sm:$0xff] %vm4238_vm2, %v4292_v34 }
0x1f21   : > { %v5739_v30 = vpop.eup %5738 }
0x1f22   : > { %v5741_v7 = vpop.eup %5740  ;;  %v4280_v6 = vmul.f32 0.6931472, %v5739_v30 }
0x1f23   : > { %v5743_v32 = vpop.eup %5742  ;;  %v4282_v44 = vmul.f32 0.6931472, %v5741_v7 }
0x1f24   : > { %v5745_v53 = vpop.eup %5744  ;;  %v4293_v57 = vadd.f32 %v4280_v6, %v4261_v43  ;;  %v4284_v35 = vmul.f32 0.6931472, %v5743_v32 }
0x1f25   : > { %v5747_v22 = vpop.eup %5746  ;;  %v4294_v18 = vadd.f32 %v4282_v44, %v4262_v17  ;;  %v4286_v54 = vmul.f32 0.6931472, %v5745_v53 }
0x1f26   : > { %4301 = vst.msk [vmem:[%s6476_s4 + $0x10] sm:$0xff] %vm4238_vm2, %v4293_v57  ;;  %v4295_v51 = vadd.f32 %v4284_v35, %v4263_v37  ;;  %v4288_v16 = vmul.f32 0.6931472, %v5747_v22 }
0x1f27   : > { %4302 = vst.msk [vmem:[%s6476_s4 + $0x18] sm:$0xff] %vm4238_vm2, %v4294_v18  ;;  %v4296_v12 = vadd.f32 %v4286_v54, %v4264_v11 }
0x1f28   : > { %4303 = vst.msk [vmem:[%s6476_s4 + $0x20] sm:$0xff] %vm4238_vm2, %v4295_v51  ;;  %v4297_v45 = vadd.f32 %v4288_v16, %v4265_v2 }
0x1f29   : > { %v5749_v40 = vpop.eup %5748  ;;  %4304 = vst.msk [vmem:[%s6476_s4 + $0x28] sm:$0xff] %vm4238_vm2, %v4296_v12 }
0x1f2a   : > { %v4290_v58 = vmul.f32 0.6931472, %v5749_v40  ;;  %4305 = vst.msk [vmem:[%s6476_s4 + $0x30] sm:$0xff] %vm4238_vm2, %v4297_v45 }
0x1f2c   : > { %v4298_v20 = vadd.f32 %v4290_v58, %v4266_v50 }
0x1f2e   : > { %4306 = vst.msk [vmem:[%s6476_s4 + $0x38] sm:$0xff] %vm4238_vm2, %v4298_v20 }
0x1f2f PF: > { %s8273_s26 = sld [smem:[#allocation26_spill]]  ;;  %s8274_s25 = sld [smem:[#allocation29_spill]] }
0x1f30   : > { %s8275_s8 = sld [smem:[#allocation36_spill]]  ;;  %s4327_s10 = sshll.u32 %s6474_s19, 4  ;;  %s8111_s10 = int_to_ptr.vmem [resolvable:$true] %s4327_s10 }
0x1f31   : > { %s8115_s11 = scalar_lea.sflag [#allocation8], %s440_s20  ;;  %s5894_s14 = scalar_lea.vmem %s8111_s10, 1024 }
0x1f32   : > { %p5895_p3 = scmp.ne.s32.totalorder %s8111_s10, %s5894_s14  ;;  %s6057_s6 = smov [#allocation15]  }
0x1f33   : > { %s5898_s28 = sshll.u32 %s6057_s6, 4  ;;  %s5899_s28 = int_to_ptr.vmem [resolvable:$false] %s5898_s28 }
0x1f34   : > { %s5900_s29 = scalar_lea.vmem %s5899_s28, 2048  ;;  %p5901_p2 = scmp.lt.s32.totalorder %s8111_s10, %s5899_s28 }
0x1f35   : > { %s4695_s24 = sshll.u32 %s8273_s26, 7  ;;  %p8276_p12 = scmp.ne.s32.totalorder %s8274_s25, 0 }
0x1f36   : > { %s8108_s13 = scalar_lea.hbm %s8275_s8, %s4695_s24  ;;  %p5902_p8 = scmp.lt.s32.totalorder %s5900_s29, %s5894_s14 }
0x1f37   : > { %p5896_p0 = pnand %p5895_p3, %p8276_p12 }
0x1f38   : > { %p5903_p6 = por %p5902_p8, %p5901_p2 }
0x1f39   : > { %p5897_p13 = pneg %p5896_p0 }
0x1f3b   : > { %p5904_p4 = pnand %p5903_p6, %p5897_p13 }
0x1f3d   : > { %5907 = shalt.err (!%p5904_p4)
}
0x1f3e   : > { %s5908_s20 = scalar_lea.hbm %s8108_s13, 1024  ;;  %s5912_s26 = scalar_lea.hbm %s8275_s8, 3072 }
0x1f3f   : > { %p5909_p5 = scmp.ne.s32.totalorder %s8108_s13, %s5908_s20  ;;  %p5913_p1 = scmp.lt.u32.totalorder %s8108_s13, %s8275_s8 }
0x1f40   : > { %p5914_p10 = scmp.lt.u32.totalorder %s5912_s26, %s5908_s20  ;;  %p5916_p3 = scmp.lt.u32.totalorder %s5908_s20, %s8108_s13 }
0x1f41   : > { %p5910_p7 = pnand %p5909_p5, %p8276_p12 }
0x1f42   : > { %p5915_p9 = por %p5914_p10, %p5913_p1 }
0x1f43   : > { %p5911_p11 = pneg %p5910_p7 }
0x1f44   : > { %p5917_p0 = por %p5916_p3, %p5915_p9 }
0x1f46   : > { %p5918_p13 = pnand %p5917_p0, %p5911_p11 }
0x1f48   : > { %5921 = shalt.err (!%p5918_p13)
}
0x1f49   : > { %s6058_s12 = smov 128   ;;  %s6059_s14 = smov 384   ;;  %v4383_v13 = vld [vmem:[%s6476_s4] sm:$0xff] (%p8276_p12)  ;;  %v4385_v62 = vld [vmem:[%s6476_s4 + $0x8] sm:$0xff] (%p8276_p12)  ;;  %v4387_v42 = vld [vmem:[%s6476_s4 + $0x10] sm:$0xff] (%p8276_p12) }
0x1f4a   : > { %s6060_s6 = smov 8   ;;  %4336 = sbr.rel (!%p8276_p12) target bundleno = 8024 (0x1f58), region = 96  ;;  %v4389_v49 = vld [vmem:[%s6476_s4 + $0x18] sm:$0xff] (%p8276_p12)  ;;  %v4391_v33 = vld [vmem:[%s6476_s4 + $0x20] sm:$0xff] (%p8276_p12)  ;;  %v4393_v61 = vld [vmem:[%s6476_s4 + $0x28] sm:$0xff] (%p8276_p12) }
0x1f4b   : > { %5021 = dma.vmem_to_hbm [thread:$0]  (%p8276_p12), %s8111_s10, 1024, %s8108_s13, %s8115_s11, %s6058_s12, %s6059_s14, %s6060_s6  }
0x1f4c   : > { %s8277_s28 = sld [smem:[#allocation26_spill]] (%p8276_p12)  ;;  %s8278_s9 = sld [smem:[#allocation37_spill]] (%p8276_p12)  ;;  %v4395_v36 = vld [vmem:[%s6476_s4 + $0x30] sm:$0xff] (%p8276_p12)  ;;  %v4397_v3 = vld [vmem:[%s6476_s4 + $0x38] sm:$0xff] (%p8276_p12) }
0x1f52   : > { %s4696_s29 = sshll.u32 %s8277_s28, 3 }
0x1f53   : > { %s4341_s13 = scalar_lea.vmem %s8278_s9, %s4696_s29 }
0x1f54   : > { %4384 = vst [vmem:[%s4341_s13] sm:$0xff] %v4383_v13  ;;  %4386 = vst [vmem:[%s4341_s13 + $0x18] sm:$0xff] %v4385_v62 }
0x1f55   : > { %4388 = vst [vmem:[%s4341_s13 + $0x30] sm:$0xff] %v4387_v42  ;;  %4390 = vst [vmem:[%s4341_s13 + $0x48] sm:$0xff] %v4389_v49 }
0x1f56   : > { %4392 = vst [vmem:[%s4341_s13 + $0x60] sm:$0xff] %v4391_v33  ;;  %4394 = vst [vmem:[%s4341_s13 + $0x78] sm:$0xff] %v4393_v61 }
0x1f57   : > { %4396 = vst [vmem:[%s4341_s13 + $0x90] sm:$0xff] %v4395_v36  ;;  %4398 = vst [vmem:[%s4341_s13 + $0xa8] sm:$0xff] %v4397_v3 }
0x1f58 PF: > { %s8279_s25 = sld [smem:[#allocation24_spill]]  ;;  %s8280_s10 = sld [smem:[#allocation30_spill]] }
0x1f59   : > { %p5051_p12 = scmp.ge.s32.totalorder %s6032_s23, 2 }
0x1f5e   : > { %s4410_s11 = sand.u32 1, %s8279_s25   ;;  %p8281_p2 = scmp.ne.s32.totalorder %s8280_s10, 0 }
0x1f5f   : > { %s4411_s26 = scalar_lea.sflag [#allocation8], %s4410_s11 }
0x1f60   : > { %p5041_p8 = pnand %p5051_p12, %p8281_p2 }
0x1f62   : > { %5987 = dma.done.wait (!%p5041_p8), %s4411_s26, 1024  }
0x1f63   : > { %5989 = vsyncadd (!%p5041_p8), %s4411_s26, 4294966272  ;;  %s29_s23 = sadd.s32 1, %s6032_s23   ;;  %s8282_s13 = sld [smem:[#allocation23_spill]] }
0x1f64   : > { %p26_p6 = scmp.ge.s32.totalorder %s29_s23, 8   ;;  %s8283_s4 = smov %s6433_s16 }
0x1f65   : > { %s8284_s14 = smov %s6000_s15  ;;  %s8285_s15 = smov %s6386_s5 }
0x1f66   : > { %s8286_s16 = smov %s6008_s17  ;;  %s8287_s17 = smov %s6012_s18 }
0x1f67   : > { %s8288_s18 = smov %s8283_s4  ;;  %s8289_s19 = smov %s6024_s21 }
0x1f68   : > { %s8290_s20 = smov %s6028_s22  ;;  %s8291_s21 = smov %s8294_s0 }
0x1f69   : > { %s8292_s22 = smov %s8298_s27  ;;  %28 = sbr.rel (!%p26_p6) target bundleno = 19 (0x13), region = 191 }
0x1f70   :  { %4423 = vsyncpa [#allocation7], 1 }
0x1f71   :  { %4425 = vsyncpa [#allocation7 + $0x1], 1 }
0x1f72   :  { %4426 = vsyncpa [#allocation10], 1 }
0x1f73   :  { %4428 = vsyncpa [#allocation10 + $0x1], 1 }
0x1f74   :  { %4429 = vsyncpa [#allocation13], 1 }
0x1f75   :  { %4430 = vsyncpa [#allocation8], 1 }
0x1f76   :  { %4432 = vsyncpa [#allocation8 + $0x1], 1 }

</bundles_post_ra>
